<compile_context>
chip_gen: v7x
topology: tpu7x:2x2x1
jax: 0.10.0
libtpu: 0.0.40
codegen_flags: <defaults>
</compile_context>

<pallas_src>
import math

import jax
import jax.numpy as jnp
from jax import lax
from jax.experimental import pallas as pl
from jax.experimental.pallas import tpu as pltpu

_HIGH = jax.lax.Precision.HIGHEST   # used only by the pure-JAX reference


# ------------------------------- Pallas kernel --------------------------------
def make_encdec_kernel(wmeta, bmeta, Nb, L):
    Lq = L // 4                     # quarter-rate rows per sample (power of two)
    Mq = Nb * Lq                    # rows per grid step

    def kernel(x_ref, w_ref, b_ref, o_ref):
        # ---- per-sample boundary masks, hoisted ONCE (quarter-rate row index) ----
        row = lax.broadcasted_iota(jnp.int32, (Mq, 1), 0)
        qpos = jnp.bitwise_and(row, Lq - 1)            # row position within a sample
        first = qpos == 0                              # first quarter-row of a sample
        last = qpos == Lq - 1                          # last quarter-row of a sample

        def W(name):                                   # packed bf16 weight matrix
            off, rows = wmeta[name]
            return w_ref[off:off + rows, :]

        def Bv(name):                                  # f32 bias row, (1, 128)
            off = bmeta[name]
            return b_ref[off:off + 1, :]

        def shift_prev(v):                             # v[r] <- v[r-1]; 0 at sample start
            return jnp.where(first, 0.0, pltpu.roll(v, shift=1, axis=0))

        def shift_next(v):                             # v[r] <- v[r+1]; 0 at sample end
            # roll by Mq-1 == roll by -1 (pltpu.roll requires non-negative shifts)
            return jnp.where(last, 0.0, pltpu.roll(v, shift=Mq - 1, axis=0))

        def dot(a, w):                                 # bf16 operands, f32 accumulate
            return jnp.dot(a.astype(jnp.bfloat16), w,
                           preferred_element_type=jnp.float32)

        def conv(slab, cph, name):
            # Conv1d(k=3, pad=1) + folded BN on a phase slab, as ONE banded matmul.
            # cph = channels per phase of the input slab.
            width = slab.shape[1]
            lhs = jnp.concatenate([shift_prev(slab[:, width - cph:width]),
                                   slab,
                                   shift_next(slab[:, 0:cph])], axis=-1)
            return dot(lhs, W(name + '/w')) + Bv(name + '/b')

        def res(slab, cin_p, cout_p, name, conv_skip):
            y = jnp.maximum(conv(slab, cin_p, name + '/c1'), 0.0)   # conv+bn+relu
            z = conv(y, cout_p, name + '/c2')                       # conv+bn
            s = (dot(slab, W(name + '/ws')) + Bv(name + '/bs')) if conv_skip else slab
            return jnp.maximum(z + s, 0.0)

        x4 = x_ref[...]                                # (Mq,128) 4-phase full-res slab

        # skip_res1 at full resolution (stays a lane-dense 4-phase slab)
        skip1 = res(x4, 32, 32, 'skip_res1', False)

        # encoder_pool1: adjacent-pair max -> 2-phase half-res slab (32 ch/phase)
        h = jnp.concatenate([jnp.maximum(x4[:, 0:32], x4[:, 32:64]),
                             jnp.maximum(x4[:, 64:96], x4[:, 96:128])], axis=-1)

        h = res(h, 32, 64, 'encoder_res1', True)       # (Mq,128) 2-phase, 64 ch/phase
        skip2 = res(h, 64, 64, 'skip_res2', False)     # (Mq,128) lane-dense skip slab

        # encoder_pool2: max over the two half-res phases -> quarter-res rows
        h = jnp.maximum(h[:, 0:64], h[:, 64:128])      # (Mq, 64)

        h = res(h, 64, 128, 'encoder_res2', True)      # (Mq, 128) quarter-res
        h = res(h, 128, 128, 'mid_res', False)
        h = res(h, 128, 128, 'decoder_res2', False)

        # decoder_upsample2 (ConvTranspose k=2 s=2 + BN + ReLU), taps fused on lanes
        u = jnp.maximum(dot(h, W('decoder_upsample2/w')) + Bv('decoder_upsample2/b'), 0.0)
        u = u + skip2                                  # single 128-lane slab add

        u = res(u, 64, 64, 'decoder_res1', False)      # 2-phase half-res slab

        # decoder_upsample1: block-diagonal fused taps -> 4-phase full-res slab
        up = jnp.maximum(dot(u, W('decoder_upsample1/w')) + Bv('decoder_upsample1/b'), 0.0)

        o_ref[...] = up + skip1                        # ONE unmasked 128-lane store

    return kernel


# ------------------------------- pallas wrapper --------------------------------
def encoder_decoder_pallas(x_nlc, wbuf, wmeta, bbuf, bmeta, Nb=None):
    N, L, C = x_nlc.shape
    assert C == 32 and L % 4 == 0 and (L & (L - 1)) == 0, "need 32 channels, pow2 L >= 4"
    if Nb is None:
        Nb = N                                          # grid = 1 (v5e/v6e default)
    assert N % Nb == 0
    Lq = L // 4
    Mq = Nb * Lq
    assert Mq % 8 == 0

    # lane-dense 4-phase input slab: row (n, q) = [x[n,4q,:] | ... | x[n,4q+3,:]]
    x_slab = x_nlc.reshape(N * Lq, 4 * C)
    Rw, Rb = wbuf.shape[0], bbuf.shape[0]

    kernel = make_encdec_kernel(wmeta, bmeta, Nb, L)
    out = pl.pallas_call(
        kernel,
        out_shape=jax.ShapeDtypeStruct((N * Lq, 128), jnp.float32),
        grid=(N // Nb,),
        in_specs=[
            pl.BlockSpec((Mq, 128), lambda n: (n, 0)),      # activations (f32)
            # Invariant weight/bias slabs: constant index_map -> fetched once
            # (with grid=1 there is never a re-fetch).  On v7x, budget per-core:
            # ~1.1 MB bf16 weights + (x, out, live slabs) against 64 MiB VMEM.
            pl.BlockSpec((Rw, 128), lambda n: (0, 0)),      # packed bf16 weights
            pl.BlockSpec((Rb, 128), lambda n: (0, 0)),      # f32 bias rows
        ],
        out_specs=pl.BlockSpec((Mq, 128), lambda n: (n, 0)),
        compiler_params=pltpu.CompilerParams(dimension_semantics=("parallel",)),
    )(x_slab, wbuf, bbuf)

    # (N*L/4, 128) 4-phase slab -> (N, L, 32)
    return out.reshape(N, L, C)


# ---------------------------- parameter construction ----------------------------
def conv_bn_params(key, cin, cout, k, transposed=False):
    """Conv (or ConvTranspose) + BN1d, BN folded (inference mode). Torch layouts."""
    ks = jax.random.split(key, 6)
    wshape = (cin, cout, k) if transposed else (cout, cin, k)
    w = jax.random.normal(ks[0], wshape, jnp.float32) / math.sqrt(cin * k)
    b = 0.05 * jax.random.normal(ks[1], (cout,), jnp.float32)
    gamma = 1.0 + 0.1 * jax.random.normal(ks[2], (cout,), jnp.float32)
    beta = 0.1 * jax.random.normal(ks[3], (cout,), jnp.float32)
    mean = 0.1 * jax.random.normal(ks[4], (cout,), jnp.float32)
    var = 1.0 + jax.random.uniform(ks[5], (cout,), jnp.float32)
    scale = gamma / jnp.sqrt(var + 1e-5)
    wf = w * (scale[None, :, None] if transposed else scale[:, None, None])
    bf = (b - mean) * scale + beta
    return wf, bf


def res_params(key, cin, cout):
    k1, k2, k3 = jax.random.split(key, 3)
    p = {}
    p['w1'], p['b1'] = conv_bn_params(k1, cin, cout, 3)
    p['w2'], p['b2'] = conv_bn_params(k2, cout, cout, 3)
    if cin != cout:
        p['ws'], p['bs'] = conv_bn_params(k3, cin, cout, 1)
    return p


def up_params(key, cin, cout):
    p = {}
    p['w'], p['b'] = conv_bn_params(key, cin, cout, 2, transposed=True)
    return p


def _band(w, phases):
    """Banded matrix for a k=3 conv applied to a `phases`-phase slab.

    w: folded torch-layout Conv1d weight (cout, cin, 3).
    lhs blocks (left->right): [prev-row last phase, phase 0..P-1, next-row phase 0],
    output blocks: phase 0..P-1; output phase p reads lhs blocks p, p+1, p+2 with
    taps (t-1, t, t+1).
    """
    cout, cin, _ = w.shape
    taps = [w[:, :, d].T for d in range(3)]             # (cin, cout) per tap
    B = jnp.zeros(((phases + 2) * cin, phases * cout), jnp.float32)
    for ph in range(phases):
        for d in range(3):
            B = B.at[(ph + d) * cin:(ph + d + 1) * cin,
                     ph * cout:(ph + 1) * cout].set(taps[d])
    return B


def _bdiag(ws, phases):
    """Block-diagonal replication of a (cin, cout) matrix over `phases` phases."""
    cin, cout = ws.shape
    B = jnp.zeros((phases * cin, phases * cout), jnp.float32)
    for ph in range(phases):
        B = B.at[ph * cin:(ph + 1) * cin, ph * cout:(ph + 1) * cout].set(ws)
    return B


def _kernel_entries(P):
    """Kernel-layout weights (banded / lane-fused, all 128 lanes wide) + f32 biases."""
    wents, bents = [], []

    def add_conv(name, w, b, phases):
        wents.append((name + '/w', _band(w, phases)))
        bents.append((name + '/b', jnp.tile(b, 128 // b.shape[0])))

    def add_res(name, p, phases):
        add_conv(name + '/c1', p['w1'], p['b1'], phases)
        add_conv(name + '/c2', p['w2'], p['b2'], phases)
        if 'ws' in p:
            wents.append((name + '/ws', _bdiag(p['ws'][:, :, 0].T, phases)))
            bents.append((name + '/bs', jnp.tile(p['bs'], 128 // p['bs'].shape[0])))

    def add_up(name, p, in_phases):
        # ConvTranspose(k=2,s=2): fuse the two taps along output lanes, replicate
        # block-diagonally over the input phases.
        u = jnp.concatenate([p['w'][:, :, 0], p['w'][:, :, 1]], axis=1)  # (cin, 2*cout)
        wents.append((name + '/w', _bdiag(u, in_phases)))
        bents.append((name + '/b', jnp.tile(p['b'], 128 // p['b'].shape[0])))

    add_res('skip_res1', P['skip_res1'], 4)
    add_res('encoder_res1', P['encoder_res1'], 2)
    add_res('skip_res2', P['skip_res2'], 2)
    add_res('encoder_res2', P['encoder_res2'], 1)
    add_res('mid_res', P['mid_res'], 1)
    add_res('decoder_res2', P['decoder_res2'], 1)
    add_up('decoder_upsample2', P['decoder_upsample2'], 1)
    add_res('decoder_res1', P['decoder_res1'], 2)
    add_up('decoder_upsample1', P['decoder_upsample1'], 2)
    return wents, bents


def pack_weights(wents):
    """Pack all matmul weights into one (Rw, 128) bf16 buffer with static offsets."""
    meta = {}
    off = 0
    for name, m in wents:
        assert m.shape[1] == 128 and m.shape[0] % 8 == 0, (name, m.shape)
        meta[name] = (off, m.shape[0])
        off += m.shape[0]
    buf = jnp.zeros((off, 128), jnp.float32)
    for name, m in wents:
        o, r = meta[name]
        buf = buf.at[o:o + r, :].set(m)
    return buf.astype(jnp.bfloat16), meta


def pack_biases(bents):
    """Pack bias rows into a small (Rb, 128) f32 buffer, 8-row aligned offsets."""
    meta = {}
    blocks = []
    for i, (name, b) in enumerate(bents):
        meta[name] = 8 * i
        blocks.append(jnp.zeros((8, 128), jnp.float32).at[0].set(b.astype(jnp.float32)))
    return jnp.concatenate(blocks, axis=0), meta


# ------------------------------ pure-JAX reference ------------------------------
def _conv1d_ref(x, w, b, pad):
    y = lax.conv_general_dilated(x, w, window_strides=(1,), padding=[(pad, pad)],
                                 dimension_numbers=('NCH', 'OIH', 'NCH'),
                                 precision=_HIGH)
    return y + b[None, :, None]


def _res_ref(x, p):
    y = jax.nn.relu(_conv1d_ref(x, p['w1'], p['b1'], 1))
    y = _conv1d_ref(y, p['w2'], p['b2'], 1)
    s = _conv1d_ref(x, p['ws'], p['bs'], 0) if 'ws' in p else x
    return jax.nn.relu(y + s)


def _pool_ref(x):
    N, C, L = x.shape
    return jnp.max(x.reshape(N, C, L // 2, 2), axis=-1)


def _up_ref(x, p):
    y = jnp.einsum('ncl,cok->nokl', x, p['w'], precision=_HIGH)     # (N, O, 2, L)
    N, O, K, L = y.shape
    y = jnp.transpose(y, (0, 1, 3, 2)).reshape(N, O, L * K)
    return jax.nn.relu(y + p['b'][None, :, None])


def encdec_ref(x, P):
    skip1 = _res_ref(x, P['skip_res1'])
    h = _pool_ref(x)
    h = _res_ref(h, P['encoder_res1'])
    skip2 = _res_ref(h, P['skip_res2'])
    h = _pool_ref(h)
    h = _res_ref(h, P['encoder_res2'])
    h = _res_ref(h, P['mid_res'])
    h = _res_ref(h, P['decoder_res2'])
    h = _up_ref(h, P['decoder_upsample2'])
    h = h + skip2
    h = _res_ref(h, P['decoder_res1'])
    h = _up_ref(h, P['decoder_upsample1'])
    h = h + skip1
    return h


# ------------------------------------- main -------------------------------------
if __name__ == "__main__":
    key = jax.random.PRNGKey(0)
    kx, kp = jax.random.split(key)
    N, C0, L = 8, 32, 32
    x_ncl = jax.random.normal(kx, (N, C0, L), jnp.float32)       # PyTorch NCL input

    specs = [
        ("skip_res1", 32, 32, "res"),
        ("encoder_res1", 32, 64, "res"),
        ("skip_res2", 64, 64, "res"),
        ("encoder_res2", 64, 128, "res"),
        ("mid_res", 128, 128, "res"),
        ("decoder_res2", 128, 128, "res"),
        ("decoder_upsample2", 128, 64, "up"),
        ("decoder_res1", 64, 64, "res"),
        ("decoder_upsample1", 64, 32, "up"),
    ]
    keys = jax.random.split(kp, len(specs))
    P = {}
    for (name, cin, cout, kind), k in zip(specs, keys):
        P[name] = res_params(k, cin, cout) if kind == "res" else up_params(k, cin, cout)

    wents, bents = _kernel_entries(P)
    wbuf, wmeta = pack_weights(wents)          # bf16 (Rw, 128)
    bbuf, bmeta = pack_biases(bents)           # f32  (Rb, 128)

    ref = encdec_ref(x_ncl, P)                 # (N, 32, L), HIGHEST precision

    x_nlc = jnp.transpose(x_ncl, (0, 2, 1))    # kernel layout (N, L, C)
    out_nlc = encoder_decoder_pallas(x_nlc, wbuf, wmeta, bbuf, bmeta, Nb=N)
    jax.block_until_ready(out_nlc)
    out_ncl = jnp.transpose(out_nlc, (0, 2, 1))

    assert out_ncl.shape == ref.shape, (out_ncl.shape, ref.shape)
    max_ref = float(jnp.max(jnp.abs(ref)))
    max_err = float(jnp.max(jnp.abs(out_ncl - ref)))
    # Kernel matmuls run with bf16 operands on the MXU (f32 accumulation) across
    # ~11 conv layers; the reference runs at HIGHEST precision, so allow a small
    # relative tolerance for accumulated bf16 rounding.
    assert max_err <= 5e-2 * max(1.0, max_ref), f"max abs error {max_err} (ref max {max_ref})"
    print("KERNEL_OK")
</pallas_src>

<mosaic_0001>
module attributes {stable_mosaic.version = 11 : i64} {
  func.func @kernel(%arg0: i32, %arg1: memref<64x128xf32, #tpu.memory_space<vmem>>, %arg2: memref<4288x128xbf16, #tpu.memory_space<vmem>>, %arg3: memref<144x128xf32, #tpu.memory_space<vmem>>, %arg4: memref<64x128xf32, #tpu.memory_space<vmem>>) attributes {dimension_semantics = [#tpu.dimension_semantics<parallel>], iteration_bounds = array<i64: 1>, scalar_prefetch = 0 : i64, scratch_operands = 0 : i64, tpu.core_type = #tpu.core_type<tc>, window_params = [{transform_indices = @transform_0, window_bounds = array<i64: 64, 128>}, {pipeline_mode = #tpu.pipeline_mode<synchronous>, transform_indices = @transform_1, window_bounds = array<i64: 4288, 128>}, {pipeline_mode = #tpu.pipeline_mode<synchronous>, transform_indices = @transform_2, window_bounds = array<i64: 144, 128>}, {transform_indices = @transform_3, window_bounds = array<i64: 64, 128>}]} {
    %0 = tpu.iota {dimensions = array<i32: 0>} : vector<64x1xi32>
    %c7_i32 = arith.constant 7 : i32
    %1 = vector.broadcast %c7_i32 : i32 to vector<64x1xi32>
    %2 = arith.andi %0, %1 : vector<64x1xi32>
    %c0_i32 = arith.constant 0 : i32
    %3 = vector.broadcast %c0_i32 : i32 to vector<64x1xi32>
    %4 = arith.cmpi eq, %2, %3 : vector<64x1xi32>
    %c7_i32_0 = arith.constant 7 : i32
    %5 = vector.broadcast %c7_i32_0 : i32 to vector<64x1xi32>
    %6 = arith.cmpi eq, %2, %5 : vector<64x1xi32>
    %c0 = arith.constant 0 : index
    %c0_1 = arith.constant 0 : index
    %7 = vector.load %arg1[%c0, %c0_1] : memref<64x128xf32, #tpu.memory_space<vmem>>, vector<64x128xf32>
    %8 = vector.extract_strided_slice %7 {offsets = [0, 96], sizes = [64, 32], strides = [1, 1]} : vector<64x128xf32> to vector<64x32xf32>
    %c1_i32 = arith.constant 1 : i32
    %9 = tpu.dynamic_rotate %8 by %c1_i32 dim 0 : vector<64x32xf32>, i32 -> vector<64x32xf32>
    %cst = arith.constant 0.000000e+00 : f32
    %10 = vector.shape_cast %4 : vector<64x1xi1> to vector<64x1xi1>
    %11 = vector.broadcast %10 : vector<64x1xi1> to vector<64x32xi1>
    %12 = vector.broadcast %cst : f32 to vector<64x32xf32>
    %13 = arith.select %11, %12, %9 : vector<64x32xi1>, vector<64x32xf32>
    %14 = vector.extract_strided_slice %7 {offsets = [0, 0], sizes = [64, 32], strides = [1, 1]} : vector<64x128xf32> to vector<64x32xf32>
    %c63_i32 = arith.constant 63 : i32
    %15 = tpu.dynamic_rotate %14 by %c63_i32 dim 0 : vector<64x32xf32>, i32 -> vector<64x32xf32>
    %cst_2 = arith.constant 0.000000e+00 : f32
    %16 = vector.shape_cast %6 : vector<64x1xi1> to vector<64x1xi1>
    %17 = vector.broadcast %16 : vector<64x1xi1> to vector<64x32xi1>
    %18 = vector.broadcast %cst_2 : f32 to vector<64x32xf32>
    %19 = arith.select %17, %18, %15 : vector<64x32xi1>, vector<64x32xf32>
    %20 = tpu.concatenate %13, %7, %19 in 1 : vector<64x32xf32>, vector<64x128xf32>, vector<64x32xf32> -> vector<64x192xf32>
    %c0_3 = arith.constant 0 : index
    %c0_4 = arith.constant 0 : index
    %21 = vector.load %arg2[%c0_3, %c0_4] : memref<4288x128xbf16, #tpu.memory_space<vmem>>, vector<192x128xbf16>
    %22 = arith.truncf %20 : vector<64x192xf32> to vector<64x192xbf16>
    %cst_5 = arith.constant dense<0.000000e+00> : vector<64x128xf32>
    %23 = tpu.matmul %22, %21, %cst_5 {dimension_numbers = #tpu.dot_dimension_numbers<[1], [0], [0], [1], [0, 0, 1, 1], [], []>} : vector<64x192xbf16>, vector<192x128xbf16>, vector<64x128xf32> -> vector<64x128xf32>
    %c0_6 = arith.constant 0 : index
    %c0_7 = arith.constant 0 : index
    %24 = vector.load %arg3[%c0_6, %c0_7] : memref<144x128xf32, #tpu.memory_space<vmem>>, vector<1x128xf32>
    %25 = vector.broadcast %24 : vector<1x128xf32> to vector<64x128xf32>
    %26 = arith.addf %23, %25 : vector<64x128xf32>
    %cst_8 = arith.constant 0.000000e+00 : f32
    %27 = vector.broadcast %cst_8 : f32 to vector<64x128xf32>
    %28 = arith.maximumf %26, %27 : vector<64x128xf32>
    %29 = vector.extract_strided_slice %28 {offsets = [0, 96], sizes = [64, 32], strides = [1, 1]} : vector<64x128xf32> to vector<64x32xf32>
    %c1_i32_9 = arith.constant 1 : i32
    %30 = tpu.dynamic_rotate %29 by %c1_i32_9 dim 0 : vector<64x32xf32>, i32 -> vector<64x32xf32>
    %cst_10 = arith.constant 0.000000e+00 : f32
    %31 = vector.shape_cast %4 : vector<64x1xi1> to vector<64x1xi1>
    %32 = vector.broadcast %31 : vector<64x1xi1> to vector<64x32xi1>
    %33 = vector.broadcast %cst_10 : f32 to vector<64x32xf32>
    %34 = arith.select %32, %33, %30 : vector<64x32xi1>, vector<64x32xf32>
    %35 = vector.extract_strided_slice %28 {offsets = [0, 0], sizes = [64, 32], strides = [1, 1]} : vector<64x128xf32> to vector<64x32xf32>
    %c63_i32_11 = arith.constant 63 : i32
    %36 = tpu.dynamic_rotate %35 by %c63_i32_11 dim 0 : vector<64x32xf32>, i32 -> vector<64x32xf32>
    %cst_12 = arith.constant 0.000000e+00 : f32
    %37 = vector.shape_cast %6 : vector<64x1xi1> to vector<64x1xi1>
    %38 = vector.broadcast %37 : vector<64x1xi1> to vector<64x32xi1>
    %39 = vector.broadcast %cst_12 : f32 to vector<64x32xf32>
    %40 = arith.select %38, %39, %36 : vector<64x32xi1>, vector<64x32xf32>
    %41 = tpu.concatenate %34, %28, %40 in 1 : vector<64x32xf32>, vector<64x128xf32>, vector<64x32xf32> -> vector<64x192xf32>
    %c192 = arith.constant 192 : index
    %c0_13 = arith.constant 0 : index
    %42 = vector.load %arg2[%c192, %c0_13] : memref<4288x128xbf16, #tpu.memory_space<vmem>>, vector<192x128xbf16>
    %43 = arith.truncf %41 : vector<64x192xf32> to vector<64x192xbf16>
    %cst_14 = arith.constant dense<0.000000e+00> : vector<64x128xf32>
    %44 = tpu.matmul %43, %42, %cst_14 {dimension_numbers = #tpu.dot_dimension_numbers<[1], [0], [0], [1], [0, 0, 1, 1], [], []>} : vector<64x192xbf16>, vector<192x128xbf16>, vector<64x128xf32> -> vector<64x128xf32>
    %c8 = arith.constant 8 : index
    %c0_15 = arith.constant 0 : index
    %45 = vector.load %arg3[%c8, %c0_15] : memref<144x128xf32, #tpu.memory_space<vmem>>, vector<1x128xf32>
    %46 = vector.broadcast %45 : vector<1x128xf32> to vector<64x128xf32>
    %47 = arith.addf %44, %46 : vector<64x128xf32>
    %48 = arith.addf %47, %7 : vector<64x128xf32>
    %cst_16 = arith.constant 0.000000e+00 : f32
    %49 = vector.broadcast %cst_16 : f32 to vector<64x128xf32>
    %50 = arith.maximumf %48, %49 : vector<64x128xf32>
    %51 = vector.extract_strided_slice %7 {offsets = [0, 0], sizes = [64, 32], strides = [1, 1]} : vector<64x128xf32> to vector<64x32xf32>
    %52 = vector.extract_strided_slice %7 {offsets = [0, 32], sizes = [64, 32], strides = [1, 1]} : vector<64x128xf32> to vector<64x32xf32>
    %53 = arith.maximumf %51, %52 : vector<64x32xf32>
    %54 = vector.extract_strided_slice %7 {offsets = [0, 64], sizes = [64, 32], strides = [1, 1]} : vector<64x128xf32> to vector<64x32xf32>
    %55 = vector.extract_strided_slice %7 {offsets = [0, 96], sizes = [64, 32], strides = [1, 1]} : vector<64x128xf32> to vector<64x32xf32>
    %56 = arith.maximumf %54, %55 : vector<64x32xf32>
    %57 = tpu.concatenate %53, %56 in 1 : vector<64x32xf32>, vector<64x32xf32> -> vector<64x64xf32>
    %58 = vector.extract_strided_slice %57 {offsets = [0, 32], sizes = [64, 32], strides = [1, 1]} : vector<64x64xf32> to vector<64x32xf32>
    %c1_i32_17 = arith.constant 1 : i32
    %59 = tpu.dynamic_rotate %58 by %c1_i32_17 dim 0 : vector<64x32xf32>, i32 -> vector<64x32xf32>
    %cst_18 = arith.constant 0.000000e+00 : f32
    %60 = vector.shape_cast %4 : vector<64x1xi1> to vector<64x1xi1>
    %61 = vector.broadcast %60 : vector<64x1xi1> to vector<64x32xi1>
    %62 = vector.broadcast %cst_18 : f32 to vector<64x32xf32>
    %63 = arith.select %61, %62, %59 : vector<64x32xi1>, vector<64x32xf32>
    %64 = vector.extract_strided_slice %57 {offsets = [0, 0], sizes = [64, 32], strides = [1, 1]} : vector<64x64xf32> to vector<64x32xf32>
    %c63_i32_19 = arith.constant 63 : i32
    %65 = tpu.dynamic_rotate %64 by %c63_i32_19 dim 0 : vector<64x32xf32>, i32 -> vector<64x32xf32>
    %cst_20 = arith.constant 0.000000e+00 : f32
    %66 = vector.shape_cast %6 : vector<64x1xi1> to vector<64x1xi1>
    %67 = vector.broadcast %66 : vector<64x1xi1> to vector<64x32xi1>
    %68 = vector.broadcast %cst_20 : f32 to vector<64x32xf32>
    %69 = arith.select %67, %68, %65 : vector<64x32xi1>, vector<64x32xf32>
    %70 = tpu.concatenate %63, %57, %69 in 1 : vector<64x32xf32>, vector<64x64xf32>, vector<64x32xf32> -> vector<64x128xf32>
    %c384 = arith.constant 384 : index
    %c0_21 = arith.constant 0 : index
    %71 = vector.load %arg2[%c384, %c0_21] : memref<4288x128xbf16, #tpu.memory_space<vmem>>, vector<128x128xbf16>
    %72 = arith.truncf %70 : vector<64x128xf32> to vector<64x128xbf16>
    %cst_22 = arith.constant dense<0.000000e+00> : vector<64x128xf32>
    %73 = tpu.matmul %72, %71, %cst_22 {dimension_numbers = #tpu.dot_dimension_numbers<[1], [0], [0], [1], [0, 0, 1, 1], [], []>} : vector<64x128xbf16>, vector<128x128xbf16>, vector<64x128xf32> -> vector<64x128xf32>
    %c16 = arith.constant 16 : index
    %c0_23 = arith.constant 0 : index
    %74 = vector.load %arg3[%c16, %c0_23] : memref<144x128xf32, #tpu.memory_space<vmem>>, vector<1x128xf32>
    %75 = vector.broadcast %74 : vector<1x128xf32> to vector<64x128xf32>
    %76 = arith.addf %73, %75 : vector<64x128xf32>
    %cst_24 = arith.constant 0.000000e+00 : f32
    %77 = vector.broadcast %cst_24 : f32 to vector<64x128xf32>
    %78 = arith.maximumf %76, %77 : vector<64x128xf32>
    %79 = vector.extract_strided_slice %78 {offsets = [0, 64], sizes = [64, 64], strides = [1, 1]} : vector<64x128xf32> to vector<64x64xf32>
    %c1_i32_25 = arith.constant 1 : i32
    %80 = tpu.dynamic_rotate %79 by %c1_i32_25 dim 0 : vector<64x64xf32>, i32 -> vector<64x64xf32>
    %cst_26 = arith.constant 0.000000e+00 : f32
    %81 = vector.shape_cast %4 : vector<64x1xi1> to vector<64x1xi1>
    %82 = vector.broadcast %81 : vector<64x1xi1> to vector<64x64xi1>
    %83 = vector.broadcast %cst_26 : f32 to vector<64x64xf32>
    %84 = arith.select %82, %83, %80 : vector<64x64xi1>, vector<64x64xf32>
    %85 = vector.extract_strided_slice %78 {offsets = [0, 0], sizes = [64, 64], strides = [1, 1]} : vector<64x128xf32> to vector<64x64xf32>
    %c63_i32_27 = arith.constant 63 : i32
    %86 = tpu.dynamic_rotate %85 by %c63_i32_27 dim 0 : vector<64x64xf32>, i32 -> vector<64x64xf32>
    %cst_28 = arith.constant 0.000000e+00 : f32
    %87 = vector.shape_cast %6 : vector<64x1xi1> to vector<64x1xi1>
    %88 = vector.broadcast %87 : vector<64x1xi1> to vector<64x64xi1>
    %89 = vector.broadcast %cst_28 : f32 to vector<64x64xf32>
    %90 = arith.select %88, %89, %86 : vector<64x64xi1>, vector<64x64xf32>
    %91 = tpu.concatenate %84, %78, %90 in 1 : vector<64x64xf32>, vector<64x128xf32>, vector<64x64xf32> -> vector<64x256xf32>
    %c512 = arith.constant 512 : index
    %c0_29 = arith.constant 0 : index
    %92 = vector.load %arg2[%c512, %c0_29] : memref<4288x128xbf16, #tpu.memory_space<vmem>>, vector<256x128xbf16>
    %93 = arith.truncf %91 : vector<64x256xf32> to vector<64x256xbf16>
    %cst_30 = arith.constant dense<0.000000e+00> : vector<64x128xf32>
    %94 = tpu.matmul %93, %92, %cst_30 {dimension_numbers = #tpu.dot_dimension_numbers<[1], [0], [0], [1], [0, 0, 1, 1], [], []>} : vector<64x256xbf16>, vector<256x128xbf16>, vector<64x128xf32> -> vector<64x128xf32>
    %c24 = arith.constant 24 : index
    %c0_31 = arith.constant 0 : index
    %95 = vector.load %arg3[%c24, %c0_31] : memref<144x128xf32, #tpu.memory_space<vmem>>, vector<1x128xf32>
    %96 = vector.broadcast %95 : vector<1x128xf32> to vector<64x128xf32>
    %97 = arith.addf %94, %96 : vector<64x128xf32>
    %c768 = arith.constant 768 : index
    %c0_32 = arith.constant 0 : index
    %98 = vector.load %arg2[%c768, %c0_32] : memref<4288x128xbf16, #tpu.memory_space<vmem>>, vector<64x128xbf16>
    %99 = arith.truncf %57 : vector<64x64xf32> to vector<64x64xbf16>
    %cst_33 = arith.constant dense<0.000000e+00> : vector<64x128xf32>
    %100 = tpu.matmul %99, %98, %cst_33 {dimension_numbers = #tpu.dot_dimension_numbers<[1], [0], [0], [1], [0, 0, 1, 1], [], []>} : vector<64x64xbf16>, vector<64x128xbf16>, vector<64x128xf32> -> vector<64x128xf32>
    %c32 = arith.constant 32 : index
    %c0_34 = arith.constant 0 : index
    %101 = vector.load %arg3[%c32, %c0_34] : memref<144x128xf32, #tpu.memory_space<vmem>>, vector<1x128xf32>
    %102 = vector.broadcast %101 : vector<1x128xf32> to vector<64x128xf32>
    %103 = arith.addf %100, %102 : vector<64x128xf32>
    %104 = arith.addf %97, %103 : vector<64x128xf32>
    %cst_35 = arith.constant 0.000000e+00 : f32
    %105 = vector.broadcast %cst_35 : f32 to vector<64x128xf32>
    %106 = arith.maximumf %104, %105 : vector<64x128xf32>
    %107 = vector.extract_strided_slice %106 {offsets = [0, 64], sizes = [64, 64], strides = [1, 1]} : vector<64x128xf32> to vector<64x64xf32>
    %c1_i32_36 = arith.constant 1 : i32
    %108 = tpu.dynamic_rotate %107 by %c1_i32_36 dim 0 : vector<64x64xf32>, i32 -> vector<64x64xf32>
    %cst_37 = arith.constant 0.000000e+00 : f32
    %109 = vector.shape_cast %4 : vector<64x1xi1> to vector<64x1xi1>
    %110 = vector.broadcast %109 : vector<64x1xi1> to vector<64x64xi1>
    %111 = vector.broadcast %cst_37 : f32 to vector<64x64xf32>
    %112 = arith.select %110, %111, %108 : vector<64x64xi1>, vector<64x64xf32>
    %113 = vector.extract_strided_slice %106 {offsets = [0, 0], sizes = [64, 64], strides = [1, 1]} : vector<64x128xf32> to vector<64x64xf32>
    %c63_i32_38 = arith.constant 63 : i32
    %114 = tpu.dynamic_rotate %113 by %c63_i32_38 dim 0 : vector<64x64xf32>, i32 -> vector<64x64xf32>
    %cst_39 = arith.constant 0.000000e+00 : f32
    %115 = vector.shape_cast %6 : vector<64x1xi1> to vector<64x1xi1>
    %116 = vector.broadcast %115 : vector<64x1xi1> to vector<64x64xi1>
    %117 = vector.broadcast %cst_39 : f32 to vector<64x64xf32>
    %118 = arith.select %116, %117, %114 : vector<64x64xi1>, vector<64x64xf32>
    %119 = tpu.concatenate %112, %106, %118 in 1 : vector<64x64xf32>, vector<64x128xf32>, vector<64x64xf32> -> vector<64x256xf32>
    %c832 = arith.constant 832 : index
    %c0_40 = arith.constant 0 : index
    %120 = vector.load %arg2[%c832, %c0_40] : memref<4288x128xbf16, #tpu.memory_space<vmem>>, vector<256x128xbf16>
    %121 = arith.truncf %119 : vector<64x256xf32> to vector<64x256xbf16>
    %cst_41 = arith.constant dense<0.000000e+00> : vector<64x128xf32>
    %122 = tpu.matmul %121, %120, %cst_41 {dimension_numbers = #tpu.dot_dimension_numbers<[1], [0], [0], [1], [0, 0, 1, 1], [], []>} : vector<64x256xbf16>, vector<256x128xbf16>, vector<64x128xf32> -> vector<64x128xf32>
    %c40 = arith.constant 40 : index
    %c0_42 = arith.constant 0 : index
    %123 = vector.load %arg3[%c40, %c0_42] : memref<144x128xf32, #tpu.memory_space<vmem>>, vector<1x128xf32>
    %124 = vector.broadcast %123 : vector<1x128xf32> to vector<64x128xf32>
    %125 = arith.addf %122, %124 : vector<64x128xf32>
    %cst_43 = arith.constant 0.000000e+00 : f32
    %126 = vector.broadcast %cst_43 : f32 to vector<64x128xf32>
    %127 = arith.maximumf %125, %126 : vector<64x128xf32>
    %128 = vector.extract_strided_slice %127 {offsets = [0, 64], sizes = [64, 64], strides = [1, 1]} : vector<64x128xf32> to vector<64x64xf32>
    %c1_i32_44 = arith.constant 1 : i32
    %129 = tpu.dynamic_rotate %128 by %c1_i32_44 dim 0 : vector<64x64xf32>, i32 -> vector<64x64xf32>
    %cst_45 = arith.constant 0.000000e+00 : f32
    %130 = vector.shape_cast %4 : vector<64x1xi1> to vector<64x1xi1>
    %131 = vector.broadcast %130 : vector<64x1xi1> to vector<64x64xi1>
    %132 = vector.broadcast %cst_45 : f32 to vector<64x64xf32>
    %133 = arith.select %131, %132, %129 : vector<64x64xi1>, vector<64x64xf32>
    %134 = vector.extract_strided_slice %127 {offsets = [0, 0], sizes = [64, 64], strides = [1, 1]} : vector<64x128xf32> to vector<64x64xf32>
    %c63_i32_46 = arith.constant 63 : i32
    %135 = tpu.dynamic_rotate %134 by %c63_i32_46 dim 0 : vector<64x64xf32>, i32 -> vector<64x64xf32>
    %cst_47 = arith.constant 0.000000e+00 : f32
    %136 = vector.shape_cast %6 : vector<64x1xi1> to vector<64x1xi1>
    %137 = vector.broadcast %136 : vector<64x1xi1> to vector<64x64xi1>
    %138 = vector.broadcast %cst_47 : f32 to vector<64x64xf32>
    %139 = arith.select %137, %138, %135 : vector<64x64xi1>, vector<64x64xf32>
    %140 = tpu.concatenate %133, %127, %139 in 1 : vector<64x64xf32>, vector<64x128xf32>, vector<64x64xf32> -> vector<64x256xf32>
    %c1088 = arith.constant 1088 : index
    %c0_48 = arith.constant 0 : index
    %141 = vector.load %arg2[%c1088, %c0_48] : memref<4288x128xbf16, #tpu.memory_space<vmem>>, vector<256x128xbf16>
    %142 = arith.truncf %140 : vector<64x256xf32> to vector<64x256xbf16>
    %cst_49 = arith.constant dense<0.000000e+00> : vector<64x128xf32>
    %143 = tpu.matmul %142, %141, %cst_49 {dimension_numbers = #tpu.dot_dimension_numbers<[1], [0], [0], [1], [0, 0, 1, 1], [], []>} : vector<64x256xbf16>, vector<256x128xbf16>, vector<64x128xf32> -> vector<64x128xf32>
    %c48 = arith.constant 48 : index
    %c0_50 = arith.constant 0 : index
    %144 = vector.load %arg3[%c48, %c0_50] : memref<144x128xf32, #tpu.memory_space<vmem>>, vector<1x128xf32>
    %145 = vector.broadcast %144 : vector<1x128xf32> to vector<64x128xf32>
    %146 = arith.addf %143, %145 : vector<64x128xf32>
    %147 = arith.addf %146, %106 : vector<64x128xf32>
    %cst_51 = arith.constant 0.000000e+00 : f32
    %148 = vector.broadcast %cst_51 : f32 to vector<64x128xf32>
    %149 = arith.maximumf %147, %148 : vector<64x128xf32>
    %150 = vector.extract_strided_slice %106 {offsets = [0, 0], sizes = [64, 64], strides = [1, 1]} : vector<64x128xf32> to vector<64x64xf32>
    %151 = vector.extract_strided_slice %106 {offsets = [0, 64], sizes = [64, 64], strides = [1, 1]} : vector<64x128xf32> to vector<64x64xf32>
    %152 = arith.maximumf %150, %151 : vector<64x64xf32>
    %c1_i32_52 = arith.constant 1 : i32
    %153 = tpu.dynamic_rotate %152 by %c1_i32_52 dim 0 : vector<64x64xf32>, i32 -> vector<64x64xf32>
    %cst_53 = arith.constant 0.000000e+00 : f32
    %154 = vector.shape_cast %4 : vector<64x1xi1> to vector<64x1xi1>
    %155 = vector.broadcast %154 : vector<64x1xi1> to vector<64x64xi1>
    %156 = vector.broadcast %cst_53 : f32 to vector<64x64xf32>
    %157 = arith.select %155, %156, %153 : vector<64x64xi1>, vector<64x64xf32>
    %c63_i32_54 = arith.constant 63 : i32
    %158 = tpu.dynamic_rotate %152 by %c63_i32_54 dim 0 : vector<64x64xf32>, i32 -> vector<64x64xf32>
    %cst_55 = arith.constant 0.000000e+00 : f32
    %159 = vector.shape_cast %6 : vector<64x1xi1> to vector<64x1xi1>
    %160 = vector.broadcast %159 : vector<64x1xi1> to vector<64x64xi1>
    %161 = vector.broadcast %cst_55 : f32 to vector<64x64xf32>
    %162 = arith.select %160, %161, %158 : vector<64x64xi1>, vector<64x64xf32>
    %163 = tpu.concatenate %157, %152, %162 in 1 : vector<64x64xf32>, vector<64x64xf32>, vector<64x64xf32> -> vector<64x192xf32>
    %c1344 = arith.constant 1344 : index
    %c0_56 = arith.constant 0 : index
    %164 = vector.load %arg2[%c1344, %c0_56] : memref<4288x128xbf16, #tpu.memory_space<vmem>>, vector<192x128xbf16>
    %165 = arith.truncf %163 : vector<64x192xf32> to vector<64x192xbf16>
    %cst_57 = arith.constant dense<0.000000e+00> : vector<64x128xf32>
    %166 = tpu.matmul %165, %164, %cst_57 {dimension_numbers = #tpu.dot_dimension_numbers<[1], [0], [0], [1], [0, 0, 1, 1], [], []>} : vector<64x192xbf16>, vector<192x128xbf16>, vector<64x128xf32> -> vector<64x128xf32>
    %c56 = arith.constant 56 : index
    %c0_58 = arith.constant 0 : index
    %167 = vector.load %arg3[%c56, %c0_58] : memref<144x128xf32, #tpu.memory_space<vmem>>, vector<1x128xf32>
    %168 = vector.broadcast %167 : vector<1x128xf32> to vector<64x128xf32>
    %169 = arith.addf %166, %168 : vector<64x128xf32>
    %cst_59 = arith.constant 0.000000e+00 : f32
    %170 = vector.broadcast %cst_59 : f32 to vector<64x128xf32>
    %171 = arith.maximumf %169, %170 : vector<64x128xf32>
    %c1_i32_60 = arith.constant 1 : i32
    %172 = tpu.dynamic_rotate %171 by %c1_i32_60 dim 0 : vector<64x128xf32>, i32 -> vector<64x128xf32>
    %cst_61 = arith.constant 0.000000e+00 : f32
    %173 = vector.shape_cast %4 : vector<64x1xi1> to vector<64x1xi1>
    %174 = vector.broadcast %173 : vector<64x1xi1> to vector<64x128xi1>
    %175 = vector.broadcast %cst_61 : f32 to vector<64x128xf32>
    %176 = arith.select %174, %175, %172 : vector<64x128xi1>, vector<64x128xf32>
    %c63_i32_62 = arith.constant 63 : i32
    %177 = tpu.dynamic_rotate %171 by %c63_i32_62 dim 0 : vector<64x128xf32>, i32 -> vector<64x128xf32>
    %cst_63 = arith.constant 0.000000e+00 : f32
    %178 = vector.shape_cast %6 : vector<64x1xi1> to vector<64x1xi1>
    %179 = vector.broadcast %178 : vector<64x1xi1> to vector<64x128xi1>
    %180 = vector.broadcast %cst_63 : f32 to vector<64x128xf32>
    %181 = arith.select %179, %180, %177 : vector<64x128xi1>, vector<64x128xf32>
    %182 = tpu.concatenate %176, %171, %181 in 1 : vector<64x128xf32>, vector<64x128xf32>, vector<64x128xf32> -> vector<64x384xf32>
    %c1536 = arith.constant 1536 : index
    %c0_64 = arith.constant 0 : index
    %183 = vector.load %arg2[%c1536, %c0_64] : memref<4288x128xbf16, #tpu.memory_space<vmem>>, vector<384x128xbf16>
    %184 = arith.truncf %182 : vector<64x384xf32> to vector<64x384xbf16>
    %cst_65 = arith.constant dense<0.000000e+00> : vector<64x128xf32>
    %185 = tpu.matmul %184, %183, %cst_65 {dimension_numbers = #tpu.dot_dimension_numbers<[1], [0], [0], [1], [0, 0, 1, 1], [], []>} : vector<64x384xbf16>, vector<384x128xbf16>, vector<64x128xf32> -> vector<64x128xf32>
    %c64 = arith.constant 64 : index
    %c0_66 = arith.constant 0 : index
    %186 = vector.load %arg3[%c64, %c0_66] : memref<144x128xf32, #tpu.memory_space<vmem>>, vector<1x128xf32>
    %187 = vector.broadcast %186 : vector<1x128xf32> to vector<64x128xf32>
    %188 = arith.addf %185, %187 : vector<64x128xf32>
    %c1920 = arith.constant 1920 : index
    %c0_67 = arith.constant 0 : index
    %189 = vector.load %arg2[%c1920, %c0_67] : memref<4288x128xbf16, #tpu.memory_space<vmem>>, vector<64x128xbf16>
    %190 = arith.truncf %152 : vector<64x64xf32> to vector<64x64xbf16>
    %cst_68 = arith.constant dense<0.000000e+00> : vector<64x128xf32>
    %191 = tpu.matmul %190, %189, %cst_68 {dimension_numbers = #tpu.dot_dimension_numbers<[1], [0], [0], [1], [0, 0, 1, 1], [], []>} : vector<64x64xbf16>, vector<64x128xbf16>, vector<64x128xf32> -> vector<64x128xf32>
    %c72 = arith.constant 72 : index
    %c0_69 = arith.constant 0 : index
    %192 = vector.load %arg3[%c72, %c0_69] : memref<144x128xf32, #tpu.memory_space<vmem>>, vector<1x128xf32>
    %193 = vector.broadcast %192 : vector<1x128xf32> to vector<64x128xf32>
    %194 = arith.addf %191, %193 : vector<64x128xf32>
    %195 = arith.addf %188, %194 : vector<64x128xf32>
    %cst_70 = arith.constant 0.000000e+00 : f32
    %196 = vector.broadcast %cst_70 : f32 to vector<64x128xf32>
    %197 = arith.maximumf %195, %196 : vector<64x128xf32>
    %c1_i32_71 = arith.constant 1 : i32
    %198 = tpu.dynamic_rotate %197 by %c1_i32_71 dim 0 : vector<64x128xf32>, i32 -> vector<64x128xf32>
    %cst_72 = arith.constant 0.000000e+00 : f32
    %199 = vector.shape_cast %4 : vector<64x1xi1> to vector<64x1xi1>
    %200 = vector.broadcast %199 : vector<64x1xi1> to vector<64x128xi1>
    %201 = vector.broadcast %cst_72 : f32 to vector<64x128xf32>
    %202 = arith.select %200, %201, %198 : vector<64x128xi1>, vector<64x128xf32>
    %c63_i32_73 = arith.constant 63 : i32
    %203 = tpu.dynamic_rotate %197 by %c63_i32_73 dim 0 : vector<64x128xf32>, i32 -> vector<64x128xf32>
    %cst_74 = arith.constant 0.000000e+00 : f32
    %204 = vector.shape_cast %6 : vector<64x1xi1> to vector<64x1xi1>
    %205 = vector.broadcast %204 : vector<64x1xi1> to vector<64x128xi1>
    %206 = vector.broadcast %cst_74 : f32 to vector<64x128xf32>
    %207 = arith.select %205, %206, %203 : vector<64x128xi1>, vector<64x128xf32>
    %208 = tpu.concatenate %202, %197, %207 in 1 : vector<64x128xf32>, vector<64x128xf32>, vector<64x128xf32> -> vector<64x384xf32>
    %c1984 = arith.constant 1984 : index
    %c0_75 = arith.constant 0 : index
    %209 = vector.load %arg2[%c1984, %c0_75] : memref<4288x128xbf16, #tpu.memory_space<vmem>>, vector<384x128xbf16>
    %210 = arith.truncf %208 : vector<64x384xf32> to vector<64x384xbf16>
    %cst_76 = arith.constant dense<0.000000e+00> : vector<64x128xf32>
    %211 = tpu.matmul %210, %209, %cst_76 {dimension_numbers = #tpu.dot_dimension_numbers<[1], [0], [0], [1], [0, 0, 1, 1], [], []>} : vector<64x384xbf16>, vector<384x128xbf16>, vector<64x128xf32> -> vector<64x128xf32>
    %c80 = arith.constant 80 : index
    %c0_77 = arith.constant 0 : index
    %212 = vector.load %arg3[%c80, %c0_77] : memref<144x128xf32, #tpu.memory_space<vmem>>, vector<1x128xf32>
    %213 = vector.broadcast %212 : vector<1x128xf32> to vector<64x128xf32>
    %214 = arith.addf %211, %213 : vector<64x128xf32>
    %cst_78 = arith.constant 0.000000e+00 : f32
    %215 = vector.broadcast %cst_78 : f32 to vector<64x128xf32>
    %216 = arith.maximumf %214, %215 : vector<64x128xf32>
    %c1_i32_79 = arith.constant 1 : i32
    %217 = tpu.dynamic_rotate %216 by %c1_i32_79 dim 0 : vector<64x128xf32>, i32 -> vector<64x128xf32>
    %cst_80 = arith.constant 0.000000e+00 : f32
    %218 = vector.shape_cast %4 : vector<64x1xi1> to vector<64x1xi1>
    %219 = vector.broadcast %218 : vector<64x1xi1> to vector<64x128xi1>
    %220 = vector.broadcast %cst_80 : f32 to vector<64x128xf32>
    %221 = arith.select %219, %220, %217 : vector<64x128xi1>, vector<64x128xf32>
    %c63_i32_81 = arith.constant 63 : i32
    %222 = tpu.dynamic_rotate %216 by %c63_i32_81 dim 0 : vector<64x128xf32>, i32 -> vector<64x128xf32>
    %cst_82 = arith.constant 0.000000e+00 : f32
    %223 = vector.shape_cast %6 : vector<64x1xi1> to vector<64x1xi1>
    %224 = vector.broadcast %223 : vector<64x1xi1> to vector<64x128xi1>
    %225 = vector.broadcast %cst_82 : f32 to vector<64x128xf32>
    %226 = arith.select %224, %225, %222 : vector<64x128xi1>, vector<64x128xf32>
    %227 = tpu.concatenate %221, %216, %226 in 1 : vector<64x128xf32>, vector<64x128xf32>, vector<64x128xf32> -> vector<64x384xf32>
    %c2368 = arith.constant 2368 : index
    %c0_83 = arith.constant 0 : index
    %228 = vector.load %arg2[%c2368, %c0_83] : memref<4288x128xbf16, #tpu.memory_space<vmem>>, vector<384x128xbf16>
    %229 = arith.truncf %227 : vector<64x384xf32> to vector<64x384xbf16>
    %cst_84 = arith.constant dense<0.000000e+00> : vector<64x128xf32>
    %230 = tpu.matmul %229, %228, %cst_84 {dimension_numbers = #tpu.dot_dimension_numbers<[1], [0], [0], [1], [0, 0, 1, 1], [], []>} : vector<64x384xbf16>, vector<384x128xbf16>, vector<64x128xf32> -> vector<64x128xf32>
    %c88 = arith.constant 88 : index
    %c0_85 = arith.constant 0 : index
    %231 = vector.load %arg3[%c88, %c0_85] : memref<144x128xf32, #tpu.memory_space<vmem>>, vector<1x128xf32>
    %232 = vector.broadcast %231 : vector<1x128xf32> to vector<64x128xf32>
    %233 = arith.addf %230, %232 : vector<64x128xf32>
    %234 = arith.addf %233, %197 : vector<64x128xf32>
    %cst_86 = arith.constant 0.000000e+00 : f32
    %235 = vector.broadcast %cst_86 : f32 to vector<64x128xf32>
    %236 = arith.maximumf %234, %235 : vector<64x128xf32>
    %c1_i32_87 = arith.constant 1 : i32
    %237 = tpu.dynamic_rotate %236 by %c1_i32_87 dim 0 : vector<64x128xf32>, i32 -> vector<64x128xf32>
    %cst_88 = arith.constant 0.000000e+00 : f32
    %238 = vector.shape_cast %4 : vector<64x1xi1> to vector<64x1xi1>
    %239 = vector.broadcast %238 : vector<64x1xi1> to vector<64x128xi1>
    %240 = vector.broadcast %cst_88 : f32 to vector<64x128xf32>
    %241 = arith.select %239, %240, %237 : vector<64x128xi1>, vector<64x128xf32>
    %c63_i32_89 = arith.constant 63 : i32
    %242 = tpu.dynamic_rotate %236 by %c63_i32_89 dim 0 : vector<64x128xf32>, i32 -> vector<64x128xf32>
    %cst_90 = arith.constant 0.000000e+00 : f32
    %243 = vector.shape_cast %6 : vector<64x1xi1> to vector<64x1xi1>
    %244 = vector.broadcast %243 : vector<64x1xi1> to vector<64x128xi1>
    %245 = vector.broadcast %cst_90 : f32 to vector<64x128xf32>
    %246 = arith.select %244, %245, %242 : vector<64x128xi1>, vector<64x128xf32>
    %247 = tpu.concatenate %241, %236, %246 in 1 : vector<64x128xf32>, vector<64x128xf32>, vector<64x128xf32> -> vector<64x384xf32>
    %c2752 = arith.constant 2752 : index
    %c0_91 = arith.constant 0 : index
    %248 = vector.load %arg2[%c2752, %c0_91] : memref<4288x128xbf16, #tpu.memory_space<vmem>>, vector<384x128xbf16>
    %249 = arith.truncf %247 : vector<64x384xf32> to vector<64x384xbf16>
    %cst_92 = arith.constant dense<0.000000e+00> : vector<64x128xf32>
    %250 = tpu.matmul %249, %248, %cst_92 {dimension_numbers = #tpu.dot_dimension_numbers<[1], [0], [0], [1], [0, 0, 1, 1], [], []>} : vector<64x384xbf16>, vector<384x128xbf16>, vector<64x128xf32> -> vector<64x128xf32>
    %c96 = arith.constant 96 : index
    %c0_93 = arith.constant 0 : index
    %251 = vector.load %arg3[%c96, %c0_93] : memref<144x128xf32, #tpu.memory_space<vmem>>, vector<1x128xf32>
    %252 = vector.broadcast %251 : vector<1x128xf32> to vector<64x128xf32>
    %253 = arith.addf %250, %252 : vector<64x128xf32>
    %cst_94 = arith.constant 0.000000e+00 : f32
    %254 = vector.broadcast %cst_94 : f32 to vector<64x128xf32>
    %255 = arith.maximumf %253, %254 : vector<64x128xf32>
    %c1_i32_95 = arith.constant 1 : i32
    %256 = tpu.dynamic_rotate %255 by %c1_i32_95 dim 0 : vector<64x128xf32>, i32 -> vector<64x128xf32>
    %cst_96 = arith.constant 0.000000e+00 : f32
    %257 = vector.shape_cast %4 : vector<64x1xi1> to vector<64x1xi1>
    %258 = vector.broadcast %257 : vector<64x1xi1> to vector<64x128xi1>
    %259 = vector.broadcast %cst_96 : f32 to vector<64x128xf32>
    %260 = arith.select %258, %259, %256 : vector<64x128xi1>, vector<64x128xf32>
    %c63_i32_97 = arith.constant 63 : i32
    %261 = tpu.dynamic_rotate %255 by %c63_i32_97 dim 0 : vector<64x128xf32>, i32 -> vector<64x128xf32>
    %cst_98 = arith.constant 0.000000e+00 : f32
    %262 = vector.shape_cast %6 : vector<64x1xi1> to vector<64x1xi1>
    %263 = vector.broadcast %262 : vector<64x1xi1> to vector<64x128xi1>
    %264 = vector.broadcast %cst_98 : f32 to vector<64x128xf32>
    %265 = arith.select %263, %264, %261 : vector<64x128xi1>, vector<64x128xf32>
    %266 = tpu.concatenate %260, %255, %265 in 1 : vector<64x128xf32>, vector<64x128xf32>, vector<64x128xf32> -> vector<64x384xf32>
    %c3136 = arith.constant 3136 : index
    %c0_99 = arith.constant 0 : index
    %267 = vector.load %arg2[%c3136, %c0_99] : memref<4288x128xbf16, #tpu.memory_space<vmem>>, vector<384x128xbf16>
    %268 = arith.truncf %266 : vector<64x384xf32> to vector<64x384xbf16>
    %cst_100 = arith.constant dense<0.000000e+00> : vector<64x128xf32>
    %269 = tpu.matmul %268, %267, %cst_100 {dimension_numbers = #tpu.dot_dimension_numbers<[1], [0], [0], [1], [0, 0, 1, 1], [], []>} : vector<64x384xbf16>, vector<384x128xbf16>, vector<64x128xf32> -> vector<64x128xf32>
    %c104 = arith.constant 104 : index
    %c0_101 = arith.constant 0 : index
    %270 = vector.load %arg3[%c104, %c0_101] : memref<144x128xf32, #tpu.memory_space<vmem>>, vector<1x128xf32>
    %271 = vector.broadcast %270 : vector<1x128xf32> to vector<64x128xf32>
    %272 = arith.addf %269, %271 : vector<64x128xf32>
    %273 = arith.addf %272, %236 : vector<64x128xf32>
    %cst_102 = arith.constant 0.000000e+00 : f32
    %274 = vector.broadcast %cst_102 : f32 to vector<64x128xf32>
    %275 = arith.maximumf %273, %274 : vector<64x128xf32>
    %c3520 = arith.constant 3520 : index
    %c0_103 = arith.constant 0 : index
    %276 = vector.load %arg2[%c3520, %c0_103] : memref<4288x128xbf16, #tpu.memory_space<vmem>>, vector<128x128xbf16>
    %277 = arith.truncf %275 : vector<64x128xf32> to vector<64x128xbf16>
    %cst_104 = arith.constant dense<0.000000e+00> : vector<64x128xf32>
    %278 = tpu.matmul %277, %276, %cst_104 {dimension_numbers = #tpu.dot_dimension_numbers<[1], [0], [0], [1], [0, 0, 1, 1], [], []>} : vector<64x128xbf16>, vector<128x128xbf16>, vector<64x128xf32> -> vector<64x128xf32>
    %c112 = arith.constant 112 : index
    %c0_105 = arith.constant 0 : index
    %279 = vector.load %arg3[%c112, %c0_105] : memref<144x128xf32, #tpu.memory_space<vmem>>, vector<1x128xf32>
    %280 = vector.broadcast %279 : vector<1x128xf32> to vector<64x128xf32>
    %281 = arith.addf %278, %280 : vector<64x128xf32>
    %cst_106 = arith.constant 0.000000e+00 : f32
    %282 = vector.broadcast %cst_106 : f32 to vector<64x128xf32>
    %283 = arith.maximumf %281, %282 : vector<64x128xf32>
    %284 = arith.addf %283, %149 : vector<64x128xf32>
    %285 = vector.extract_strided_slice %284 {offsets = [0, 64], sizes = [64, 64], strides = [1, 1]} : vector<64x128xf32> to vector<64x64xf32>
    %c1_i32_107 = arith.constant 1 : i32
    %286 = tpu.dynamic_rotate %285 by %c1_i32_107 dim 0 : vector<64x64xf32>, i32 -> vector<64x64xf32>
    %cst_108 = arith.constant 0.000000e+00 : f32
    %287 = vector.shape_cast %4 : vector<64x1xi1> to vector<64x1xi1>
    %288 = vector.broadcast %287 : vector<64x1xi1> to vector<64x64xi1>
    %289 = vector.broadcast %cst_108 : f32 to vector<64x64xf32>
    %290 = arith.select %288, %289, %286 : vector<64x64xi1>, vector<64x64xf32>
    %291 = vector.extract_strided_slice %284 {offsets = [0, 0], sizes = [64, 64], strides = [1, 1]} : vector<64x128xf32> to vector<64x64xf32>
    %c63_i32_109 = arith.constant 63 : i32
    %292 = tpu.dynamic_rotate %291 by %c63_i32_109 dim 0 : vector<64x64xf32>, i32 -> vector<64x64xf32>
    %cst_110 = arith.constant 0.000000e+00 : f32
    %293 = vector.shape_cast %6 : vector<64x1xi1> to vector<64x1xi1>
    %294 = vector.broadcast %293 : vector<64x1xi1> to vector<64x64xi1>
    %295 = vector.broadcast %cst_110 : f32 to vector<64x64xf32>
    %296 = arith.select %294, %295, %292 : vector<64x64xi1>, vector<64x64xf32>
    %297 = tpu.concatenate %290, %284, %296 in 1 : vector<64x64xf32>, vector<64x128xf32>, vector<64x64xf32> -> vector<64x256xf32>
    %c3648 = arith.constant 3648 : index
    %c0_111 = arith.constant 0 : index
    %298 = vector.load %arg2[%c3648, %c0_111] : memref<4288x128xbf16, #tpu.memory_space<vmem>>, vector<256x128xbf16>
    %299 = arith.truncf %297 : vector<64x256xf32> to vector<64x256xbf16>
    %cst_112 = arith.constant dense<0.000000e+00> : vector<64x128xf32>
    %300 = tpu.matmul %299, %298, %cst_112 {dimension_numbers = #tpu.dot_dimension_numbers<[1], [0], [0], [1], [0, 0, 1, 1], [], []>} : vector<64x256xbf16>, vector<256x128xbf16>, vector<64x128xf32> -> vector<64x128xf32>
    %c120 = arith.constant 120 : index
    %c0_113 = arith.constant 0 : index
    %301 = vector.load %arg3[%c120, %c0_113] : memref<144x128xf32, #tpu.memory_space<vmem>>, vector<1x128xf32>
    %302 = vector.broadcast %301 : vector<1x128xf32> to vector<64x128xf32>
    %303 = arith.addf %300, %302 : vector<64x128xf32>
    %cst_114 = arith.constant 0.000000e+00 : f32
    %304 = vector.broadcast %cst_114 : f32 to vector<64x128xf32>
    %305 = arith.maximumf %303, %304 : vector<64x128xf32>
    %306 = vector.extract_strided_slice %305 {offsets = [0, 64], sizes = [64, 64], strides = [1, 1]} : vector<64x128xf32> to vector<64x64xf32>
    %c1_i32_115 = arith.constant 1 : i32
    %307 = tpu.dynamic_rotate %306 by %c1_i32_115 dim 0 : vector<64x64xf32>, i32 -> vector<64x64xf32>
    %cst_116 = arith.constant 0.000000e+00 : f32
    %308 = vector.shape_cast %4 : vector<64x1xi1> to vector<64x1xi1>
    %309 = vector.broadcast %308 : vector<64x1xi1> to vector<64x64xi1>
    %310 = vector.broadcast %cst_116 : f32 to vector<64x64xf32>
    %311 = arith.select %309, %310, %307 : vector<64x64xi1>, vector<64x64xf32>
    %312 = vector.extract_strided_slice %305 {offsets = [0, 0], sizes = [64, 64], strides = [1, 1]} : vector<64x128xf32> to vector<64x64xf32>
    %c63_i32_117 = arith.constant 63 : i32
    %313 = tpu.dynamic_rotate %312 by %c63_i32_117 dim 0 : vector<64x64xf32>, i32 -> vector<64x64xf32>
    %cst_118 = arith.constant 0.000000e+00 : f32
    %314 = vector.shape_cast %6 : vector<64x1xi1> to vector<64x1xi1>
    %315 = vector.broadcast %314 : vector<64x1xi1> to vector<64x64xi1>
    %316 = vector.broadcast %cst_118 : f32 to vector<64x64xf32>
    %317 = arith.select %315, %316, %313 : vector<64x64xi1>, vector<64x64xf32>
    %318 = tpu.concatenate %311, %305, %317 in 1 : vector<64x64xf32>, vector<64x128xf32>, vector<64x64xf32> -> vector<64x256xf32>
    %c3904 = arith.constant 3904 : index
    %c0_119 = arith.constant 0 : index
    %319 = vector.load %arg2[%c3904, %c0_119] : memref<4288x128xbf16, #tpu.memory_space<vmem>>, vector<256x128xbf16>
    %320 = arith.truncf %318 : vector<64x256xf32> to vector<64x256xbf16>
    %cst_120 = arith.constant dense<0.000000e+00> : vector<64x128xf32>
    %321 = tpu.matmul %320, %319, %cst_120 {dimension_numbers = #tpu.dot_dimension_numbers<[1], [0], [0], [1], [0, 0, 1, 1], [], []>} : vector<64x256xbf16>, vector<256x128xbf16>, vector<64x128xf32> -> vector<64x128xf32>
    %c128 = arith.constant 128 : index
    %c0_121 = arith.constant 0 : index
    %322 = vector.load %arg3[%c128, %c0_121] : memref<144x128xf32, #tpu.memory_space<vmem>>, vector<1x128xf32>
    %323 = vector.broadcast %322 : vector<1x128xf32> to vector<64x128xf32>
    %324 = arith.addf %321, %323 : vector<64x128xf32>
    %325 = arith.addf %324, %284 : vector<64x128xf32>
    %cst_122 = arith.constant 0.000000e+00 : f32
    %326 = vector.broadcast %cst_122 : f32 to vector<64x128xf32>
    %327 = arith.maximumf %325, %326 : vector<64x128xf32>
    %c4160 = arith.constant 4160 : index
    %c0_123 = arith.constant 0 : index
    %328 = vector.load %arg2[%c4160, %c0_123] : memref<4288x128xbf16, #tpu.memory_space<vmem>>, vector<128x128xbf16>
    %329 = arith.truncf %327 : vector<64x128xf32> to vector<64x128xbf16>
    %cst_124 = arith.constant dense<0.000000e+00> : vector<64x128xf32>
    %330 = tpu.matmul %329, %328, %cst_124 {dimension_numbers = #tpu.dot_dimension_numbers<[1], [0], [0], [1], [0, 0, 1, 1], [], []>} : vector<64x128xbf16>, vector<128x128xbf16>, vector<64x128xf32> -> vector<64x128xf32>
    %c136 = arith.constant 136 : index
    %c0_125 = arith.constant 0 : index
    %331 = vector.load %arg3[%c136, %c0_125] : memref<144x128xf32, #tpu.memory_space<vmem>>, vector<1x128xf32>
    %332 = vector.broadcast %331 : vector<1x128xf32> to vector<64x128xf32>
    %333 = arith.addf %330, %332 : vector<64x128xf32>
    %cst_126 = arith.constant 0.000000e+00 : f32
    %334 = vector.broadcast %cst_126 : f32 to vector<64x128xf32>
    %335 = arith.maximumf %333, %334 : vector<64x128xf32>
    %336 = arith.addf %335, %50 : vector<64x128xf32>
    %c0_127 = arith.constant 0 : index
    %c0_128 = arith.constant 0 : index
    %337 = vector.load %arg4[%c0_127, %c0_128] : memref<64x128xf32, #tpu.memory_space<vmem>>, vector<64x128xf32>
    tpu.vector_store %arg4[%c0_127, %c0_128], %336 {strides = array<i32>} : memref<64x128xf32, #tpu.memory_space<vmem>>, vector<64x128xf32>,
    return
  }
  func.func @transform_0(%arg0: i32) -> (i32, i32) {
    %c0_i32 = arith.constant 0 : i32
    %c0_i32_0 = arith.constant 0 : i32
    return %arg0, %c0_i32 : i32, i32
  }
  func.func @transform_1(%arg0: i32) -> (i32, i32) {
    %c0_i32 = arith.constant 0 : i32
    %c0_i32_0 = arith.constant 0 : i32
    %c0_i32_1 = arith.constant 0 : i32
    return %c0_i32, %c0_i32_0 : i32, i32
  }
  func.func @transform_2(%arg0: i32) -> (i32, i32) {
    %c0_i32 = arith.constant 0 : i32
    %c0_i32_0 = arith.constant 0 : i32
    %c0_i32_1 = arith.constant 0 : i32
    return %c0_i32, %c0_i32_0 : i32, i32
  }
  func.func @transform_3(%arg0: i32) -> (i32, i32) {
    %c0_i32 = arith.constant 0 : i32
    %c0_i32_0 = arith.constant 0 : i32
    return %arg0, %c0_i32 : i32, i32
  }
}

</mosaic_0001>

<bundles_post_ra>
// kernel: tpu_custom_call.1
= control target key start
LH: loop header
LB: loop body
LE: loop exit
PB: predicated region body
PF: predicated region fallthrough
CT: control target
= control target key end

     0   :  { %8 = vsyncpa [#allocation3], 0  ;;  %s10049_s0 = inlined_call_operand.hbm [shape: f32[64,128], index: 0, kind: input, shape index: {}]   ;;  %s10050_s1 = inlined_call_operand.hbm [shape: bf16[4288,128], index: 1, kind: input, shape index: {}]   ;;  %s10051_s2 = inlined_call_operand.hbm [shape: f32[144,128], index: 2, kind: input, shape index: {}]   ;;  %s10052_s3 = inlined_call_operand.hbm [shape: f32[64,128], index: 3, kind: output, shape index: {}]  }
   0x1   :  { %9 = vsyncpa [#allocation6], 0 }
   0x2   :  { %10 = vsyncpa [#allocation4], 0  ;;  %s7767_s12 = smov [#allocation5]   ;;  %s7673_s16 = scalar_lea.hbm %s10050_s1, 34304 }
   0x3   :  { %s28_s13 = sshll.u32 %s7767_s12, 4  ;;  %p7674_p0 = scmp.ne.s32.totalorder %s10050_s1, %s7673_s16  ;;  %s29_s13 = int_to_ptr.vmem [resolvable:$true] %s28_s13 }
   0x4   :  { %p7677_p1 = scmp.lt.u32.totalorder %s7673_s16, %s10050_s1 }
   0x6   :  { %p7679_p2 = pnand %p7677_p1, %p7674_p0 }
   0x8   :  { %7682 = shalt.err (!%p7679_p2)
}
   0x9   :  { %s7683_s21 = scalar_lea.vmem %s29_s13, 34304  ;;  %p7688_p4 = scmp.lt.s32.totalorder %s29_s13, %s29_s13 }
   0xa   :  { %p7684_p3 = scmp.ne.s32.totalorder %s29_s13, %s7683_s21  ;;  %p7689_p5 = scmp.lt.s32.totalorder %s7683_s21, %s7683_s21 }
   0xc   :  { %p7690_p6 = por %p7689_p5, %p7688_p4 }
   0xe   :  { %p7691_p7 = pnand %p7690_p6, %p7684_p3 }
  0x10   :  { %7694 = shalt.err (!%p7691_p7)
}
  0x11   :  { %s7768_s22 = smov 64   ;;  %s7769_s23 = smov 4  }
  0x12   :  { %34 = dma.hbm_to_vmem [thread:$0]  %s10050_s1, 34304, %s29_s13, [#allocation6], %s7768_s22, %s7768_s22, %s7769_s23  }
  0x13   :  { %s7770_s26 = smov [#allocation2]   ;;  %s7695_s30 = scalar_lea.hbm %s10049_s0, 1024 }
  0x14   :  { %s16_s27 = sshll.u32 %s7770_s26, 4  ;;  %p7696_p8 = scmp.ne.s32.totalorder %s10049_s0, %s7695_s30  ;;  %s17_s27 = int_to_ptr.vmem [resolvable:$true] %s16_s27 }
  0x15   :  { %p7699_p9 = scmp.lt.u32.totalorder %s7695_s30, %s10049_s0 }
  0x17   :  { %p7701_p10 = pnand %p7699_p9, %p7696_p8 }
  0x19   :  { %7704 = shalt.err (!%p7701_p10)
}
  0x1a   :  { %s7705_s8 = scalar_lea.vmem %s17_s27, 1024  ;;  %p7710_p12 = scmp.lt.s32.totalorder %s17_s27, %s17_s27 }
  0x1b   :  { %p7706_p11 = scmp.ne.s32.totalorder %s17_s27, %s7705_s8  ;;  %p7711_p13 = scmp.lt.s32.totalorder %s7705_s8, %s7705_s8 }
  0x1d   :  { %p7712_p0 = por %p7711_p13, %p7710_p12 }
  0x1f   :  { %p7713_p1 = pnand %p7712_p0, %p7706_p11 }
  0x21   :  { %7716 = shalt.err (!%p7713_p1)
}
  0x22   :  { %s7771_s1 = smov 128   ;;  %s7772_s9 = smov 8  }
  0x23   :  { %22 = dma.hbm_to_vmem [thread:$0]  %s10049_s0, 1024, %s17_s27, [#allocation3], %s7771_s1, %s7771_s1, %s7772_s9  }
  0x24   :  { %s7773_s12 = smov [#allocation7]   ;;  %s7717_s16 = scalar_lea.hbm %s10051_s2, 2304 }
  0x25   :  { %s40_s13 = sshll.u32 %s7773_s12, 4  ;;  %p7718_p2 = scmp.ne.s32.totalorder %s10051_s2, %s7717_s16  ;;  %s41_s13 = int_to_ptr.vmem [resolvable:$true] %s40_s13 }
  0x26   :  { %p7721_p3 = scmp.lt.u32.totalorder %s7717_s16, %s10051_s2 }
  0x28   :  { %p7723_p4 = pnand %p7721_p3, %p7718_p2 }
  0x2a   :  { %7726 = shalt.err (!%p7723_p4)
}
  0x2b   :  { %s7727_s21 = scalar_lea.vmem %s41_s13, 2304  ;;  %p7732_p6 = scmp.lt.s32.totalorder %s41_s13, %s41_s13 }
  0x2c   :  { %p7728_p5 = scmp.ne.s32.totalorder %s41_s13, %s7727_s21  ;;  %p7733_p7 = scmp.lt.s32.totalorder %s7727_s21, %s7727_s21 }
  0x2e   :  { %p7734_p8 = por %p7733_p7, %p7732_p6 }
  0x30   :  { %p7735_p9 = pnand %p7734_p8, %p7728_p5 }
  0x32   :  { %7738 = shalt.err (!%p7735_p9)
}
  0x33   :  { %46 = dma.hbm_to_vmem [thread:$0]  %s10051_s2, 2304, %s41_s13, [#allocation6], %s7771_s1, %s7771_s1, %s7772_s9  }
  0x34   :  { %7761 = dma.done.wait [#allocation3], 1024  }
  0x35   :  { %7762 = vsyncadd [#allocation3], 4294966272 }
  0x36   :  { %7763 = dma.done.wait [#allocation6], 36608  }
  0x37   :  { %7764 = vsyncadd [#allocation6], 4294930688  ;;  %v7842_v0 = vld [vmem:[#allocation2] sm:$0xff]  ;;  %v7844_v1 = vld [vmem:[#allocation2 + $0x8] sm:$0xff]  ;;  %s7774_s2 = smov 96   ;;  %v57_v12 = vlaneseq  ;;  %v10152_v29 = vmov 0 }
  0x38   :  { %v7846_v2 = vld [vmem:[#allocation2 + $0x18] sm:$0xff]  ;;  %v7850_v3 = vpack.i.bf16 %v7844_v1, %v7842_v0  ;;  %v7852_v4 = vld [vmem:[#allocation2 + $0x20] sm:$0xff]  ;;  %v7854_v5 = vld [vmem:[#allocation2 + $0x10] sm:$0xff]  ;;  %v171_v16 = vrot.slane %v7842_v0, 1  ;;  %v172_v18 = vrot.slane %v7844_v1, 1  ;;  %v10154_v31 = vmov 0 }
  0x39   :  { %v7856_v6 = vld [vmem:[#allocation2 + $0x38] sm:$0xff]  ;;  %v7037_v7 = vpack.i.bf16 %v7852_v4, %v7846_v2  ;;  %v7860_v8 = vld [vmem:[#allocation2 + $0x28] sm:$0xff]  ;;  %v7862_v9 = vld [vmem:[#allocation2 + $0x30] sm:$0xff]  ;;  %v7871_v13 = vshrl.u32 %v57_v12, 7  ;;  %v173_v20 = vrot.slane %v7854_v5, 1  ;;  %v174_v23 = vrot.slane %v7846_v2, 1 }
  0x3a   :  { %7028 = vrot.lane.b32.xlu0 %v7850_v3, %s7774_s2  ;;  %v7032_v10 = vpack.i.bf16 %v7854_v5, %v7856_v6  ;;  %v7042_v11 = vpack.i.bf16 %v7862_v9, %v7860_v8  ;;  %v175_v24 = vrot.slane %v7852_v4, 1  ;;  %v176_v27 = vrot.slane %v7860_v8, 1  ;;  %v7397_v45 = vld [vmem:[#allocation5] sm:$0xff]   ;;  %v7398_v52 = vld [vmem:[#allocation5 + $0x8] sm:$0xff]   ;;  %v7399_v53 = vld [vmem:[#allocation5 + $0x10] sm:$0xff]   ;;  %s7776_s24 = smov 32  }
  0x3b   :  { %7038 = vrot.lane.b32.xlu1 %v7037_v7, %s7774_s2  ;;  %v7876_v14 = vadd.s32 8, %v7871_v13  ;;  %v7879_v15 = vadd.s32 16, %v7871_v13  ;;  %v66_v17 = vand.u32 7, %v7871_v13  ;;  %vm10053_vm0 = vcmp.lt.s32.totalorder %v7871_v13, 7  ;;  %v7400_v54 = vld [vmem:[#allocation5 + $0x18] sm:$0xff]   ;;  %v7401_v56 = vld [vmem:[#allocation5 + $0x20] sm:$0xff]  }
  0x3c   :  { %v7888_v21 = vadd.s32 24, %v7871_v13  ;;  %v7894_v25 = vadd.s32 32, %v7871_v13  ;;  %v7909_v30 = vsel %vm10053_vm0, %v171_v16, %v172_v18  ;;  %v7919_v32 = vsel %vm10053_vm0, %v172_v18, %v173_v20  ;;  %v7402_v58 = vld [vmem:[#allocation5 + $0x28] sm:$0xff]   ;;  %v7403_v12 = vld [vmem:[#allocation5 + $0x30] sm:$0xff]  }
  0x3d   :  { %v67_v19 = vand.u32 7, %v7876_v14  ;;  %v68_v22 = vand.u32 7, %v7879_v15  ;;  %vm7901_vm1 = vcmp.eq.s32.totalorder %v66_v17, 7  ;;  %v10156_v33 = vmov 0 }
  0x3e   :  { %7033 = vrot.lane.b32.xlu0 %v7032_v10, %s7774_s2  ;;  %v69_v26 = vand.u32 7, %v7888_v21  ;;  %v70_v28 = vand.u32 7, %v7894_v25  ;;  %v10153_v29 = vsel %vm7901_vm1, 4294967295, %v10152_v29  ;;  %v7929_v34 = vsel %vm10053_vm0, %v173_v20, %v174_v23 }
  0x3f   :  { %7043 = vrot.lane.b32.xlu1 %v7042_v11, %s7774_s2  ;;  %vm7913_vm2 = vcmp.eq.s32.totalorder %v67_v19, 7  ;;  %vm7923_vm3 = vcmp.eq.s32.totalorder %v68_v22, 7  ;;  %v10158_v35 = vmov 0  ;;  %v7939_v36 = vsel %vm10053_vm0, %v174_v23, %v175_v24 }
  0x40   :  { %v10155_v31 = vsel %vm7913_vm2, 4294967295, %v10154_v31  ;;  %v10157_v33 = vsel %vm7923_vm3, 4294967295, %v10156_v33  ;;  %vm7933_vm4 = vcmp.eq.s32.totalorder %v69_v26, 7  ;;  %vm7943_vm5 = vcmp.eq.s32.totalorder %v70_v28, 7 }
  0x41   :  { %v10159_v35 = vsel %vm7933_vm4, 4294967295, %v10158_v35  ;;  %v10160_v37 = vmov 0  ;;  %v7949_v38 = vsel %vm10053_vm0, %v175_v24, %v176_v27  ;;  %v7952_v39 = vadd.s32 40, %v7871_v13 }
  0x42   :  { %v10161_v37 = vsel %vm7943_vm5, 4294967295, %v10160_v37  ;;  %v204_v40 = vsel %vm7901_vm1, 0.0, %v7909_v30  ;;  %v205_v41 = vsel %vm7913_vm2, 0.0, %v7919_v32  ;;  %v206_v42 = vsel %vm7923_vm3, 0.0, %v7929_v34  ;;  %v8104_v32 = vld [vmem:[#allocation5 + $0xc0] sm:$0xff]  }
  0x43   :  { %v177_v43 = vrot.slane %v7862_v9, 1  ;;  %v7965_v44 = vadd.s32 48, %v7871_v13  ;;  %v207_v46 = vsel %vm7933_vm4, 0.0, %v7939_v36  ;;  %v208_v47 = vsel %vm7943_vm5, 0.0, %v7949_v38 }
  0x44   :  { %v7974_v48 = vadd.s32 56, %v7871_v13  ;;  %v178_v49 = vrot.slane %v7856_v6, 1  ;;  %v10085_v50 = vmov 0   ;;  %v71_v51 = vand.u32 7, %v7952_v39 }
  0x45   :  { %383 = vmatprep.subr.bf16.mxu0 %v10085_v50  ;;  %705 = vmatprep.subr.bf16.mxu1 %v10085_v50  ;;  %v72_v55 = vand.u32 7, %v7965_v44  ;;  %v10162_v10 = vmov 0  ;;  %v181_v11 = vsel %vm10053_vm0, %v176_v27, %v177_v43  ;;  %vm10055_vm9 = vcmask 261120   ;;  %v7413_v44 = vld [vmem:[#allocation5 + $0xe0] sm:$0xff]  }
  0x46   :  { %384 = vmatpush1.bf16.msra.mxu0 %v7397_v45  ;;  %v73_v57 = vand.u32 7, %v7974_v48  ;;  %vm7990_vm6 = vcmp.eq.s32.totalorder %v71_v51, 7  ;;  %vm10054_vm10 = vcmp.lt.s32.totalorder %v7871_v13, 1  ;;  %vm10056_vm11 = vcmask 523264  }
  0x47   :  { %385 = vmatprep.subr.bf16.mxu0 %v10085_v50  ;;  %v10163_v10 = vsel %vm7990_vm6, 4294967295, %v10162_v10  ;;  %vm8034_vm7 = vcmp.eq.s32.totalorder %v72_v55, 7  ;;  %vm8174_vm12 = vcmp.eq.s32.totalorder %v66_v17, 0  ;;  %vm8181_vm13 = vcmp.eq.s32.totalorder %v67_v19, 0 }
  0x48   :  { %vm8045_vm8 = vcmp.eq.s32.totalorder %v73_v57, 7  ;;  %vm8193_vm14 = vcmp.eq.s32.totalorder %v68_v22, 0  ;;  %vm8202_vm15 = vcmp.eq.s32.totalorder %v69_v26, 0 }
  0x4a   :  { %386 = vmatpush1.bf16.msra.mxu0 %v7398_v52 }
  0x4b   :  { %387 = vmatprep.subr.bf16.mxu0 %v10085_v50 }
  0x4e   :  { %388 = vmatpush1.bf16.msra.mxu0 %v7399_v53 }
  0x4f   :  { %389 = vmatprep.subr.bf16.mxu0 %v10085_v50 }
  0x52   :  { %390 = vmatpush1.bf16.msra.mxu0 %v7400_v54 }
  0x53   :  { %391 = vmatprep.subr.bf16.mxu0 %v10085_v50 }
  0x56   :  { %392 = vmatpush1.bf16.msra.mxu0 %v7401_v56  ;;  %v7404_v56 = vld [vmem:[#allocation5 + $0x38] sm:$0xff]  }
  0x57   :  { %393 = vmatprep.subr.bf16.mxu0 %v10085_v50 }
  0x5a   :  { %394 = vmatpush1.bf16.msra.mxu0 %v7402_v58 }
  0x5b   :  { %395 = vmatprep.subr.bf16.mxu0 %v10085_v50 }
  0x5e   :  { %396 = vmatpush1.bf16.msra.mxu0 %v7403_v12  ;;  %v10164_v12 = vmov 0 }
  0x5f   :  { %397 = vmatprep.subr.bf16.mxu0 %v10085_v50  ;;  %v10165_v12 = vsel %vm8034_vm7, 4294967295, %v10164_v12 }
  0x60   :  { %10166 = vst [vmem:[#allocation12_spill] sm:$0xff] %v10165_v12 }
  0x62   :  { %398 = vmatpush1.bf16.msra.mxu0 %v7404_v56  ;;  %v7072_v56 = vpack.i.bf16 %v204_v40, %v7856_v6 }
  0x63   :  { %399 = vmatprep.subr.bf16.mxu0 %v10085_v50 }
  0xac   :  { %v7029_v59 = vpop.permute.xlu0 %7028 }
  0xad   :  { %v7031_v60 = vunpack.i.h.bf16 %v7029_v59  ;;  %v7030_v61 = vunpack.i.l.bf16 %v7029_v59  ;;  %v7039_v62 = vpop.permute.xlu1 %7038 }
  0xae   :  { %v7041_v63 = vunpack.i.h.bf16 %v7039_v62  ;;  %v7040_v7 = vunpack.i.l.bf16 %v7039_v62 }
  0xaf   :  { %v7999_v18 = vmax.f32 %v7844_v1, %v7031_v60  ;;  %v8002_v20 = vmax.f32 %v7842_v0, %v7030_v61  ;;  %v209_v1 = vsel %vm7990_vm6, 0.0, %v181_v11  ;;  %v7087_v0 = vpack.i.bf16 %v7852_v4, %v207_v46 }
  0xb0   :  { %v8005_v23 = vmax.f32 %v7852_v4, %v7041_v63  ;;  %v8008_v24 = vmax.f32 %v7846_v2, %v7040_v7  ;;  %v7034_v45 = vpop.permute.xlu0 %7033  ;;  %v7097_v30 = vpack.i.bf16 %v7862_v9, %v209_v1 }
  0xb1   :  { %v7036_v52 = vunpack.i.h.bf16 %v7034_v45  ;;  %v7035_v53 = vunpack.i.l.bf16 %v7034_v45  ;;  %v7047_v27 = vpack.i.bf16 %v7999_v18, %v8002_v20  ;;  %v7044_v54 = vpop.permute.xlu1 %7043  ;;  %v7405_v45 = vld [vmem:[#allocation5 + $0x40] sm:$0xff]  }
  0xb2   :  { %v7046_v58 = vunpack.i.h.bf16 %v7044_v54  ;;  %v7045_v59 = vunpack.i.l.bf16 %v7044_v54  ;;  %v7057_v62 = vpack.i.bf16 %v8005_v23, %v8008_v24  ;;  %400 = vmatpush1.bf16.msra.mxu0 %v7405_v45  ;;  %v180_v54 = vsel %vm10053_vm0, %v177_v43, %v178_v49 }
  0xb3   :  { %v8016_v60 = vmax.f32 %v7854_v5, %v7036_v52  ;;  %v8019_v61 = vmax.f32 %v7856_v6, %v7035_v53  ;;  %7048 = vrot.lane.b32.xlu0 %v7047_v27, %s7774_s2  ;;  %v10167_v53 = vmov 0  ;;  %401 = vmatprep.subr.bf16.mxu0 %v10085_v50  ;;  %v7406_v27 = vld [vmem:[#allocation5 + $0x48] sm:$0xff]   ;;  %v210_v43 = vsel %vm8034_vm7, 0.0, %v180_v54 }
  0xb4   :  { %v8025_v63 = vmax.f32 %v7862_v9, %v7046_v58  ;;  %v8028_v7 = vmax.f32 %v7860_v8, %v7045_v59  ;;  %v10168_v53 = vsel %vm8045_vm8, 4294967295, %v10167_v53  ;;  %v7077_v58 = vpack.i.bf16 %v7854_v5, %v205_v41  ;;  %v7407_v59 = vld [vmem:[#allocation5 + $0x50] sm:$0xff]  }
  0xb5   :  { %v7052_v11 = vpack.i.bf16 %v8016_v60, %v8019_v61  ;;  %10169 = vst [vmem:[#allocation13_spill] sm:$0xff] %v10168_v53  ;;  %v7082_v5 = vpack.i.bf16 %v206_v42, %v7846_v2  ;;  %v7092_v2 = vpack.i.bf16 %v208_v47, %v7860_v8 }
  0xb6   :  { %v7062_v52 = vpack.i.bf16 %v8025_v63, %v8028_v7  ;;  %402 = vmatpush1.bf16.msra.mxu0 %v7406_v27 }
  0xb7   :  { %7053 = vrot.lane.b32.xlu1 %v7052_v11, %s7774_s2  ;;  %7058 = vrot.lane.b32.xlu0 %v7057_v62, %s7774_s2 }
  0xb8   :  { %403 = vmatprep.subr.bf16.mxu0 %v10085_v50 }
  0xba   :  { %404 = vmatpush1.bf16.msra.mxu0 %v7407_v59 }
  0xbb   :  { %7063 = vrot.lane.b32.xlu1 %v7062_v52, %s7774_s2  ;;  %7068 = vrot.lane.b32.xlu0 %v7850_v3, %s7776_s24  ;;  %v187_v3 = vsel %vm10053_vm0, %v178_v49, %v171_v16  ;;  %v7408_v16 = vld [vmem:[#allocation5 + $0x58] sm:$0xff]  }
  0xbc   :  { %v211_v6 = vsel %vm8045_vm8, 0.0, %v187_v3  ;;  %405 = vmatprep.subr.bf16.mxu0 %v10085_v50 }
  0xbd   :  { %v7102_v4 = vpack.i.bf16 %v211_v6, %v210_v43 }
  0xbe   :  { %406 = vmatpush1.bf16.msra.mxu0 %v7408_v16 }
  0xbf   :  { %7073 = vrot.lane.b32.xlu1 %v7072_v56, %s7776_s24  ;;  %7078 = vrot.lane.b32.xlu0 %v7077_v58, %s7776_s24 }
  0xc0   :  { %6768 = vmatprep.subr.bf16.mxu0 %v8104_v32 }
  0xc3   :  { %7083 = vrot.lane.b32.xlu1 %v7082_v5, %s7776_s24  ;;  %7088 = vrot.lane.b32.xlu0 %v7087_v0, %s7776_s24 }
  0xc7   :  { %7093 = vrot.lane.b32.xlu1 %v7092_v2, %s7776_s24  ;;  %7098 = vrot.lane.b32.xlu0 %v7097_v30, %s7776_s24 }
  0xcb   :  { %7103 = vrot.lane.b32.xlu1 %v7102_v4, %s7776_s24 }
 0x125   :  { %v7049_v34 = vpop.permute.xlu0 %7048 }
 0x126   :  { %v7051_v36 = vunpack.i.h.bf16 %v7049_v34  ;;  %v7050_v40 = vunpack.i.l.bf16 %v7049_v34 }
 0x128   :  { %v8109_v8 = vsel %vm10055_vm9, %v7999_v18, %v7051_v36  ;;  %v8113_v9 = vsel %vm10055_vm9, %v8002_v20, %v7050_v40 }
 0x129   :  { %v915_v38 = vrot.slane %v8109_v8, 1  ;;  %v914_v41 = vrot.slane %v8113_v9, 1  ;;  %v7054_v42 = vpop.permute.xlu1 %7053  ;;  %v7059_v46 = vpop.permute.xlu0 %7058  ;;  %v7107_v47 = vpack.i.bf16 %v8109_v8, %v8113_v9  ;;  %v1499_v20 = vpack.c.bf16 %v8109_v8, %v8113_v9  ;;  %v8396_v8 = vld [vmem:[#allocation7] ss:$0 sm:$0xff]  ;;  %v7422_v9 = vld [vmem:[#allocation5 + $0x68] sm:$0xff]  }
 0x12a   :  { %v7056_v49 = vunpack.i.h.bf16 %v7054_v42  ;;  %v7055_v1 = vunpack.i.l.bf16 %v7054_v42  ;;  %v7061_v62 = vunpack.i.h.bf16 %v7059_v46  ;;  %v7060_v11 = vunpack.i.l.bf16 %v7059_v46 }
 0x12b   :  { %7108 = vrot.lane.b32.xlu0 %v7107_v47, %s7774_s2  ;;  %v928_v18 = vsel %vm10053_vm0, %v914_v41, %v915_v38 }
 0x12c   :  { %v8128_v45 = vsel %vm10055_vm9, %v8016_v60, %v7056_v49  ;;  %v8132_v52 = vsel %vm10055_vm9, %v8019_v61, %v7055_v1  ;;  %v8136_v27 = vsel %vm10055_vm9, %v8005_v23, %v7061_v62  ;;  %v8140_v54 = vsel %vm10055_vm9, %v8008_v24, %v7060_v11 }
 0x12d   :  { %v916_v56 = vrot.slane %v8128_v45, 1  ;;  %v918_v58 = vrot.slane %v8136_v27, 1  ;;  %v917_v43 = vrot.slane %v8140_v54, 1  ;;  %v7064_v60 = vpop.permute.xlu1 %7063  ;;  %v7069_v59 = vpop.permute.xlu0 %7068  ;;  %v1500_v61 = vpack.c.bf16 %v8140_v54, %v8128_v45 }
 0x12e   :  { %v7066_v3 = vunpack.i.h.bf16 %v7064_v60  ;;  %v7065_v5 = vunpack.i.l.bf16 %v7064_v60  ;;  %v7122_v23 = vpack.i.bf16 %v8140_v54, %v8128_v45  ;;  %v7112_v24 = vpack.i.bf16 %v8128_v45, %v8132_v52 }
 0x12f   :  { %v930_v0 = vsel %vm7901_vm1, 0.0, %v928_v18  ;;  %v925_v2 = vsel %vm10053_vm0, %v917_v43, %v918_v58  ;;  %v926_v30 = vsel %vm10053_vm0, %v916_v56, %v917_v43  ;;  %v7071_v42 = vunpack.i.h.bf16 %v7069_v59 }
 0x130   :  { %v8156_v6 = vsel %vm10055_vm9, %v8025_v63, %v7066_v3  ;;  %v8160_v16 = vsel %vm10055_vm9, %v8028_v7, %v7065_v5  ;;  %7123 = vrot.lane.b32.xlu0 %v7122_v23, %s7776_s24  ;;  %7113 = vrot.lane.b32.xlu1 %v7112_v24, %s7774_s2  ;;  %v927_v63 = vsel %vm10053_vm0, %v915_v38, %v916_v56  ;;  %v10170_v7 = vmov 0 }
 0x131   :  { %v920_v4 = vrot.slane %v8156_v6, 1  ;;  %v919_v34 = vrot.slane %v8160_v16, 1  ;;  %v7074_v36 = vpop.permute.xlu1 %7073  ;;  %v10171_v7 = vsel %vm8174_vm12, 4294967295, %v10170_v7  ;;  %v7127_v40 = vpack.i.bf16 %v930_v0, %v8140_v54  ;;  %v7079_v49 = vpop.permute.xlu0 %7078 }
 0x132   :  { %10172 = vst [vmem:[#allocation14_spill] sm:$0xff] %v10171_v7  ;;  %v7070_v46 = vunpack.i.l.bf16 %v7069_v59  ;;  %v10173_v1 = vmov 0  ;;  %v933_v38 = vsel %vm7933_vm4, 0.0, %v925_v2  ;;  %v931_v17 = vsel %vm7913_vm2, 0.0, %v927_v63 }
 0x133   :  { %v10174_v1 = vsel %vm8181_vm13, 4294967295, %v10173_v1  ;;  %v932_v62 = vsel %vm7923_vm3, 0.0, %v926_v30  ;;  %v10176_v11 = vmov 0  ;;  %v131_v14 = vrot.slane %v7071_v42, 7 }
 0x134   :  { %10175 = vst [vmem:[#allocation15_spill] sm:$0xff] %v10174_v1  ;;  %v10177_v11 = vsel %vm8193_vm14, 4294967295, %v10176_v11  ;;  %7128 = vrot.lane.b32.xlu0 %v7127_v40, %s7774_s2  ;;  %v7076_v19 = vunpack.i.h.bf16 %v7074_v36  ;;  %v8198_v18 = vunpack.i.l.bf16 %v7074_v36  ;;  %v7081_v56 = vunpack.i.h.bf16 %v7079_v49  ;;  %7118 = vrot.lane.b32.xlu1 %v7107_v47, %s7776_s24 }
 0x135   :  { %10178 = vst [vmem:[#allocation16_spill] sm:$0xff] %v10177_v11  ;;  %v10179_v43 = vmov 0  ;;  %v130_v15 = vrot.slane %v7070_v46, 7  ;;  %v7080_v22 = vunpack.i.l.bf16 %v7079_v49  ;;  %v923_v60 = vsel %vm10053_vm0, %v919_v34, %v920_v4  ;;  %v7084_v3 = vpop.permute.xlu1 %7083  ;;  %v7089_v36 = vpop.permute.xlu0 %7088 }
 0x136   :  { %v10180_v43 = vsel %vm8202_vm15, 4294967295, %v10179_v43  ;;  %v924_v59 = vsel %vm10053_vm0, %v918_v58, %v919_v34  ;;  %v7142_v5 = vpack.i.bf16 %v8136_v27, %v933_v38  ;;  %v137_v23 = vrot.slane %v8198_v18, 7 }
 0x137   :  { %10181 = vst [vmem:[#allocation17_spill] sm:$0xff] %v10180_v43  ;;  %v934_v21 = vsel %vm7943_vm5, 0.0, %v924_v59  ;;  %v935_v26 = vsel %vm7990_vm6, 0.0, %v923_v60  ;;  %v921_v47 = vrot.slane %v8132_v52, 1  ;;  %v7132_v24 = vpack.i.bf16 %v932_v62, %v931_v17 }
 0x138   :  { %v7147_v0 = vpack.i.bf16 %v8160_v16, %v8136_v27  ;;  %v7086_v2 = vunpack.i.h.bf16 %v7084_v3  ;;  %7143 = vrot.lane.b32.xlu0 %v7142_v5, %s7774_s2  ;;  %v7137_v58 = vpack.i.bf16 %v8156_v6, %v8160_v16  ;;  %v132_v30 = vrot.slane %v7081_v56, 7 }
 0x139   :  { %v7085_v34 = vunpack.i.l.bf16 %v7084_v3  ;;  %v253_v63 = vsel %vm10055_vm9, %v7070_v46, %v7076_v19  ;;  %7133 = vrot.lane.b32.xlu1 %v7132_v24, %s7774_s2  ;;  %v7157_v40 = vpack.i.bf16 %v935_v26, %v934_v21  ;;  %v254_v38 = vsel %vm10055_vm9, %v7071_v42, %v7080_v22  ;;  %v7094_v62 = vpop.permute.xlu1 %7093 }
 0x13a   :  { %v255_v49 = vsel %vm10055_vm9, %v7081_v56, %v7086_v2  ;;  %v145_v17 = vsel %vm10054_vm10, %v130_v15, %v131_v14  ;;  %v286_v59 = vpack.c.bf16 %v254_v38, %v253_v63  ;;  %v146_v3 = vsel %vm10054_vm10, %v137_v23, %v130_v15  ;;  %v7099_v38 = vpop.permute.xlu0 %7098 }
 0x13b   :  { %v133_v60 = vrot.slane %v7085_v34, 7  ;;  %v164_v19 = vsel %vm8181_vm13, 0.0, %v145_v17  ;;  %v163_v5 = vsel %vm8174_vm12, 0.0, %v146_v3  ;;  %v7091_v22 = vunpack.i.h.bf16 %v7089_v36 }
 0x13c   :  { %v246_v21 = vsel %vm10055_vm9, %v164_v19, %v7071_v42  ;;  %v7090_v26 = vunpack.i.l.bf16 %v7089_v36  ;;  %7148 = vrot.lane.b32.xlu0 %v7147_v0, %s7776_s24  ;;  %v922_v24 = vsel %vm10053_vm0, %v920_v4, %v921_v47  ;;  %5763 = vmatprep.mubr.msk.bf16.mxu0 %vm10056_vm11, %v286_v59  ;;  %v245_v2 = vsel %vm10055_vm9, %v163_v5, %v7070_v46  ;;  %v7410_v59 = vld [vmem:[#allocation5 + $0xc8] sm:$0xff]  }
 0x13d   :  { %v7095_v15 = vunpack.i.l.bf16 %v7094_v62  ;;  %v143_v63 = vsel %vm10054_vm10, %v132_v30, %v133_v60  ;;  %7138 = vrot.lane.b32.xlu1 %v7137_v58, %s7774_s2  ;;  %v285_v17 = vpack.c.bf16 %v246_v21, %v245_v2  ;;  %v7096_v36 = vunpack.i.h.bf16 %v7094_v62  ;;  %v7411_v2 = vld [vmem:[#allocation5 + $0xd0] sm:$0xff]  }
 0x13e   :  { %v256_v42 = vsel %vm10055_vm9, %v7085_v34, %v7090_v26  ;;  %v144_v0 = vsel %vm10054_vm10, %v131_v14, %v132_v30  ;;  %v134_v3 = vrot.slane %v7091_v22, 7  ;;  %v7152_v5 = vpack.i.bf16 %v8132_v52, %v8156_v6 }
 0x13f   :  { %v288_v4 = vpack.c.bf16 %v256_v42, %v255_v49  ;;  %v135_v19 = vrot.slane %v7095_v15, 7  ;;  %v165_v46 = vsel %vm8193_vm14, 0.0, %v144_v0  ;;  %v929_v58 = vsel %vm10053_vm0, %v921_v47, %v914_v41  ;;  %416 = vmatmul.mubr.bf16.vlgmr.msra.gmra.mrb[0].mxu0 %v285_v17 }
 0x140   :  { %v166_v62 = vsel %vm8202_vm15, 0.0, %v143_v63  ;;  %v7100_v14 = vunpack.i.l.bf16 %v7099_v38  ;;  %7158 = vrot.lane.b32.xlu0 %v7157_v40, %s7774_s2  ;;  %v936_v30 = vsel %vm8034_vm7, 0.0, %v922_v24  ;;  %v247_v49 = vsel %vm10055_vm9, %v165_v46, %v7081_v56  ;;  %6769 = vmatpush3.bf16.msra.mxu0 %v8104_v32 }
 0x141   :  { %5764 = vmatprep.mubr.msk.bf16.mxu0 %vm10056_vm11, %v288_v4  ;;  %v248_v21 = vsel %vm10055_vm9, %v166_v62, %v7085_v34  ;;  %7153 = vrot.lane.b32.xlu1 %v7152_v5, %s7776_s24  ;;  %v257_v41 = vsel %vm10055_vm9, %v7091_v22, %v7096_v36  ;;  %vm8270_vm0 = vcmp.eq.s32.totalorder %v70_v28, 0  ;;  %v10182_v26 = vmov 0  ;;  %v7104_v28 = vpop.permute.xlu1 %7103 }
 0x142   :  { %v258_v47 = vsel %vm10055_vm9, %v7095_v15, %v7100_v14  ;;  %v10183_v26 = vsel %vm8270_vm0, 4294967295, %v10182_v26  ;;  %vm8276_vm10 = vcmp.eq.s32.totalorder %v71_v51, 0  ;;  %v10185_v40 = vmov 0  ;;  %6770 = vmatprep.subr.bf16.mxu0 %v7410_v59 }
 0x143   :  { %10184 = vst [vmem:[#allocation18_spill] sm:$0xff] %v10183_v26  ;;  %v10186_v40 = vsel %vm8276_vm10, 4294967295, %v10185_v40  ;;  %v937_v56 = vsel %vm8045_vm8, 0.0, %v929_v58  ;;  %v7101_v34 = vunpack.i.h.bf16 %v7099_v38  ;;  %vm10188_vm9 = vcmp.lt.s32.totalorder %v7871_v13, 1 }
 0x144   :  { %10187 = vst [vmem:[#allocation19_spill] sm:$0xff] %v10186_v40  ;;  %v141_v24 = vsel %vm10188_vm9, %v134_v3, %v135_v19  ;;  %vm10189_vm11 = vmmov %vm10188_vm9  ;;  %v7162_v39 = vpack.i.bf16 %v937_v56, %v936_v30  ;;  %v287_v51 = vpack.c.bf16 %v248_v21, %v247_v49  ;;  %v290_v63 = vpack.c.bf16 %v258_v47, %v257_v41  ;;  %v7415_v49 = vld [vmem:[#allocation5 + $0xf0] sm:$0xff]   ;;  %v7416_v41 = vld [vmem:[#allocation5 + $0xf8] sm:$0xff]  }
 0x145   :  { %v142_v25 = vsel %vm10189_vm11, %v133_v60, %v134_v3  ;;  %v168_v38 = vsel %vm8276_vm10, 0.0, %v141_v24  ;;  %v7106_v17 = vunpack.i.h.bf16 %v7104_v28  ;;  %v7105_v42 = vunpack.i.l.bf16 %v7104_v28  ;;  %6771 = vmatpush3.bf16.msra.mxu0 %v7410_v59  ;;  %v7412_v60 = vld [vmem:[#allocation5 + $0xd8] sm:$0xff]   ;;  %v8328_v47 = vld [vmem:[#allocation5 + $0x180] sm:$0xff]  }
 0x146   :  { %7163 = vrot.lane.b32.xlu1 %v7162_v39, %s7774_s2  ;;  %v167_v32 = vsel %vm8270_vm0, 0.0, %v142_v25  ;;  %v136_v36 = vrot.slane %v7101_v34, 7  ;;  %6772 = vmatprep.subr.bf16.mxu0 %v7411_v2  ;;  %v1501_v0 = vpack.c.bf16 %v8160_v16, %v8136_v27  ;;  %v1502_v3 = vpack.c.bf16 %v8132_v52, %v8156_v6  ;;  %v7423_v52 = vld [vmem:[#allocation5 + $0x70] sm:$0xff]  }
 0x147   :  { %424 = vmatmul.mubr.bf16.gmra.mrb[4].mxu0 %v287_v51  ;;  %vm10190_vm9 = vcmask 523264   ;;  %vm10191_vm11 = vcmask 261120   ;;  %vm8304_vm5 = vcmp.eq.s32.totalorder %v72_v55, 0  ;;  %v10195_v58 = vmov 0 }
 0x148   :  { %5765 = vmatprep.mubr.msk.bf16.mxu0 %vm10190_vm9, %v290_v63  ;;  %v249_v4 = vsel %vm10191_vm11, %v167_v32, %v7091_v22  ;;  %vm10192_vm8 = vmmov %vm10191_vm11  ;;  %v10196_v58 = vsel %vm8304_vm5, 4294967295, %v10195_v58  ;;  %vm8310_vm1 = vcmp.eq.s32.totalorder %v73_v57, 0  ;;  %v10198_v62 = vmov 0  ;;  %v7414_v57 = vld [vmem:[#allocation5 + $0xe8] sm:$0xff]  }
 0x149   :  { %v250_v46 = vsel %vm10192_vm8, %v168_v38, %v7095_v15  ;;  %vm10193_vm7 = vmmov %vm10192_vm8  ;;  %6773 = vmatpush3.bf16.msra.mxu0 %v7411_v2  ;;  %10197 = vst [vmem:[#allocation20_spill] sm:$0xff] %v10196_v58  ;;  %v10199_v62 = vsel %vm8310_vm1, 4294967295, %v10198_v62 }
 0x14a   :  { %v259_v5 = vsel %vm10193_vm7, %v7101_v34, %v7105_v42  ;;  %vm10194_vm6 = vmmov %vm10193_vm7  ;;  %10200 = vst [vmem:[#allocation21_spill] sm:$0xff] %v10199_v62  ;;  %vm10201_vm7 = vcmp.lt.s32.totalorder %v7871_v13, 1  ;;  %6774 = vmatprep.subr.bf16.mxu0 %v7412_v60  ;;  %v289_v55 = vpack.c.bf16 %v250_v46, %v249_v4 }
 0x14b   :  { %v260_v59 = vsel %vm10194_vm6, %v8198_v18, %v7106_v17  ;;  %v139_v22 = vsel %vm10201_vm7, %v136_v36, %v137_v23  ;;  %vm10202_vm6 = vmmov %vm10201_vm7 }
 0x14c   :  { %v140_v15 = vsel %vm10202_vm6, %v135_v19, %v136_v36  ;;  %v292_v14 = vpack.c.bf16 %v260_v59, %v259_v5  ;;  %v170_v48 = vsel %vm8310_vm1, 0.0, %v139_v22  ;;  %vm10203_vm8 = vmmov %vm10190_vm9 }
 0x14d   :  { %v169_v30 = vsel %vm8304_vm5, 0.0, %v140_v15  ;;  %6775 = vmatpush3.bf16.msra.mxu0 %v7412_v60  ;;  %vm10204_vm9 = vmmov %vm10191_vm11 }
 0x14e   :  { %6776 = vmatprep.subr.bf16.mxu0 %v7413_v44  ;;  %v251_v23 = vsel %vm10204_vm9, %v169_v30, %v7101_v34  ;;  %vm10205_vm11 = vmmov %vm10204_vm9 }
 0x14f   :  { %432 = vmatmul.mubr.bf16.gmra.mrb[8].mxu0 %v289_v55  ;;  %v252_v19 = vsel %vm10205_vm11, %v170_v48, %v8198_v18  ;;  %vm10206_vm7 = vmmov %vm10202_vm6 }
 0x150   :  { %5766 = vmatprep.mubr.msk.bf16.mxu0 %vm10203_vm8, %v292_v14  ;;  %v291_v21 = vpack.c.bf16 %v252_v19, %v251_v23  ;;  %vm10207_vm8 = vmmov %vm10202_vm6 }
 0x151   :  { %6777 = vmatpush3.bf16.msra.mxu0 %v7413_v44  ;;  %vm10208_vm11 = vmmov %vm10202_vm6 }
 0x152   :  { %6778 = vmatprep.subr.bf16.mxu0 %v7414_v57 }
 0x155   :  { %6779 = vmatpush3.bf16.msra.mxu0 %v7414_v57 }
 0x156   :  { %6780 = vmatprep.subr.bf16.mxu0 %v7415_v49 }
 0x157   :  { %440 = vmatmul.mubr.bf16.gmra.mrb[12].mxu0 %v291_v21 }
 0x159   :  { %6781 = vmatpush3.bf16.msra.mxu0 %v7415_v49 }
 0x15a   :  { %6782 = vmatprep.subr.bf16.mxu0 %v7416_v41 }
 0x15d   :  { %6783 = vmatpush3.bf16.msra.mxu0 %v7416_v41 }
 0x15e   :  { %6792 = vmatprep.subr.bf16.mxu0 %v8328_v47 }
 0x19d   :  { %v7109_v56 = vpop.permute.xlu0 %7108 }
 0x19e   :  { %v7111_v34 = vunpack.i.h.bf16 %v7109_v56  ;;  %v7110_v24 = vunpack.i.l.bf16 %v7109_v56 }
 0x1a0   :  { %v891_v18 = vrot.slane %v7111_v34, 7  ;;  %v890_v28 = vrot.slane %v7110_v24, 7 }
 0x1a2   :  { %v7124_v25 = vpop.permute.xlu0 %7123  ;;  %v7114_v2 = vpop.permute.xlu1 %7113  ;;  %v904_v17 = vsel %vm10206_vm7, %v890_v28, %v891_v18  ;;  %vm10209_vm7 = vmmov %vm10204_vm9 }
 0x1a3   :  { %v7116_v39 = vunpack.i.h.bf16 %v7114_v2  ;;  %v7115_v51 = vunpack.i.l.bf16 %v7114_v2  ;;  %v907_v15 = vsel %vm8181_vm13, 0.0, %v904_v17  ;;  %v7126_v44 = vunpack.i.h.bf16 %v7124_v25 }
 0x1a4   :  { %v7125_v55 = vunpack.i.l.bf16 %v7124_v25 }
 0x1a5   :  { %v892_v63 = vrot.slane %v7116_v39, 7  ;;  %v897_v32 = vrot.slane %v7115_v51, 7 }
 0x1a6   :  { %v7129_v38 = vpop.permute.xlu0 %7128  ;;  %v7119_v36 = vpop.permute.xlu1 %7118 }
 0x1a7   :  { %v7130_v42 = vunpack.i.l.bf16 %v7129_v38  ;;  %v903_v60 = vsel %vm10202_vm6, %v891_v18, %v892_v63  ;;  %v905_v4 = vsel %vm10207_vm8, %v897_v32, %v890_v28  ;;  %v7120_v46 = vunpack.i.l.bf16 %v7119_v36  ;;  %vm10210_vm6 = vmmov %vm10209_vm7 }
 0x1a8   :  { %v906_v5 = vsel %vm8174_vm12, 0.0, %v905_v4  ;;  %v7121_v22 = vunpack.i.h.bf16 %v7119_v36  ;;  %v908_v14 = vsel %vm8193_vm14, 0.0, %v903_v60  ;;  %v7131_v48 = vunpack.i.h.bf16 %v7129_v38  ;;  %vm10211_vm8 = vmmov %vm10210_vm6 }
 0x1a9   :  { %v893_v59 = vrot.slane %v7130_v42, 7  ;;  %v994_v41 = vsel %vm10209_vm7, %v906_v5, %v7120_v46  ;;  %vm10212_vm9 = vmmov %vm10210_vm6  ;;  %vm10213_vm14 = vcmask 785408  }
 0x1aa   :  { %v7144_v30 = vpop.permute.xlu0 %7143  ;;  %v995_v24 = vsel %vm10210_vm6, %v907_v15, %v7121_v22  ;;  %v996_v28 = vsel %vm10212_vm9, %v908_v14, %v7125_v55  ;;  %v7418_v22 = vld [vmem:[#allocation5 + $0x188] sm:$0xff]   ;;  %vm10221_vm9 = vmmov %vm10210_vm6 }
 0x1ab   :  { %v902_v57 = vsel %vm10208_vm11, %v892_v63, %v893_v59  ;;  %v7146_v23 = vunpack.i.h.bf16 %v7144_v30  ;;  %v7145_v19 = vunpack.i.l.bf16 %v7144_v30  ;;  %v7134_v49 = vpop.permute.xlu1 %7133  ;;  %vm10214_vm11 = vmmov %vm10213_vm14 }
 0x1ac   :  { %v909_v21 = vsel %vm8202_vm15, 0.0, %v902_v57  ;;  %v7136_v56 = vunpack.i.h.bf16 %v7134_v49  ;;  %v7135_v34 = vunpack.i.l.bf16 %v7134_v49  ;;  %vm10215_vm12 = vmmov %vm10214_vm11  ;;  %vm10216_vm15 = vcmp.lt.s32.totalorder %v7871_v13, 1 }
 0x1ad   :  { %v894_v25 = vrot.slane %v7146_v23, 7  ;;  %v997_v18 = vsel %vm10211_vm8, %v909_v21, %v7126_v44  ;;  %vm10217_vm7 = vmmov %vm10214_vm11 }
 0x1ae   :  { %v1006_v2 = vsel %vm10213_vm14, %v997_v18, %v7145_v19  ;;  %v1005_v39 = vsel %vm10214_vm11, %v996_v28, %v7136_v56  ;;  %v7149_v51 = vpop.permute.xlu0 %7148  ;;  %v1004_v63 = vsel %vm10215_vm12, %v995_v24, %v7135_v34  ;;  %v1003_v36 = vsel %vm10217_vm7, %v994_v41, %v7131_v48  ;;  %vm10218_vm12 = vmmov %vm10216_vm15  ;;  %v7419_v24 = vld [vmem:[#allocation5 + $0x190] sm:$0xff]  }
 0x1af   :  { %v901_v38 = vsel %vm10216_vm15, %v893_v59, %v894_v25  ;;  %v1028_v17 = vpack.c.bf16 %v1006_v2, %v1005_v39  ;;  %v7139_v42 = vpop.permute.xlu1 %7138  ;;  %v1027_v46 = vpack.c.bf16 %v1004_v63, %v1003_v36  ;;  %v7150_v5 = vunpack.i.l.bf16 %v7149_v51  ;;  %vm10219_vm14 = vmmov %vm10218_vm12 }
 0x1b0   :  { %v7141_v60 = vunpack.i.h.bf16 %v7139_v42  ;;  %v7140_v4 = vunpack.i.l.bf16 %v7139_v42  ;;  %v910_v15 = vsel %vm8270_vm0, 0.0, %v901_v38  ;;  %v7151_v23 = vunpack.i.h.bf16 %v7149_v51  ;;  %vm10220_vm15 = vmmov %vm10218_vm12  ;;  %v7420_v42 = vld [vmem:[#allocation5 + $0x198] sm:$0xff]  }
 0x1b1   :  { %6784 = vmatprep.mubr.bf16.mxu0 %v1027_v46  ;;  %v998_v21 = vsel %vm10221_vm9, %v910_v15, %v7150_v5  ;;  %vm10222_vm8 = vmmov %vm10217_vm7  ;;  %vm10228_vm9 = vcmask 523264   ;;  %v7421_v46 = vld [vmem:[#allocation5 + $0x60] sm:$0xff]   ;;  %v7424_v5 = vld [vmem:[#allocation5 + $0x78] sm:$0xff]  }
 0x1b2   :  { %v896_v44 = vrot.slane %v7141_v60, 7  ;;  %v895_v55 = vrot.slane %v7140_v4, 7  ;;  %v7159_v14 = vpop.permute.xlu0 %7158  ;;  %6785 = vmatmul.mubr.bf16.vlgmr.msra.gmra.mrb[16].mxu0 %v1028_v17  ;;  %vm10223_vm11 = vmmov %vm10217_vm7  ;;  %706 = vmatpush1.bf16.msra.mxu1 %v7421_v46 }
 0x1b3   :  { %v7161_v30 = vunpack.i.h.bf16 %v7159_v14  ;;  %v7160_v57 = vunpack.i.l.bf16 %v7159_v14  ;;  %v7154_v59 = vpop.permute.xlu1 %7153  ;;  %6793 = vmatpush3.bf16.msra.mxu0 %v8328_v47  ;;  %vm10224_vm7 = vmmov %vm10210_vm6  ;;  %707 = vmatprep.subr.bf16.mxu1 %v10085_v50 }
 0x1b4   :  { %v898_v48 = vsel %vm10218_vm12, %v896_v44, %v897_v32  ;;  %v899_v19 = vsel %vm10219_vm14, %v895_v55, %v896_v44  ;;  %v900_v49 = vsel %vm10220_vm15, %v894_v25, %v895_v55  ;;  %v7156_v56 = vunpack.i.h.bf16 %v7154_v59  ;;  %6794 = vmatprep.subr.bf16.mxu0 %v7418_v22  ;;  %vm10225_vm12 = vmmov %vm10210_vm6 }
 0x1b5   :  { %v911_v41 = vsel %vm8276_vm10, 0.0, %v900_v49  ;;  %v7155_v34 = vunpack.i.l.bf16 %v7154_v59  ;;  %v912_v32 = vsel %vm8304_vm5, 0.0, %v899_v19  ;;  %v913_v18 = vsel %vm8310_vm1, 0.0, %v898_v48  ;;  %vm10226_vm14 = vmmov %vm10222_vm8  ;;  %v7425_v59 = vld [vmem:[#allocation5 + $0x80] sm:$0xff]  }
 0x1b6   :  { %v999_v28 = vsel %vm10210_vm6, %v911_v41, %v7151_v23  ;;  %v1007_v25 = vsel %vm10222_vm8, %v998_v21, %v7160_v57  ;;  %v1001_v17 = vsel %vm10225_vm12, %v913_v18, %v7156_v56  ;;  %vm10227_vm15 = vmmov %vm10222_vm8  ;;  %708 = vmatpush1.bf16.msra.mxu1 %v7422_v9  ;;  %v7426_v41 = vld [vmem:[#allocation5 + $0x88] sm:$0xff]  }
 0x1b7   :  { %v1008_v2 = vsel %vm10223_vm11, %v999_v28, %v7161_v30  ;;  %6795 = vmatpush3.bf16.msra.mxu0 %v7418_v22  ;;  %v1000_v38 = vsel %vm10224_vm7, %v912_v32, %v7155_v34  ;;  %vm10229_vm6 = vmmov %vm10228_vm9  ;;  %709 = vmatprep.subr.bf16.mxu1 %v10085_v50  ;;  %vm10232_vm7 = vcmp.lt.s32.totalorder %v7871_v13, 7 }
 0x1b8   :  { %v7164_v47 = vpop.permute.xlu1 %7163  ;;  %v1029_v63 = vpack.c.bf16 %v1008_v2, %v1007_v25  ;;  %6796 = vmatprep.subr.bf16.mxu0 %v7419_v24  ;;  %vm10230_vm8 = vmmov %vm10229_vm6 }
 0x1b9   :  { %v7166_v39 = vunpack.i.h.bf16 %v7164_v47  ;;  %v7165_v51 = vunpack.i.l.bf16 %v7164_v47  ;;  %vm10231_vm11 = vmmov %vm10229_vm6 }
 0x1ba   :  { %6788 = vmatprep.mubr.bf16.mxu0 %v1029_v63  ;;  %710 = vmatpush1.bf16.msra.mxu1 %v7423_v52  ;;  %vm10233_vm12 = vmmov %vm10232_vm7  ;;  %v7429_v52 = vld [vmem:[#allocation5 + $0xa0] sm:$0xff]  }
 0x1bb   :  { %v1009_v36 = vsel %vm10226_vm14, %v1000_v38, %v7165_v51  ;;  %v1010_v60 = vsel %vm10227_vm15, %v1001_v17, %v7166_v39  ;;  %6797 = vmatpush3.bf16.msra.mxu0 %v7419_v24  ;;  %711 = vmatprep.subr.bf16.mxu1 %v10085_v50  ;;  %vm10234_vm14 = vmmov %vm10232_vm7  ;;  %v7427_v39 = vld [vmem:[#allocation5 + $0x90] sm:$0xff]  }
 0x1bc   :  { %v1030_v4 = vpack.c.bf16 %v1010_v60, %v1009_v36  ;;  %6798 = vmatprep.subr.bf16.mxu0 %v7420_v42  ;;  %v7428_v60 = vld [vmem:[#allocation5 + $0x98] sm:$0xff]   ;;  %vm10235_vm15 = vmmov %vm10232_vm7 }
 0x1be   :  { %6789 = vmatmul.mubr.bf16.gmra.mrb[20].mxu0 %v1030_v4  ;;  %712 = vmatpush1.bf16.msra.mxu1 %v7424_v5 }
 0x1bf   :  { %6800 = vmatprep.mubr.msk.bf16.mxu0 %vm10228_vm9, %v1499_v20  ;;  %6799 = vmatpush3.bf16.msra.mxu0 %v7420_v42  ;;  %vm10236_vm9 = vmmov %vm10232_vm7 }
 0x1c0   :  { %713 = vmatprep.subr.bf16.mxu1 %v10085_v50 }
 0x1c2   :  { %714 = vmatpush1.bf16.msra.mxu1 %v7425_v59 }
 0x1c3   :  { %715 = vmatprep.subr.bf16.mxu1 %v10085_v50 }
 0x1c6   :  { %6801 = vmatmul.mubr.msk.bf16.vlgmr.msra.gmra.mrb[24].mxu0 %vm10229_vm6, %v1500_v61  ;;  %716 = vmatpush1.bf16.msra.mxu1 %v7426_v41  ;;  %vm10237_vm6 = vnez %v10153_v29  ;;  %v7431_v41 = vld [vmem:[#allocation5 + $0xb0] sm:$0xff]  }
 0x1c7   :  { %6804 = vmatprep.mubr.msk.bf16.mxu0 %vm10230_vm8, %v1501_v0  ;;  %717 = vmatprep.subr.bf16.mxu1 %v10085_v50  ;;  %vm10238_vm8 = vnez %v10161_v37 }
 0x1ca   :  { %718 = vmatpush1.bf16.msra.mxu1 %v7427_v39 }
 0x1cb   :  { %719 = vmatprep.subr.bf16.mxu1 %v10085_v50 }
 0x1ce   :  { %6805 = vmatmul.mubr.msk.bf16.gmra.mrb[28].mxu0 %vm10231_vm11, %v1502_v3  ;;  %720 = vmatpush1.bf16.msra.mxu1 %v7428_v60  ;;  %vm10239_vm11 = vmmov %vm10232_vm7 }
 0x1cf   :  { %721 = vmatprep.subr.bf16.mxu1 %v10085_v50 }
 0x1d2   :  { %722 = vmatpush1.bf16.msra.mxu1 %v7429_v52 }
 0x1d3   :  { %723 = vmatprep.subr.bf16.mxu1 %v10085_v50 }
 0x212   :  { %v417_v20 = vpop.f32.mrb[0].mxu0 }
 0x213   :  { %v418_v45 = vadd.f32 %v8396_v8, %v417_v20  ;;  %v419_v54 = vpop.f32.mrb[1].mxu0 }
 0x214   :  { %v420_v61 = vpop.f32.mrb[2].mxu0 }
 0x215   :  { %v448_v27 = vmax.f32 %v418_v45, 0.0  ;;  %v421_v16 = vadd.f32 %v8396_v8, %v420_v61  ;;  %v422_v0 = vpop.f32.mrb[3].mxu0 }
 0x217   :  { %v8402_v6 = vrot.slane %v448_v27, 1  ;;  %v449_v3 = vmax.f32 %v421_v16, 0.0 }
 0x219   :  { %v513_v22 = vrot.slane %v449_v3, 1  ;;  %v7167_v15 = vpack.i.bf16 %v449_v3, %v448_v27 }
 0x21a   :  { %v425_v44 = vpop.f32.mrb[4].mxu0 }
 0x21b   :  { %v426_v55 = vadd.f32 %v8396_v8, %v425_v44  ;;  %v427_v14 = vpop.f32.mrb[5].mxu0  ;;  %v526_v30 = vsel %vm10232_vm7, %v8402_v6, %v513_v22  ;;  %7168 = vrot.lane.b32.xlu0 %v7167_v15, %s7776_s24  ;;  %vm10240_vm7 = vnez %v10163_v10 }
 0x21c   :  { %v428_v57 = vpop.f32.mrb[6].mxu0  ;;  %v528_v15 = vsel %vm10237_vm6, 0.0, %v526_v30 }
 0x21d   :  { %v450_v23 = vmax.f32 %v426_v55, 0.0  ;;  %v429_v48 = vadd.f32 %v8396_v8, %v428_v57  ;;  %v430_v19 = vpop.f32.mrb[7].mxu0  ;;  %v7430_v57 = vld [vmem:[#allocation5 + $0xa8] sm:$0xff]  }
 0x21e   :  { %724 = vmatpush1.bf16.msra.mxu1 %v7430_v57 }
 0x21f   :  { %v514_v49 = vrot.slane %v450_v23, 1  ;;  %v451_v21 = vmax.f32 %v429_v48, 0.0  ;;  %725 = vmatprep.subr.bf16.mxu1 %v10085_v50 }
 0x221   :  { %v515_v56 = vrot.slane %v451_v21, 1  ;;  %v7177_v34 = vpack.i.bf16 %v451_v21, %v450_v23  ;;  %v525_v24 = vsel %vm10233_vm12, %v513_v22, %v514_v49  ;;  %vm10241_vm12 = vmmov %vm10236_vm9 }
 0x222   :  { %v433_v32 = vpop.f32.mrb[8].mxu0  ;;  %v529_v18 = vsel %vm7913_vm2, 0.0, %v525_v24  ;;  %726 = vmatpush1.bf16.msra.mxu1 %v7431_v41 }
 0x223   :  { %v434_v28 = vadd.f32 %v8396_v8, %v433_v32  ;;  %v435_v25 = vpop.f32.mrb[9].mxu0  ;;  %546 = vrot.lane.b32.xlu0 %v529_v18, %s7776_s24  ;;  %v524_v47 = vsel %vm10234_vm14, %v514_v49, %v515_v56  ;;  %vm10242_vm14 = vmmov %vm10236_vm9  ;;  %v7432_v32 = vld [vmem:[#allocation5 + $0xb8] sm:$0xff]   ;;  %727 = vmatprep.subr.bf16.mxu1 %v10085_v50  ;;  %v5784_v18 = vld [vmem:[#allocation7 + $0x10] ss:$0 sm:$0xff] }
 0x224   :  { %v436_v2 = vpop.f32.mrb[10].mxu0  ;;  %v530_v36 = vsel %vm7923_vm3, 0.0, %v524_v47 }
 0x225   :  { %v452_v51 = vmax.f32 %v434_v28, 0.0  ;;  %v437_v63 = vadd.f32 %v8396_v8, %v436_v2  ;;  %v438_v38 = vpop.f32.mrb[11].mxu0 }
 0x226   :  { %728 = vmatpush1.bf16.msra.mxu1 %v7432_v32 }
 0x227   :  { %v516_v17 = vrot.slane %v452_v51, 1  ;;  %v453_v42 = vmax.f32 %v437_v63, 0.0 }
 0x229   :  { %v517_v4 = vrot.slane %v453_v42, 1  ;;  %v7187_v46 = vpack.i.bf16 %v453_v42, %v452_v51  ;;  %v523_v9 = vsel %vm10235_vm15, %v515_v56, %v516_v17  ;;  %vm10243_vm15 = vnez %v10165_v12 }
 0x22a   :  { %v441_v20 = vpop.f32.mrb[12].mxu0  ;;  %v531_v45 = vsel %vm7933_vm4, 0.0, %v523_v9 }
 0x22b   :  { %v442_v54 = vadd.f32 %v8396_v8, %v441_v20  ;;  %v443_v61 = vpop.f32.mrb[13].mxu0  ;;  %v7182_v27 = vpack.i.bf16 %v531_v45, %v530_v36  ;;  %v522_v16 = vsel %vm10236_vm9, %v516_v17, %v517_v4  ;;  %vm10244_vm9 = vnez %v10168_v53 }
 0x22c   :  { %v444_v0 = vpop.f32.mrb[14].mxu0  ;;  %v532_v14 = vsel %vm10238_vm8, 0.0, %v522_v16 }
 0x22d   :  { %v454_v3 = vmax.f32 %v442_v54, 0.0  ;;  %v445_v5 = vadd.f32 %v8396_v8, %v444_v0  ;;  %7183 = vrot.lane.b32.xlu0 %v7182_v27, %s7776_s24  ;;  %v446_v22 = vpop.f32.mrb[15].mxu0 }
 0x22f   :  { %v518_v44 = vrot.slane %v454_v3, 1  ;;  %v455_v55 = vmax.f32 %v445_v5, 0.0 }
 0x231   :  { %v7172_v59 = vpack.i.bf16 %v528_v15, %v455_v55  ;;  %v519_v23 = vrot.slane %v455_v55, 1  ;;  %v521_v8 = vsel %vm10239_vm11, %v517_v4, %v518_v44 }
 0x232   :  { %v533_v48 = vsel %vm10240_vm7, 0.0, %v521_v8 }
 0x233   :  { %7173 = vrot.lane.b32.xlu1 %v7172_v59, %s7776_s24  ;;  %v7192_v30 = vpack.i.bf16 %v533_v48, %v532_v14  ;;  %v520_v19 = vsel %vm10241_vm12, %v518_v44, %v519_v23  ;;  %v527_v49 = vsel %vm10242_vm14, %v519_v23, %v8402_v6  ;;  %v7433_v6 = vld [vmem:[#allocation5 + $0x140] sm:$0xff]   ;;  %vm10245_vm12 = vmmov %vm10239_vm11 }
 0x234   :  { %v534_v21 = vsel %vm10243_vm15, 0.0, %v520_v19  ;;  %v535_v24 = vsel %vm10244_vm9, 0.0, %v527_v49  ;;  %6268 = vmatprep.subr.bf16.mxu1 %v7433_v6  ;;  %vm10246_vm14 = vmmov %vm10239_vm11 }
 0x235   :  { %7193 = vrot.lane.b32.xlu0 %v7192_v30, %s7776_s24  ;;  %v7197_v56 = vpack.i.bf16 %v534_v21, %v454_v3 }
 0x237   :  { %7178 = vrot.lane.b32.xlu1 %v7177_v34, %s7776_s24 }
 0x239   :  { %558 = vrot.lane.b32.xlu0 %v535_v24, %s7776_s24 }
 0x23b   :  { %7188 = vrot.lane.b32.xlu1 %v7187_v46, %s7776_s24 }
 0x23f   :  { %7198 = vrot.lane.b32.xlu1 %v7197_v56, %s7776_s24 }
 0x285   :  { %v6786_v28 = vpop.f32.mrb[16].mxu0 }
 0x286   :  { %v1127_v25 = vadd.f32 %v6786_v28, %v5784_v18  ;;  %v1118_v47 = vpop.f32.mrb[17].mxu0 }
 0x287   :  { %v1119_v2 = vadd.f32 %v5784_v18, %v1118_v47  ;;  %v6787_v39 = vpop.f32.mrb[18].mxu0 }
 0x288   :  { %v1151_v34 = vmax.f32 %v1127_v25, 0.0  ;;  %v1130_v51 = vadd.f32 %v6787_v39, %v5784_v18  ;;  %v1121_v63 = vpop.f32.mrb[19].mxu0 }
 0x289   :  { %v1149_v38 = vmax.f32 %v1119_v2, 0.0  ;;  %v1122_v17 = vadd.f32 %v5784_v18, %v1121_v63 }
 0x28a   :  { %v1152_v42 = vmax.f32 %v1130_v51, 0.0  ;;  %v1215_v60 = vrot.slane %v1151_v34, 1 }
 0x28b   :  { %v1150_v36 = vmax.f32 %v1122_v17, 0.0  ;;  %v1213_v9 = vrot.slane %v1149_v38, 1 }
 0x28c   :  { %v1216_v4 = vrot.slane %v1152_v42, 1  ;;  %v7212_v46 = vpack.i.bf16 %v1152_v42, %v1151_v34 }
 0x28d   :  { %v1214_v20 = vrot.slane %v1150_v36, 1  ;;  %v7202_v45 = vpack.i.bf16 %v1150_v36, %v1149_v38  ;;  %v7169_v47 = vpop.permute.xlu0 %7168 }
 0x28e   :  { %v1225_v54 = vsel %vm10239_vm11, %v1215_v60, %v1216_v4 }
 0x28f   :  { %7203 = vrot.lane.b32.xlu1 %v7202_v45, %s7768_s22  ;;  %v1226_v27 = vsel %vm10245_vm12, %v1214_v20, %v1215_v60  ;;  %v1227_v16 = vsel %vm10246_vm14, %v1213_v9, %v1214_v20  ;;  %v1231_v6 = vsel %vm7923_vm3, 0.0, %v1225_v54  ;;  %vm10247_vm12 = vmmov %vm10239_vm11  ;;  %v7171_v60 = vunpack.i.h.bf16 %v7169_v47 }
 0x290   :  { %v1230_v55 = vsel %vm7913_vm2, 0.0, %v1226_v27  ;;  %v1229_v48 = vsel %vm10237_vm6, 0.0, %v1227_v16  ;;  %vm10248_vm14 = vmmov %vm10239_vm11 }
 0x291   :  { %v6790_v61 = vpop.f32.mrb[20].mxu0  ;;  %vm10249_vm6 = vmmov %vm10239_vm11  ;;  %v489_v45 = vrot.slane %v7171_v60, 7 }
 0x292   :  { %v1143_v0 = vadd.f32 %v6790_v61, %v5784_v18  ;;  %v1134_v52 = vpop.f32.mrb[21].mxu0 }
 0x293   :  { %v1135_v3 = vadd.f32 %v5784_v18, %v1134_v52  ;;  %v6791_v5 = vpop.f32.mrb[22].mxu0  ;;  %1247 = vrot.lane.b32.xlu1 %v1230_v55, %s7768_s22 }
 0x294   :  { %v1155_v22 = vmax.f32 %v1143_v0, 0.0  ;;  %v1146_v15 = vadd.f32 %v6791_v5, %v5784_v18  ;;  %v1137_v44 = vpop.f32.mrb[23].mxu0 }
 0x295   :  { %v1153_v14 = vmax.f32 %v1135_v3, 0.0  ;;  %v1138_v57 = vadd.f32 %v5784_v18, %v1137_v44  ;;  %v547_v27 = vpop.permute.xlu0 %546 }
 0x296   :  { %v1156_v59 = vmax.f32 %v1146_v15, 0.0  ;;  %v1219_v30 = vrot.slane %v1155_v22, 1 }
 0x297   :  { %v1217_v23 = vrot.slane %v1153_v14, 1  ;;  %v1154_v8 = vmax.f32 %v1138_v57, 0.0 }
 0x298   :  { %v1220_v19 = vrot.slane %v1156_v59, 1  ;;  %v7207_v49 = vpack.i.bf16 %v1229_v48, %v1156_v59 }
 0x299   :  { %v1218_v21 = vrot.slane %v1154_v8, 1  ;;  %v8474_v41 = vpop.f32.mrb[24].mxu0  ;;  %v1224_v56 = vsel %vm10239_vm11, %v1216_v4, %v1217_v23  ;;  %v7222_v24 = vpack.i.bf16 %v1154_v8, %v1153_v14  ;;  %v7170_v4 = vunpack.i.l.bf16 %v7169_v47  ;;  %v7434_v47 = vld [vmem:[#allocation5 + $0x100] sm:$0xff]  }
 0x29a   :  { %v8478_v32 = vpop.f32.mrb[25].mxu0  ;;  %7208 = vrot.lane.b32.xlu0 %v7207_v49, %s7768_s22  ;;  %v1232_v18 = vsel %vm7933_vm4, 0.0, %v1224_v56  ;;  %v1228_v28 = vsel %vm10247_vm12, %v1220_v19, %v1213_v9  ;;  %v1221_v25 = vsel %vm10248_vm14, %v1219_v30, %v1220_v19  ;;  %vm10251_vm12 = vcmask 261120  }
 0x29b   :  { %v8489_v2 = vpop.f32.mrb[26].mxu0  ;;  %v7217_v39 = vpack.i.bf16 %v1232_v18, %v1231_v6  ;;  %v1222_v34 = vsel %vm10239_vm11, %v1218_v21, %v1219_v30  ;;  %v1223_v51 = vsel %vm10249_vm6, %v1217_v23, %v1218_v21  ;;  %v1235_v36 = vsel %vm10243_vm15, 0.0, %v1221_v25  ;;  %vm10252_vm14 = vmmov %vm10251_vm12 }
 0x29c   :  { %v8495_v63 = vpop.f32.mrb[27].mxu0  ;;  %v1233_v38 = vsel %vm10238_vm8, 0.0, %v1223_v51  ;;  %v1234_v17 = vsel %vm10240_vm7, 0.0, %v1222_v34  ;;  %v7232_v9 = vpack.i.bf16 %v1235_v36, %v1155_v22  ;;  %v488_v54 = vrot.slane %v7170_v4, 7 }
 0x29d   :  { %7218 = vrot.lane.b32.xlu1 %v7217_v39, %s7768_s22  ;;  %v7227_v42 = vpack.i.bf16 %v1234_v17, %v1233_v38  ;;  %v1236_v52 = vsel %vm10244_vm9, 0.0, %v1228_v28  ;;  %vm10250_vm6 = vcmp.lt.s32.totalorder %v7871_v13, 1  ;;  %v577_v44 = vsel %vm10251_vm12, %v7171_v60, %v547_v27 }
 0x29e   :  { %7213 = vrot.lane.b32.xlu0 %v7212_v46, %s7768_s22  ;;  %v502_v46 = vsel %vm10250_vm6, %v488_v54, %v489_v45  ;;  %vm10253_vm11 = vmmov %vm10250_vm6  ;;  %vm10256_vm15 = vnez %v10171_v7 }
 0x29f   :  { %v7184_v5 = vpop.permute.xlu0 %7183  ;;  %v505_v55 = vsel %vm8181_vm13, 0.0, %v502_v46  ;;  %vm10254_vm6 = vmmov %vm10251_vm12  ;;  %vm10255_vm12 = vcmask 523264  }
 0x2a0   :  { %v7185_v59 = vunpack.i.l.bf16 %v7184_v5  ;;  %v7186_v48 = vunpack.i.h.bf16 %v7184_v5  ;;  %v569_v21 = vsel %vm10254_vm6, %v505_v55, %v7171_v60  ;;  %vm10258_vm9 = vmmov %vm10254_vm6 }
 0x2a1   :  { %v8505_v20 = vpop.f32.mrb[28].mxu0  ;;  %7228 = vrot.lane.b32.xlu1 %v7227_v42, %s7768_s22  ;;  %vm10259_vm7 = vmmov %vm10254_vm6  ;;  %v7435_v42 = vld [vmem:[#allocation5 + $0x148] sm:$0xff]  }
 0x2a2   :  { %v8508_v61 = vpop.f32.mrb[29].mxu0  ;;  %7223 = vrot.lane.b32.xlu0 %v7222_v24, %s7768_s22 }
 0x2a3   :  { %v8511_v16 = vpop.f32.mrb[30].mxu0 }
 0x2a4   :  { %v8513_v0 = vpop.f32.mrb[31].mxu0 }
 0x2a5   :  { %1259 = vrot.lane.b32.xlu1 %v1236_v52, %s7768_s22  ;;  %v7174_v3 = vpop.permute.xlu1 %7173 }
 0x2a6   :  { %7233 = vrot.lane.b32.xlu0 %v7232_v9, %s7768_s22  ;;  %v7176_v22 = vunpack.i.h.bf16 %v7174_v3  ;;  %v8521_v15 = vunpack.i.l.bf16 %v7174_v3 }
 0x2a7   :  { %v7194_v56 = vpop.permute.xlu0 %7193 }
 0x2a8   :  { %v495_v14 = vrot.slane %v8521_v15, 7  ;;  %v576_v57 = vsel %vm10252_vm14, %v7170_v4, %v7176_v22  ;;  %vm10257_vm14 = vmmov %vm10254_vm6  ;;  %v7196_v38 = vunpack.i.h.bf16 %v7194_v56  ;;  %v7195_v17 = vunpack.i.l.bf16 %v7194_v56  ;;  %v7436_v22 = vld [vmem:[#allocation5 + $0x108] sm:$0xff]  }
 0x2a9   :  { %v7179_v23 = vpop.permute.xlu1 %7178  ;;  %v609_v8 = vpack.c.bf16 %v577_v44, %v576_v57  ;;  %vm10260_vm6 = vmmov %vm10253_vm11 }
 0x2aa   :  { %v7181_v30 = vunpack.i.h.bf16 %v7179_v23  ;;  %v7180_v19 = vunpack.i.l.bf16 %v7179_v23  ;;  %v503_v49 = vsel %vm10253_vm11, %v495_v14, %v488_v54  ;;  %vm10264_vm8 = vmmov %vm10257_vm14 }
 0x2ab   :  { %5780 = vmatprep.mubr.msk.bf16.mxu1 %vm10255_vm12, %v609_v8  ;;  %v504_v24 = vsel %vm10256_vm15, 0.0, %v503_v49  ;;  %vm10266_vm4 = vmmov %vm10264_vm8 }
 0x2ac   :  { %v491_v6 = vrot.slane %v7181_v30, 7  ;;  %v490_v18 = vrot.slane %v7180_v19, 7  ;;  %v568_v28 = vsel %vm10257_vm14, %v504_v24, %v7170_v4  ;;  %v578_v25 = vsel %vm10258_vm9, %v7180_v19, %v7185_v59  ;;  %v7437_v59 = vld [vmem:[#allocation5 + $0x150] sm:$0xff]  }
 0x2ad   :  { %v608_v39 = vpack.c.bf16 %v569_v21, %v568_v28  ;;  %v579_v34 = vsel %vm10259_vm7, %v7181_v30, %v7186_v48  ;;  %v7189_v51 = vpop.permute.xlu1 %7188  ;;  %vm10261_vm9 = vnez %v10180_v43  ;;  %vm10262_vm7 = vmmov %vm10255_vm12  ;;  %vm10263_vm12 = vnez %v10177_v11  ;;  %v7438_v21 = vld [vmem:[#allocation5 + $0x110] sm:$0xff]  }
 0x2ae   :  { %v611_v36 = vpack.c.bf16 %v579_v34, %v578_v25  ;;  %v7191_v60 = vunpack.i.h.bf16 %v7189_v51  ;;  %v7190_v9 = vunpack.i.l.bf16 %v7189_v51  ;;  %v500_v54 = vsel %vm10253_vm11, %v490_v18, %v491_v6  ;;  %vm10265_vm11 = vmmov %vm10264_vm8  ;;  %v559_v25 = vpop.permute.xlu0 %558 }
 0x2af   :  { %738 = vmatmul.mubr.bf16.vlgmr.msra.gmra.mrb[0].mxu1 %v608_v39  ;;  %v501_v4 = vsel %vm10260_vm6, %v489_v45, %v490_v18  ;;  %v507_v27 = vsel %vm10261_vm9, 0.0, %v500_v54  ;;  %v7439_v18 = vld [vmem:[#allocation5 + $0x158] sm:$0xff]  }
 0x2b0   :  { %v493_v52 = vrot.slane %v7191_v60, 7  ;;  %v492_v46 = vrot.slane %v7190_v9, 7  ;;  %5781 = vmatprep.mubr.msk.bf16.mxu1 %vm10262_vm7, %v611_v36  ;;  %v506_v3 = vsel %vm10263_vm12, 0.0, %v501_v4  ;;  %v571_v5 = vsel %vm10257_vm14, %v507_v27, %v7181_v30  ;;  %6269 = vmatpush3.bf16.msra.mxu1 %v7434_v47  ;;  %vm10267_vm7 = vmmov %vm10260_vm6  ;;  %v7440_v39 = vld [vmem:[#allocation5 + $0x118] sm:$0xff]   ;;  %v7443_v27 = vld [vmem:[#allocation5 + $0x168] sm:$0xff]  }
 0x2b1   :  { %v570_v44 = vsel %vm10264_vm8, %v506_v3, %v7180_v19  ;;  %v581_v55 = vsel %vm10265_vm11, %v7191_v60, %v7196_v38  ;;  %v580_v45 = vsel %vm10266_vm4, %v7190_v9, %v7195_v17  ;;  %v7199_v57 = vpop.permute.xlu1 %7198  ;;  %6270 = vmatprep.subr.bf16.mxu1 %v7435_v42  ;;  %vm10268_vm4 = vcmask 523264   ;;  %vm10269_vm14 = vmmov %vm10264_vm8  ;;  %v7441_v38 = vld [vmem:[#allocation5 + $0x160] sm:$0xff]   ;;  %v7445_v3 = vld [vmem:[#allocation5 + $0x170] sm:$0xff]  }
 0x2b2   :  { %v7200_v23 = vunpack.i.l.bf16 %v7199_v57  ;;  %v610_v8 = vpack.c.bf16 %v571_v5, %v570_v44  ;;  %v498_v48 = vsel %vm10260_vm6, %v492_v46, %v493_v52  ;;  %v499_v49 = vsel %vm10267_vm7, %v491_v6, %v492_v46  ;;  %vm10270_vm11 = vmmov %vm10264_vm8  ;;  %v7444_v46 = vld [vmem:[#allocation5 + $0x128] sm:$0xff]   ;;  %v7447_v44 = vld [vmem:[#allocation5 + $0x178] sm:$0xff]  }
 0x2b3   :  { %v613_v30 = vpack.c.bf16 %v581_v55, %v580_v45  ;;  %v7201_v56 = vunpack.i.h.bf16 %v7199_v57  ;;  %v508_v19 = vsel %vm8270_vm0, 0.0, %v499_v49  ;;  %v509_v24 = vsel %vm8276_vm10, 0.0, %v498_v48  ;;  %vm10271_vm6 = vmmov %vm10264_vm8  ;;  %v7448_v55 = vld [vmem:[#allocation5 + $0x138] sm:$0xff]  }
 0x2b4   :  { %6271 = vmatpush3.bf16.msra.mxu1 %v7436_v22  ;;  %v494_v28 = vrot.slane %v7200_v23, 7  ;;  %v572_v47 = vsel %vm10264_vm8, %v508_v19, %v7190_v9  ;;  %v573_v6 = vsel %vm10269_vm14, %v509_v24, %v7191_v60  ;;  %v583_v51 = vsel %vm10271_vm6, %v8521_v15, %v559_v25  ;;  %v7442_v60 = vld [vmem:[#allocation5 + $0x120] sm:$0xff]   ;;  %vm10274_vm14 = vmmov %vm10271_vm6  ;;  %v7446_v22 = vld [vmem:[#allocation5 + $0x130] sm:$0xff]  }
 0x2b5   :  { %6272 = vmatprep.subr.bf16.mxu1 %v7437_v59  ;;  %v582_v34 = vsel %vm10270_vm11, %v7200_v23, %v7201_v56  ;;  %v612_v36 = vpack.c.bf16 %v573_v6, %v572_v47  ;;  %vm10273_vm8 = vcmask 523264   ;;  %vm10275_vm11 = vmmov %vm10271_vm6 }
 0x2b6   :  { %v496_v17 = vsel %vm10267_vm7, %v494_v28, %v495_v14  ;;  %v615_v9 = vpack.c.bf16 %v583_v51, %v582_v34 }
 0x2b7   :  { %746 = vmatmul.mubr.bf16.gmra.mrb[4].mxu1 %v610_v8  ;;  %v511_v4 = vsel %vm8310_vm1, 0.0, %v496_v17 }
 0x2b8   :  { %5782 = vmatprep.mubr.msk.bf16.mxu1 %vm10268_vm4, %v613_v30  ;;  %6273 = vmatpush3.bf16.msra.mxu1 %v7438_v21  ;;  %vm10272_vm4 = vmmov %vm10267_vm7 }
 0x2b9   :  { %6274 = vmatprep.subr.bf16.mxu1 %v7439_v18  ;;  %v497_v42 = vsel %vm10272_vm4, %v493_v52, %v494_v28  ;;  %v575_v52 = vsel %vm10275_vm11, %v511_v4, %v8521_v15  ;;  %vm10276_vm6 = vmmov %vm10272_vm4 }
 0x2ba   :  { %v510_v54 = vsel %vm8304_vm5, 0.0, %v497_v42  ;;  %vm10277_vm7 = vmmov %vm10273_vm8 }
 0x2bb   :  { %v574_v14 = vsel %vm10274_vm14, %v510_v54, %v7200_v23  ;;  %vm10278_vm4 = vmmov %vm10277_vm7 }
 0x2bc   :  { %6275 = vmatpush3.bf16.msra.mxu1 %v7440_v39  ;;  %v614_v5 = vpack.c.bf16 %v575_v52, %v574_v14  ;;  %vm10280_vm14 = vmmov %vm10278_vm4 }
 0x2bd   :  { %6276 = vmatprep.subr.bf16.mxu1 %v7441_v38  ;;  %vm10281_vm11 = vmmov %vm10278_vm4 }
 0x2bf   :  { %754 = vmatmul.mubr.bf16.gmra.mrb[8].mxu1 %v612_v36 }
 0x2c0   :  { %5783 = vmatprep.mubr.msk.bf16.mxu1 %vm10273_vm8, %v615_v9  ;;  %6277 = vmatpush3.bf16.msra.mxu1 %v7442_v60  ;;  %vm10279_vm8 = vmmov %vm10276_vm6 }
 0x2c1   :  { %6278 = vmatprep.subr.bf16.mxu1 %v7443_v27 }
 0x2c4   :  { %6279 = vmatpush3.bf16.msra.mxu1 %v7444_v46 }
 0x2c5   :  { %6280 = vmatprep.subr.bf16.mxu1 %v7445_v3 }
 0x2c7   :  { %762 = vmatmul.mubr.bf16.gmra.mrb[12].mxu1 %v614_v5 }
 0x2c8   :  { %6281 = vmatpush3.bf16.msra.mxu1 %v7446_v22 }
 0x2c9   :  { %6282 = vmatprep.subr.bf16.mxu1 %v7447_v44 }
 0x2cc   :  { %6283 = vmatpush3.bf16.msra.mxu1 %v7448_v55 }
 0x301   :  { %v7204_v45 = vpop.permute.xlu1 %7203 }
 0x302   :  { %v7206_v57 = vunpack.i.h.bf16 %v7204_v45  ;;  %v7205_v59 = vunpack.i.l.bf16 %v7204_v45 }
 0x304   :  { %v1190_v23 = vrot.slane %v7206_v57, 7  ;;  %v1189_v8 = vrot.slane %v7205_v59, 7 }
 0x305   :  { %v1248_v15 = vpop.permute.xlu1 %1247 }
 0x306   :  { %v1203_v48 = vsel %vm10276_vm6, %v1189_v8, %v1190_v23  ;;  %v1278_v19 = vsel %vm10277_vm7, %v7206_v57, %v1248_v15  ;;  %vm10282_vm6 = vmmov %vm10278_vm4 }
 0x307   :  { %v1206_v56 = vsel %vm8181_vm13, 0.0, %v1203_v48  ;;  %vm10283_vm7 = vmmov %vm10278_vm4 }
 0x308   :  { %v1270_v17 = vsel %vm10280_vm14, %v1206_v56, %v7206_v57  ;;  %vm10286_vm14 = vmmov %vm10282_vm6 }
 0x30c   :  { %v7209_v49 = vpop.permute.xlu0 %7208 }
 0x30d   :  { %v7211_v30 = vunpack.i.h.bf16 %v7209_v49  ;;  %v8582_v21 = vunpack.i.l.bf16 %v7209_v49 }
 0x30f   :  { %v1196_v24 = vrot.slane %v8582_v21, 7  ;;  %v7219_v18 = vpop.permute.xlu1 %7218  ;;  %v1277_v28 = vsel %vm10278_vm4, %v7205_v59, %v7211_v30  ;;  %vm10284_vm4 = vmmov %vm10279_vm8 }
 0x310   :  { %v7221_v25 = vunpack.i.h.bf16 %v7219_v18  ;;  %v7220_v47 = vunpack.i.l.bf16 %v7219_v18  ;;  %v7214_v6 = vpop.permute.xlu0 %7213  ;;  %v1318_v39 = vpack.c.bf16 %v1278_v19, %v1277_v28 }
 0x311   :  { %v1204_v34 = vsel %vm10279_vm8, %v1196_v24, %v1189_v8  ;;  %v7216_v51 = vunpack.i.h.bf16 %v7214_v6  ;;  %v7215_v38 = vunpack.i.l.bf16 %v7214_v6  ;;  %vm10285_vm8 = vmmov %vm10284_vm4 }
 0x312   :  { %v1205_v42 = vsel %vm10256_vm15, 0.0, %v1204_v34  ;;  %1458 = vmatprep.mubr.bf16.mxu1 %v1318_v39 }
 0x313   :  { %v1192_v36 = vrot.slane %v7216_v51, 7  ;;  %v1191_v9 = vrot.slane %v7215_v38, 7  ;;  %v7229_v60 = vpop.permute.xlu1 %7228  ;;  %v1269_v54 = vsel %vm10281_vm11, %v1205_v42, %v7205_v59  ;;  %v1279_v4 = vsel %vm10282_vm6, %v7215_v38, %v7220_v47  ;;  %vm10287_vm11 = vmmov %vm10282_vm6 }
 0x314   :  { %v7224_v27 = vpop.permute.xlu0 %7223  ;;  %v1317_v14 = vpack.c.bf16 %v1270_v17, %v1269_v54  ;;  %v1280_v52 = vsel %vm10283_vm7, %v7216_v51, %v7221_v25  ;;  %v7231_v44 = vunpack.i.h.bf16 %v7229_v60  ;;  %v7230_v55 = vunpack.i.l.bf16 %v7229_v60  ;;  %vm10288_vm7 = vmmov %vm10282_vm6 }
 0x315   :  { %v7226_v46 = vunpack.i.h.bf16 %v7224_v27  ;;  %v7225_v3 = vunpack.i.l.bf16 %v7224_v27  ;;  %v1320_v5 = vpack.c.bf16 %v1280_v52, %v1279_v4  ;;  %v1201_v22 = vsel %vm10284_vm4, %v1191_v9, %v1192_v36 }
 0x316   :  { %1459 = vmatmul.mubr.bf16.vlgmr.msra.gmra.mrb[16].mxu1 %v1317_v14  ;;  %v1202_v45 = vsel %vm10285_vm8, %v1190_v23, %v1191_v9  ;;  %v1208_v57 = vsel %vm10261_vm9, 0.0, %v1201_v22  ;;  %vm10289_vm8 = vmmov %vm10284_vm4 }
 0x317   :  { %v1194_v59 = vrot.slane %v7226_v46, 7  ;;  %v1193_v8 = vrot.slane %v7225_v3, 7  ;;  %1466 = vmatprep.mubr.bf16.mxu1 %v1320_v5  ;;  %v1207_v15 = vsel %vm10263_vm12, 0.0, %v1202_v45  ;;  %v1272_v30 = vsel %vm10287_vm11, %v1208_v57, %v7216_v51  ;;  %vm10291_vm11 = vmmov %vm10282_vm6 }
 0x318   :  { %v7234_v48 = vpop.permute.xlu0 %7233  ;;  %v1271_v49 = vsel %vm10286_vm14, %v1207_v15, %v7215_v38  ;;  %v1281_v56 = vsel %vm10282_vm6, %v7225_v3, %v7230_v55  ;;  %v1282_v19 = vsel %vm10288_vm7, %v7226_v46, %v7231_v44  ;;  %v1260_v38 = vpop.permute.xlu1 %1259  ;;  %vm10290_vm14 = vmmov %vm10282_vm6 }
 0x319   :  { %v7235_v18 = vunpack.i.l.bf16 %v7234_v48  ;;  %v1199_v23 = vsel %vm10284_vm4, %v1193_v8, %v1194_v59  ;;  %v1200_v28 = vsel %vm10289_vm8, %v1192_v36, %v1193_v8  ;;  %v1319_v25 = vpack.c.bf16 %v1272_v30, %v1271_v49  ;;  %vm10292_vm7 = vmmov %vm10284_vm4 }
 0x31a   :  { %v1322_v47 = vpack.c.bf16 %v1282_v19, %v1281_v56  ;;  %v7236_v6 = vunpack.i.h.bf16 %v7234_v48  ;;  %v1209_v39 = vsel %vm8270_vm0, 0.0, %v1200_v28  ;;  %v1210_v34 = vsel %vm8276_vm10, 0.0, %v1199_v23  ;;  %vm10293_vm8 = vmmov %vm10282_vm6  ;;  %v8649_v28 = vld [vmem:[#allocation7 + $0x20] ss:$0 sm:$0xff] }
 0x31b   :  { %v1195_v51 = vrot.slane %v7235_v18, 7  ;;  %v1273_v17 = vsel %vm10290_vm14, %v1209_v39, %v7225_v3  ;;  %v1274_v42 = vsel %vm10291_vm11, %v1210_v34, %v7226_v46  ;;  %v1284_v54 = vsel %vm10293_vm8, %v8582_v21, %v1260_v38  ;;  %vm10294_vm14 = vmmov %vm10282_vm6 }
 0x31c   :  { %v1283_v9 = vsel %vm10282_vm6, %v7235_v18, %v7236_v6  ;;  %v1321_v4 = vpack.c.bf16 %v1274_v42, %v1273_v17  ;;  %vm10295_vm11 = vmmov %vm10282_vm6  ;;  %v1582_v42 = vadd.f32 %v8649_v28, %v8495_v63  ;;  %v7453_v63 = vld [vmem:[#allocation5 + $0x1f0] sm:$0xff]   ;;  %vm10308_vm6 = vcmp.lt.s32.totalorder %v7871_v13, 7 }
 0x31d   :  { %v1197_v36 = vsel %vm10292_vm7, %v1195_v51, %v1196_v24  ;;  %v1198_v60 = vsel %vm10284_vm4, %v1194_v59, %v1195_v51  ;;  %v1324_v27 = vpack.c.bf16 %v1284_v54, %v1283_v9  ;;  %v1579_v51 = vadd.f32 %v8649_v28, %v8478_v32  ;;  %v7450_v54 = vld [vmem:[#allocation5 + $0x1a0] sm:$0xff]   ;;  %vm10311_vm7 = vmmov %vm10308_vm6 }
 0x31e   :  { %1467 = vmatmul.mubr.bf16.gmra.mrb[20].mxu1 %v1319_v25  ;;  %v1211_v14 = vsel %vm8304_vm5, 0.0, %v1198_v60  ;;  %v1212_v52 = vsel %vm8310_vm1, 0.0, %v1197_v36  ;;  %v8651_v25 = vld [vmem:[#allocation7 + $0x18] ss:$0 sm:$0xff]  ;;  %v7449_v60 = vld [vmem:[#allocation5 + $0x1e0] sm:$0xff]   ;;  %vm10312_vm4 = vmmov %vm10308_vm6  ;;  %vm10313_vm8 = vnez %v10159_v35 }
 0x31f   :  { %1474 = vmatprep.mubr.bf16.mxu1 %v1322_v47  ;;  %v1275_v46 = vsel %vm10294_vm14, %v1211_v14, %v7235_v18  ;;  %v1276_v24 = vsel %vm10295_vm11, %v1212_v52, %v8582_v21  ;;  %6316 = vmatprep.subr.bf16.mxu1 %v7449_v60  ;;  %vm10315_vm14 = vmmov %vm10312_vm4 }
 0x320   :  { %v1323_v3 = vpack.c.bf16 %v1276_v24, %v1275_v46  ;;  %6317 = vmatpush3.bf16.msra.mxu1 %v7450_v54  ;;  %v7457_v54 = vld [vmem:[#allocation5 + $0x200] sm:$0xff]   ;;  %vm10317_vm11 = vmmov %vm10312_vm4 }
 0x326   :  { %1475 = vmatmul.mubr.bf16.gmra.mrb[24].mxu1 %v1321_v4  ;;  %v7451_v4 = vld [vmem:[#allocation5 + $0x1e8] sm:$0xff]  }
 0x327   :  { %1482 = vmatprep.mubr.bf16.mxu1 %v1324_v27  ;;  %6318 = vmatprep.subr.bf16.mxu1 %v7451_v4  ;;  %v1595_v4 = vadd.f32 %v8649_v28, %v8508_v61  ;;  %v7458_v61 = vld [vmem:[#allocation5 + $0x1c0] sm:$0xff]  }
 0x32e   :  { %1483 = vmatmul.mubr.bf16.gmra.mrb[28].mxu1 %v1323_v3 }
 0x382   :  { %v8633_v5 = vpop.f32.mrb[0].mxu1 }
 0x383   :  { %10296 = vst [vmem:[#allocation22_spill] sm:$0xff] %v8633_v5  ;;  %v741_v22 = vpop.f32.mrb[1].mxu1 }
 0x384   :  { %v8635_v44 = vpop.f32.mrb[2].mxu1  ;;  %v7452_v22 = vld [vmem:[#allocation5 + $0x1a8] sm:$0xff]  }
 0x385   :  { %10297 = vst [vmem:[#allocation23_spill] sm:$0xff] %v8635_v44  ;;  %v744_v55 = vpop.f32.mrb[3].mxu1  ;;  %6319 = vmatpush3.bf16.msra.mxu1 %v7452_v22 }
 0x386   :  { %6320 = vmatprep.subr.bf16.mxu1 %v7453_v63 }
 0x38a   :  { %v8637_v45 = vpop.f32.mrb[4].mxu1 }
 0x38b   :  { %10298 = vst [vmem:[#allocation24_spill] sm:$0xff] %v8637_v45  ;;  %v749_v57 = vpop.f32.mrb[5].mxu1 }
 0x38c   :  { %v8639_v59 = vpop.f32.mrb[6].mxu1  ;;  %v1587_v57 = vadd.f32 %v8474_v41, %v8649_v28 }
 0x38d   :  { %10299 = vst [vmem:[#allocation25_spill] sm:$0xff] %v8639_v59  ;;  %v752_v8 = vpop.f32.mrb[7].mxu1 }
 0x392   :  { %v8641_v15 = vpop.f32.mrb[8].mxu1 }
 0x393   :  { %10300 = vst [vmem:[#allocation26_spill] sm:$0xff] %v8641_v15  ;;  %v757_v48 = vpop.f32.mrb[9].mxu1 }
 0x394   :  { %v8643_v49 = vpop.f32.mrb[10].mxu1 }
 0x395   :  { %10301 = vst [vmem:[#allocation27_spill] sm:$0xff] %v8643_v49  ;;  %v760_v21 = vpop.f32.mrb[11].mxu1 }
 0x39a   :  { %v8645_v30 = vpop.f32.mrb[12].mxu1 }
 0x39b   :  { %10302 = vst [vmem:[#allocation28_spill] sm:$0xff] %v8645_v30  ;;  %v765_v56 = vpop.f32.mrb[13].mxu1 }
 0x39c   :  { %v8647_v19 = vpop.f32.mrb[14].mxu1  ;;  %v1590_v56 = vadd.f32 %v8489_v2, %v8649_v28 }
 0x39d   :  { %10303 = vst [vmem:[#allocation29_spill] sm:$0xff] %v8647_v19  ;;  %v768_v18 = vpop.f32.mrb[15].mxu1 }
 0x3e9   :  { %v6284_v23 = vpop.f32.mrb[16].mxu1 }
 0x3ea   :  { %v6285_v47 = vpop.f32.mrb[17].mxu1 }
 0x3eb   :  { %v6286_v6 = vadd.f32 %v6285_v47, %v6284_v23  ;;  %v6287_v39 = vpop.f32.mrb[18].mxu1  ;;  %v7454_v47 = vld [vmem:[#allocation5 + $0x1b0] sm:$0xff]  }
 0x3ec   :  { %v6288_v34 = vpop.f32.mrb[19].mxu1  ;;  %6321 = vmatpush3.bf16.msra.mxu1 %v7454_v47 }
 0x3ed   :  { %v1461_v38 = vadd.f32 %v6286_v6, %v8651_v25  ;;  %v6289_v17 = vadd.f32 %v6288_v34, %v6287_v39  ;;  %v7455_v6 = vld [vmem:[#allocation5 + $0x1f8] sm:$0xff]  }
 0x3ee   :  { %6322 = vmatprep.subr.bf16.mxu1 %v7455_v6 }
 0x3ef   :  { %v1609_v9 = vadd.f32 %v1579_v51, %v1461_v38  ;;  %v1464_v36 = vadd.f32 %v6289_v17, %v8651_v25 }
 0x3f1   :  { %v1610_v27 = vadd.f32 %v1582_v42, %v1464_v36  ;;  %v6290_v14 = vpop.f32.mrb[20].mxu1  ;;  %v8659_v46 = vmax.f32 %v1609_v9, 0.0  ;;  %v7456_v36 = vld [vmem:[#allocation5 + $0x1b8] sm:$0xff]  }
 0x3f2   :  { %v6291_v52 = vpop.f32.mrb[21].mxu1  ;;  %6323 = vmatpush3.bf16.msra.mxu1 %v7456_v36 }
 0x3f3   :  { %10304 = vst [vmem:[#allocation30_spill] sm:$0xff] %v8659_v46  ;;  %v8661_v24 = vmax.f32 %v1610_v27, 0.0  ;;  %v6292_v32 = vadd.f32 %v6291_v52, %v6290_v14  ;;  %v6293_v3 = vpop.f32.mrb[22].mxu1  ;;  %6324 = vmatprep.subr.bf16.mxu1 %v7457_v54 }
 0x3f4   :  { %v6294_v55 = vpop.f32.mrb[23].mxu1 }
 0x3f5   :  { %10305 = vst [vmem:[#allocation31_spill] sm:$0xff] %v8661_v24  ;;  %v1469_v8 = vadd.f32 %v6292_v32, %v8651_v25  ;;  %v6295_v48 = vadd.f32 %v6294_v55, %v6293_v3  ;;  %v7237_v21 = vpack.i.bf16 %v8661_v24, %v8659_v46  ;;  %v1682_v2 = vrot.slane %v8661_v24, 1 }
 0x3f6   :  { %v1598_v3 = vadd.f32 %v8649_v28, %v8513_v0  ;;  %6325 = vmatpush3.bf16.msra.mxu1 %v7458_v61 }
 0x3f7   :  { %v1611_v18 = vadd.f32 %v1587_v57, %v1469_v8  ;;  %v1472_v23 = vadd.f32 %v6295_v48, %v8651_v25  ;;  %7238 = vrot.lane.b32.xlu0 %v7237_v21, %s7768_s22  ;;  %v7459_v57 = vld [vmem:[#allocation5 + $0x208] sm:$0xff]  }
 0x3f8   :  { %6326 = vmatprep.subr.bf16.mxu1 %v7459_v57  ;;  %v7464_v57 = vld [vmem:[#allocation5 + $0x1d8] sm:$0xff]  }
 0x3f9   :  { %v8672_v39 = vmax.f32 %v1611_v18, 0.0  ;;  %v1612_v41 = vadd.f32 %v1590_v56, %v1472_v23  ;;  %v6296_v34 = vpop.f32.mrb[24].mxu1 }
 0x3fa   :  { %v6297_v51 = vpop.f32.mrb[25].mxu1 }
 0x3fb   :  { %10306 = vst [vmem:[#allocation32_spill] sm:$0xff] %v8672_v39  ;;  %v8674_v38 = vmax.f32 %v1612_v41, 0.0  ;;  %v6298_v17 = vadd.f32 %v6297_v51, %v6296_v34  ;;  %v6299_v42 = vpop.f32.mrb[26].mxu1  ;;  %v1683_v9 = vrot.slane %v8672_v39, 1  ;;  %v7460_v41 = vld [vmem:[#allocation5 + $0x1c8] sm:$0xff]   ;;  %v1603_v51 = vadd.f32 %v8505_v20, %v8649_v28 }
 0x3fc   :  { %v6300_v60 = vpop.f32.mrb[27].mxu1  ;;  %6327 = vmatpush3.bf16.msra.mxu1 %v7460_v41 }
 0x3fd   :  { %10307 = vst [vmem:[#allocation33_spill] sm:$0xff] %v8674_v38  ;;  %v1477_v27 = vadd.f32 %v6298_v17, %v8651_v25  ;;  %v6301_v14 = vadd.f32 %v6300_v60, %v6299_v42  ;;  %v1694_v52 = vsel %vm10308_vm6, %v1682_v2, %v1683_v9  ;;  %v1684_v63 = vrot.slane %v8674_v38, 1 }
 0x3fe   :  { %v1698_v32 = vsel %vm7913_vm2, 0.0, %v1694_v52  ;;  %v1606_v60 = vadd.f32 %v8511_v16, %v8649_v28  ;;  %vm10318_vm6 = vnez %v10153_v29  ;;  %vm10324_vm2 = vnez %v10165_v12 }
 0x3ff   :  { %v1613_v22 = vadd.f32 %v1595_v4, %v1477_v27  ;;  %v1480_v55 = vadd.f32 %v6301_v14, %v8651_v25  ;;  %1715 = vrot.lane.b32.xlu0 %v1698_v32, %s7768_s22  ;;  %v1693_v6 = vsel %vm10311_vm7, %v1683_v9, %v1684_v63  ;;  %v1681_v4 = vrot.slane %v8659_v46, 1  ;;  %v7461_v27 = vld [vmem:[#allocation5 + $0x210] sm:$0xff]   ;;  %vm10319_vm7 = vmmov %vm10312_vm4 }
 0x400   :  { %v1699_v54 = vsel %vm7923_vm3, 0.0, %v1693_v6  ;;  %6328 = vmatprep.subr.bf16.mxu1 %v7461_v27  ;;  %v7247_v6 = vpack.i.bf16 %v8674_v38, %v8672_v39 }
 0x401   :  { %v8690_v8 = vmax.f32 %v1613_v22, 0.0  ;;  %v1614_v48 = vadd.f32 %v1598_v3, %v1480_v55  ;;  %v6302_v21 = vpop.f32.mrb[28].mxu1  ;;  %v7462_v3 = vld [vmem:[#allocation5 + $0x1d0] sm:$0xff]   ;;  %v7463_v22 = vld [vmem:[#allocation5 + $0x218] sm:$0xff]   ;;  %v1695_v55 = vsel %vm10315_vm14, %v1681_v4, %v1682_v2  ;;  %vm10321_vm14 = vnez %v10163_v10 }
 0x402   :  { %v6303_v56 = vpop.f32.mrb[29].mxu1  ;;  %6329 = vmatpush3.bf16.msra.mxu1 %v7462_v3 }
 0x403   :  { %10309 = vst [vmem:[#allocation34_spill] sm:$0xff] %v8690_v8  ;;  %v8692_v18 = vmax.f32 %v1614_v48, 0.0  ;;  %v6304_v23 = vadd.f32 %v6303_v56, %v6302_v21  ;;  %v6305_v0 = vpop.f32.mrb[30].mxu1  ;;  %v1685_v47 = vrot.slane %v8690_v8, 1  ;;  %v1697_v48 = vsel %vm10318_vm6, 0.0, %v1695_v55  ;;  %6330 = vmatprep.subr.bf16.mxu1 %v7463_v22 }
 0x404   :  { %v6306_v34 = vpop.f32.mrb[31].mxu1  ;;  %vm10323_vm6 = vnez %v10168_v53 }
 0x405   :  { %10310 = vst [vmem:[#allocation35_spill] sm:$0xff] %v8692_v18  ;;  %v1485_v17 = vadd.f32 %v6304_v23, %v8651_v25  ;;  %v6307_v42 = vadd.f32 %v6306_v34, %v6305_v0  ;;  %v1692_v36 = vsel %vm10312_vm4, %v1684_v63, %v1685_v47  ;;  %v1686_v32 = vrot.slane %v8692_v18, 1 }
 0x406   :  { %v1700_v9 = vsel %vm10313_vm8, 0.0, %v1692_v36  ;;  %vm10320_vm4 = vnez %v10161_v37  ;;  %6331 = vmatpush3.bf16.msra.mxu1 %v7464_v57 }
 0x407   :  { %v1615_v14 = vadd.f32 %v1603_v51, %v1485_v17  ;;  %v1488_v20 = vadd.f32 %v6307_v42, %v8651_v25  ;;  %v7252_v52 = vpack.i.bf16 %v1700_v9, %v1699_v54  ;;  %v1691_v25 = vsel %vm10317_vm11, %v1685_v47, %v1686_v32  ;;  %2534 = vmatprep.subr.bf16.mxu1 %v10085_v50  ;;  %vm10322_vm11 = vmmov %vm10319_vm7 }
 0x408   :  { %v1701_v23 = vsel %vm10320_vm4, 0.0, %v1691_v25  ;;  %v7257_v17 = vpack.i.bf16 %v8692_v18, %v8690_v8 }
 0x409   :  { %v8711_v16 = vmax.f32 %v1615_v14, 0.0  ;;  %v1616_v28 = vadd.f32 %v1606_v60, %v1488_v20  ;;  %7253 = vrot.lane.b32.xlu0 %v7252_v52, %s7768_s22 }
 0x40b   :  { %10314 = vst [vmem:[#allocation36_spill] sm:$0xff] %v8711_v16  ;;  %v8716_v63 = vmax.f32 %v1616_v28, 0.0  ;;  %v1687_v61 = vrot.slane %v8711_v16, 1 }
 0x40d   :  { %10316 = vst [vmem:[#allocation37_spill] sm:$0xff] %v8716_v63  ;;  %v7242_v21 = vpack.i.bf16 %v1697_v48, %v8716_v63  ;;  %v1690_v56 = vsel %vm10319_vm7, %v1686_v32, %v1687_v61  ;;  %v1688_v2 = vrot.slane %v8716_v63, 1 }
 0x40e   :  { %v1702_v0 = vsel %vm10321_vm14, 0.0, %v1690_v56 }
 0x40f   :  { %7243 = vrot.lane.b32.xlu1 %v7242_v21, %s7768_s22  ;;  %v7262_v47 = vpack.i.bf16 %v1702_v0, %v1701_v23  ;;  %v1696_v41 = vsel %vm10322_vm11, %v1688_v2, %v1681_v4  ;;  %v1689_v34 = vsel %vm10319_vm7, %v1687_v61, %v1688_v2  ;;  %vm10327_vm11 = vcmp.lt.s32.totalorder %v7871_v13, 1 }
 0x410   :  { %v1704_v51 = vsel %vm10323_vm6, 0.0, %v1696_v41  ;;  %v1703_v42 = vsel %vm10324_vm2, 0.0, %v1689_v34  ;;  %vm10328_vm7 = vmmov %vm10327_vm11  ;;  %vm10329_vm6 = vcmask 523264  }
 0x411   :  { %7263 = vrot.lane.b32.xlu0 %v7262_v47, %s7768_s22  ;;  %v7267_v36 = vpack.i.bf16 %v1703_v42, %v8711_v16  ;;  %vm10331_vm2 = vmmov %vm10329_vm6 }
 0x413   :  { %7248 = vrot.lane.b32.xlu1 %v7247_v6, %s7768_s22 }
 0x415   :  { %1727 = vrot.lane.b32.xlu0 %v1704_v51, %s7768_s22 }
 0x417   :  { %7258 = vrot.lane.b32.xlu1 %v7257_v17, %s7768_s22 }
 0x41b   :  { %7268 = vrot.lane.b32.xlu1 %v7267_v36, %s7768_s22 }
 0x469   :  { %v7239_v60 = vpop.permute.xlu0 %7238 }
 0x46a   :  { %v7241_v54 = vunpack.i.h.bf16 %v7239_v60  ;;  %v7240_v9 = vunpack.i.l.bf16 %v7239_v60 }
 0x46c   :  { %v8752_v4 = vmax.f32 %v8659_v46, %v7240_v9  ;;  %v8755_v27 = vmax.f32 %v8661_v24, %v7241_v54  ;;  %v1658_v22 = vrot.slane %v7241_v54, 7  ;;  %v1657_v28 = vrot.slane %v7240_v9, 7 }
 0x46e   :  { %10325 = vst [vmem:[#allocation38_spill] sm:$0xff] %v8752_v4  ;;  %10326 = vst [vmem:[#allocation39_spill] sm:$0xff] %v8755_v27  ;;  %v7272_v14 = vpack.i.bf16 %v8755_v27, %v8752_v4  ;;  %v10084_v20 = vrot.slane %v8752_v4, 7  ;;  %v10082_v52 = vrot.slane %v8755_v27, 7  ;;  %v1671_v61 = vsel %vm10328_vm7, %v1657_v28, %v1658_v22 }
 0x46f   :  { %v1674_v56 = vsel %vm8181_vm13, 0.0, %v1671_v61  ;;  %v10360_v30 = vrot.slane %v8755_v27, 7 }
 0x470   :  { %7273 = vrot.lane.b32.xlu1 %v7272_v14, %s7768_s22  ;;  %v8770_v3 = vsel %vm10327_vm11, %v10084_v20, %v10082_v52  ;;  %vm10330_vm11 = vmmov %vm10329_vm6  ;;  %v1738_v34 = vsel %vm10331_vm2, %v1674_v56, %v7241_v54  ;;  %v7465_v56 = vld [vmem:[#allocation5 + $0x2a0] sm:$0xff]  }
 0x471   :  { %v1716_v55 = vpop.permute.xlu0 %1715 }
 0x472   :  { %v1746_v2 = vsel %vm10329_vm6, %v7241_v54, %v1716_v55  ;;  %vm10332_vm6 = vmmov %vm10331_vm2 }
 0x47b   :  { %v7254_v25 = vpop.permute.xlu0 %7253 }
 0x47c   :  { %v7256_v36 = vunpack.i.h.bf16 %v7254_v25  ;;  %v7255_v60 = vunpack.i.l.bf16 %v7254_v25 }
 0x481   :  { %v7244_v57 = vpop.permute.xlu1 %7243 }
 0x482   :  { %v7246_v48 = vunpack.i.h.bf16 %v7244_v57  ;;  %v8774_v21 = vunpack.i.l.bf16 %v7244_v57 }
 0x483   :  { %v7264_v0 = vpop.permute.xlu0 %7263 }
 0x484   :  { %v10083_v23 = vrot.slane %v8774_v21, 7  ;;  %v1745_v47 = vsel %vm10330_vm11, %v7240_v9, %v7246_v48  ;;  %v7266_v14 = vunpack.i.h.bf16 %v7264_v0  ;;  %v8791_v54 = vmax.f32 %v8716_v63, %v8774_v21  ;;  %vm10336_vm11 = vmmov %vm10331_vm2 }
 0x485   :  { %v7249_v6 = vpop.permute.xlu1 %7248  ;;  %v1786_v41 = vpack.c.bf16 %v1746_v2, %v1745_v47  ;;  %v7265_v20 = vunpack.i.l.bf16 %v7264_v0  ;;  %v10341_v0 = vmov 0  }
 0x486   :  { %v1672_v51 = vsel %vm10328_vm7, %v10083_v23, %v1657_v28  ;;  %v7251_v17 = vunpack.i.h.bf16 %v7249_v6  ;;  %v7250_v42 = vunpack.i.l.bf16 %v7249_v6  ;;  %10333 = vst [vmem:[#allocation40_spill] sm:$0xff] %v8791_v54 }
 0x487   :  { %1926 = vmatprep.mubr.bf16.mxu1 %v1786_v41  ;;  %v1673_v55 = vsel %vm10256_vm15, 0.0, %v1672_v51 }
 0x488   :  { %v1660_v61 = vrot.slane %v7251_v17, 7  ;;  %v1659_v57 = vrot.slane %v7250_v42, 7  ;;  %v1737_v48 = vsel %vm10332_vm6, %v1673_v55, %v7240_v9  ;;  %v8794_v47 = vmax.f32 %v8672_v39, %v7250_v42  ;;  %vm10337_vm6 = vmmov %vm10328_vm7 }
 0x489   :  { %v7259_v2 = vpop.permute.xlu1 %7258  ;;  %v1785_v28 = vpack.c.bf16 %v1738_v34, %v1737_v48  ;;  %v8797_v25 = vmax.f32 %v8674_v38, %v7251_v17  ;;  %v1747_v6 = vsel %vm10331_vm2, %v7250_v42, %v7255_v60  ;;  %v1748_v9 = vsel %vm10336_vm11, %v7251_v17, %v7256_v36  ;;  %vm10340_vm11 = vmmov %vm10331_vm2 }
 0x48a   :  { %10334 = vst [vmem:[#allocation41_spill] sm:$0xff] %v8794_v47  ;;  %v8800_v41 = vunpack.i.h.bf16 %v7259_v2  ;;  %v7260_v51 = vunpack.i.l.bf16 %v7259_v2  ;;  %v1669_v55 = vsel %vm10328_vm7, %v1659_v57, %v1660_v61  ;;  %v1788_v48 = vpack.c.bf16 %v1748_v9, %v1747_v6  ;;  %vm10342_vm7 = vmmov %vm10331_vm2 }
 0x48b   :  { %10335 = vst [vmem:[#allocation42_spill] sm:$0xff] %v8797_v25  ;;  %1927 = vmatmul.mubr.bf16.vlgmr.msra.gmra.mrb[32].mxu1 %v1785_v28  ;;  %v7277_v34 = vpack.i.bf16 %v8797_v25, %v8794_v47  ;;  %v1670_v32 = vsel %vm10337_vm6, %v1658_v22, %v1659_v57  ;;  %v1676_v52 = vsel %vm10261_vm9, 0.0, %v1669_v55  ;;  %v7466_v28 = vld [vmem:[#allocation5 + $0x2a8] sm:$0xff]   ;;  %vm10343_vm6 = vmmov %vm10331_vm2  ;;  %vm10344_vm9 = vcmp.lt.s32.totalorder %v7871_v13, 1 }
 0x48c   :  { %v1662_v60 = vrot.slane %v8800_v41, 7  ;;  %v1661_v23 = vrot.slane %v7260_v51, 7  ;;  %v8813_v2 = vmax.f32 %v8690_v8, %v7260_v51  ;;  %v8817_v36 = vmax.f32 %v8692_v18, %v8800_v41  ;;  %2535 = vmatpush1.bf16.msra.mxu1 %v7465_v56  ;;  %1934 = vmatprep.mubr.bf16.mxu1 %v1788_v48 }
 0x48d   :  { %7278 = vrot.lane.b32.xlu0 %v7277_v34, %s7768_s22  ;;  %v7269_v22 = vpop.permute.xlu1 %7268  ;;  %v1675_v57 = vsel %vm10263_vm12, 0.0, %v1670_v32  ;;  %v1740_v6 = vsel %vm10331_vm2, %v1676_v52, %v7251_v17  ;;  %2536 = vmatprep.subr.bf16.mxu1 %v10341_v0  ;;  %v1749_v34 = vsel %vm10342_vm7, %v7260_v51, %v7265_v20  ;;  %v1750_v48 = vsel %vm10343_vm6, %v8800_v41, %v7266_v14  ;;  %vm10345_vm2 = vmmov %vm10344_vm9  ;;  %v1728_v14 = vpop.permute.xlu0 %1727 }
 0x48e   :  { %10338 = vst [vmem:[#allocation43_spill] sm:$0xff] %v8813_v2  ;;  %10339 = vst [vmem:[#allocation44_spill] sm:$0xff] %v8817_v36  ;;  %v7271_v55 = vunpack.i.h.bf16 %v7269_v22  ;;  %v8824_v50 = vunpack.i.l.bf16 %v7269_v22  ;;  %v7282_v49 = vpack.i.bf16 %v8817_v36, %v8813_v2  ;;  %v1739_v56 = vsel %vm10340_vm11, %v1675_v57, %v7250_v42 }
 0x48f   :  { %v1667_v52 = vsel %vm10344_vm9, %v1661_v23, %v1662_v60  ;;  %v1668_v32 = vsel %vm10345_vm2, %v1660_v61, %v1661_v23  ;;  %v1787_v57 = vpack.c.bf16 %v1740_v6, %v1739_v56  ;;  %vm10347_vm9 = vmmov %vm10343_vm6  ;;  %v7467_v23 = vld [vmem:[#allocation5 + $0x2b0] sm:$0xff]   ;;  %v2351_v6 = vrot.slane %v8794_v47, 1 }
 0x490   :  { %7283 = vrot.lane.b32.xlu1 %v7282_v49, %s7768_s22  ;;  %v8840_v17 = vmax.f32 %v8711_v16, %v8824_v50  ;;  %v1677_v42 = vsel %vm8270_vm0, 0.0, %v1668_v32  ;;  %v1678_v20 = vsel %vm8276_vm10, 0.0, %v1667_v52  ;;  %2537 = vmatpush1.bf16.msra.mxu1 %v7466_v28  ;;  %v1663_v22 = vrot.slane %v8824_v50, 7  ;;  %vm10348_vm11 = vmmov %vm10343_vm6 }
 0x491   :  { %v1741_v9 = vsel %vm10347_vm9, %v1677_v42, %v7260_v51  ;;  %v1742_v49 = vsel %vm10348_vm11, %v1678_v20, %v8800_v41  ;;  %2538 = vmatprep.subr.bf16.mxu1 %v10341_v0  ;;  %v1790_v32 = vpack.c.bf16 %v1750_v48, %v1749_v34  ;;  %vm10349_vm7 = vmmov %vm10343_vm6  ;;  %v2349_v28 = vrot.slane %v8752_v4, 1 }
 0x492   :  { %10346 = vst [vmem:[#allocation45_spill] sm:$0xff] %v8840_v17  ;;  %v7287_v61 = vpack.i.bf16 %v8791_v54, %v8840_v17  ;;  %v1751_v52 = vsel %vm10349_vm7, %v8824_v50, %v7271_v55  ;;  %v10350_v51 = vrot.slane %v8752_v4, 7  ;;  %v10351_v56 = vrot.slane %v8791_v54, 7  ;;  %vm10352_vm6 = vmmov %vm10345_vm2 }
 0x493   :  { %1935 = vmatmul.mubr.bf16.gmra.mrb[36].mxu1 %v1787_v57  ;;  %vm10353_vm2 = vmmov %vm10349_vm7  ;;  %v1789_v55 = vpack.c.bf16 %v1742_v49, %v1741_v9  ;;  %v2350_v34 = vrot.slane %v8755_v27, 1  ;;  %v2356_v48 = vrot.slane %v8791_v54, 1  ;;  %v10354_v57 = vrot.slane %v8774_v21, 7 }
 0x494   :  { %v8863_v41 = vsel %vm10352_vm6, %v10351_v56, %v10350_v51  ;;  %v1752_v42 = vsel %vm10353_vm2, %v8774_v21, %v1728_v14  ;;  %7288 = vrot.lane.b32.xlu0 %v7287_v61, %s7768_s22  ;;  %1942 = vmatprep.mubr.bf16.mxu1 %v1790_v32  ;;  %vm10355_vm9 = vmmov %vm10352_vm6  ;;  %v7468_v51 = vld [vmem:[#allocation5 + $0x2b8] sm:$0xff]   ;;  %v2352_v56 = vrot.slane %v8797_v25, 1  ;;  %v2353_v14 = vrot.slane %v8813_v2, 1 }
 0x495   :  { %v1792_v20 = vpack.c.bf16 %v1752_v42, %v1751_v52  ;;  %v1665_v19 = vsel %vm10355_vm9, %v1663_v22, %v10354_v57  ;;  %2539 = vmatpush1.bf16.msra.mxu1 %v7467_v23  ;;  %vm10356_vm11 = vmmov %vm10352_vm6  ;;  %v2327_v9 = vrot.slane %v8794_v47, 7  ;;  %v2328_v49 = vrot.slane %v8797_v25, 7 }
 0x496   :  { %v1666_v61 = vsel %vm10356_vm11, %v1662_v60, %v1663_v22  ;;  %2540 = vmatprep.subr.bf16.mxu1 %v10341_v0  ;;  %v2354_v32 = vrot.slane %v8817_v36, 1  ;;  %vm10357_vm7 = vcmp.lt.s32.totalorder %v7871_v13, 7  ;;  %v2355_v42 = vrot.slane %v8840_v17, 1  ;;  %vm10359_vm2 = vmmov %vm10355_vm9 }
 0x497   :  { %v2360_v52 = vsel %vm10357_vm7, %v2352_v56, %v2353_v14  ;;  %vm10358_vm6 = vmmov %vm10357_vm7  ;;  %v2329_v57 = vrot.slane %v8813_v2, 7  ;;  %v8894_v15 = vsel %vm10359_vm2, %v2327_v9, %v2328_v49 }
 0x498   :  { %v2361_v23 = vsel %vm10358_vm6, %v2351_v6, %v2352_v56  ;;  %v2368_v22 = vsel %vm10313_vm8, 0.0, %v2360_v52  ;;  %vm10361_vm9 = vmmov %vm10359_vm2  ;;  %v1680_v56 = vsel %vm8310_vm1, 0.0, %v1665_v19  ;;  %v2359_v45 = vsel %vm10358_vm6, %v2353_v14, %v2354_v32 }
 0x499   :  { %v2367_v60 = vsel %vm7923_vm3, 0.0, %v2361_v23  ;;  %v8900_v44 = vsel %vm10361_vm9, %v10360_v30, %v2327_v9  ;;  %vm10362_vm11 = vmmov %vm10358_vm6  ;;  %2541 = vmatpush1.bf16.msra.mxu1 %v7468_v51  ;;  %v7469_v23 = vld [vmem:[#allocation5 + $0x2c0] sm:$0xff]   ;;  %v2330_v19 = vrot.slane %v8817_v36, 7  ;;  %v1679_v51 = vsel %vm8304_vm5, 0.0, %v1666_v61 }
 0x49a   :  { %v2362_v59 = vsel %vm10362_vm11, %v2350_v34, %v2351_v6  ;;  %v8906_v5 = vpack.c.bf16 %v2368_v22, %v2367_v60  ;;  %vm10363_vm7 = vmmov %vm10358_vm6  ;;  %2542 = vmatprep.subr.bf16.mxu1 %v10341_v0  ;;  %v8918_v6 = vsel %vm10359_vm2, %v2328_v49, %v2329_v57  ;;  %v2369_v9 = vsel %vm10320_vm4, 0.0, %v2359_v45 }
 0x49b   :  { %v2358_v52 = vsel %vm10363_vm7, %v2354_v32, %v2355_v42  ;;  %1943 = vmatmul.mubr.bf16.gmra.mrb[40].mxu1 %v1789_v55  ;;  %vm10364_vm9 = vmmov %vm10358_vm6 }
 0x49c   :  { %v2370_v30 = vsel %vm10321_vm14, 0.0, %v2358_v52  ;;  %v2357_v60 = vsel %vm10364_vm9, %v2355_v42, %v2356_v48  ;;  %vm10365_vm11 = vmmov %vm10358_vm6  ;;  %1950 = vmatprep.mubr.bf16.mxu1 %v1792_v20  ;;  %vm10367_vm6 = vnez %v10165_v12  ;;  %v7470_v42 = vld [vmem:[#allocation5 + $0x2c8] sm:$0xff]  }
 0x49d   :  { %v2364_v14 = vsel %vm10365_vm11, %v2356_v48, %v2349_v28  ;;  %v8928_v32 = vpack.c.bf16 %v2370_v30, %v2369_v9  ;;  %vm10366_vm7 = vmmov %vm10359_vm2  ;;  %v2371_v55 = vsel %vm10367_vm6, 0.0, %v2357_v60  ;;  %vm10368_vm2 = vnez %v10168_v53  ;;  %2543 = vmatpush1.bf16.msra.mxu1 %v7469_v23 }
 0x49e   :  { %v8932_v49 = vsel %vm10366_vm7, %v2329_v57, %v2330_v19  ;;  %v2372_v61 = vsel %vm10368_vm2, 0.0, %v2364_v14  ;;  %vm10369_vm14 = vmmov %vm10364_vm9  ;;  %v2331_v48 = vrot.slane %v8840_v17, 7  ;;  %vm10370_vm9 = vcmask 523264   ;;  %2544 = vmatprep.subr.bf16.mxu1 %v10341_v0  ;;  %v7473_v14 = vld [vmem:[#allocation5 + $0x2e0] sm:$0xff]  }
 0x49f   :  { %v2363_v45 = vsel %vm10369_vm14, %v2349_v28, %v2350_v34  ;;  %v8940_v22 = vpack.c.bf16 %v2372_v61, %v2371_v55  ;;  %v1743_v57 = vsel %vm10370_vm9, %v1679_v51, %v8824_v50  ;;  %vm10371_vm11 = vmmov %vm10370_vm9  ;;  %vm10372_vm14 = vnez %v10155_v31  ;;  %v7471_v51 = vld [vmem:[#allocation5 + $0x2d0] sm:$0xff]   ;;  %v7476_v61 = vld [vmem:[#allocation5 + $0x2f8] sm:$0xff]  }
 0x4a0   :  { %v1744_v52 = vsel %vm10371_vm11, %v1680_v56, %v8774_v21  ;;  %v2366_v23 = vsel %vm10372_vm14, 0.0, %v2362_v59  ;;  %v10373_v30 = vrot.slane %v8791_v54, 7  ;;  %vm10374_vm9 = vmmov %vm10366_vm7  ;;  %vm10375_vm11 = vnez %v10153_v29  ;;  %v7472_v59 = vld [vmem:[#allocation5 + $0x2d8] sm:$0xff]   ;;  %v7475_v55 = vld [vmem:[#allocation5 + $0x2f0] sm:$0xff]  }
 0x4a1   :  { %v2334_v50 = vsel %vm10374_vm9, %v2330_v19, %v2331_v48  ;;  %v1791_v21 = vpack.c.bf16 %v1744_v52, %v1743_v57  ;;  %v2365_v56 = vsel %vm10375_vm11, 0.0, %v2363_v45  ;;  %2545 = vmatpush1.bf16.msra.mxu1 %v7470_v42  ;;  %vm10376_vm2 = vcmask 523264   ;;  %v7474_v19 = vld [vmem:[#allocation5 + $0x2e8] sm:$0xff]  }
 0x4a2   :  { %v2333_v9 = vsel %vm10366_vm7, %v2331_v48, %v10373_v30  ;;  %v2438_v60 = vpack.c.bf16 %v2366_v23, %v2365_v56  ;;  %2546 = vmatprep.subr.bf16.mxu1 %v10341_v0  ;;  %v2342_v57 = vsel %vm8181_vm13, 0.0, %v8770_v3  ;;  %v2341_v52 = vsel %vm10256_vm15, 0.0, %v8863_v41  ;;  %vm10377_vm7 = vmmov %vm10376_vm2  ;;  %v7652_v31 = vld [vmem:[#allocation5 + $0x7c8] sm:$0xff]  }
 0x4a3   :  { %1951 = vmatmul.mubr.bf16.gmra.mrb[44].mxu1 %v1791_v21  ;;  %vm10378_vm9 = vmmov %vm10376_vm2  ;;  %v2343_v3 = vsel %vm10263_vm12, 0.0, %v8900_v44  ;;  %vm10379_vm13 = vnez %v10180_v43  ;;  %v2346_v44 = vsel %vm8276_vm10, 0.0, %v8932_v49 }
 0x4a4   :  { %5866 = vmatprep.mubr.msk.bf16.mxu1 %vm10376_vm2, %v2438_v60  ;;  %v2344_v41 = vsel %vm10379_vm13, 0.0, %v8894_v15  ;;  %vm10382_vm12 = vmmov %vm10376_vm2 }
 0x4a5   :  { %2547 = vmatpush1.bf16.msra.mxu1 %v7471_v51  ;;  %vm10384_vm10 = vmmov %vm10376_vm2 }
 0x4a6   :  { %2548 = vmatprep.subr.bf16.mxu1 %v10341_v0 }
 0x4a9   :  { %2549 = vmatpush1.bf16.msra.mxu1 %v7472_v59 }
 0x4aa   :  { %2550 = vmatprep.subr.bf16.mxu1 %v10341_v0 }
 0x4ad   :  { %2551 = vmatpush1.bf16.msra.mxu1 %v7473_v14 }
 0x4ae   :  { %2552 = vmatprep.subr.bf16.mxu1 %v10341_v0 }
 0x4b1   :  { %2553 = vmatpush1.bf16.msra.mxu1 %v7474_v19 }
 0x4b2   :  { %2554 = vmatprep.subr.bf16.mxu1 %v10341_v0 }
 0x4b5   :  { %2555 = vmatpush1.bf16.msra.mxu1 %v7475_v55 }
 0x4b6   :  { %2556 = vmatprep.subr.bf16.mxu1 %v10341_v0 }
 0x4b9   :  { %2557 = vmatpush1.bf16.msra.mxu1 %v7476_v61 }
 0x4e2   :  { %v7274_v45 = vpop.permute.xlu1 %7273 }
 0x4e3   :  { %v7276_v42 = vunpack.i.h.bf16 %v7274_v45  ;;  %v7275_v48 = vunpack.i.l.bf16 %v7274_v45 }
 0x4e5   :  { %v2406_v23 = vsel %vm10376_vm2, %v2342_v57, %v7276_v42  ;;  %v2405_v30 = vsel %vm10377_vm7, %v2341_v52, %v7275_v48  ;;  %vm10380_vm7 = vmmov %vm10376_vm2 }
 0x4e6   :  { %v2437_v21 = vpack.c.bf16 %v2406_v23, %v2405_v30  ;;  %v2347_v23 = vsel %vm8304_vm5, 0.0, %v2334_v50 }
 0x4e8   :  { %2567 = vmatmul.mubr.bf16.vlgmr.msra.gmra.mrb[48].mxu1 %v2437_v21 }
 0x4e9   :  { %5867 = vmatprep.mubr.msk.bf16.mxu1 %vm10378_vm9, %v8906_v5  ;;  %v2345_v5 = vsel %vm8270_vm0, 0.0, %v8918_v6  ;;  %vm10381_vm9 = vmmov %vm10376_vm2  ;;  %v2348_v6 = vsel %vm8310_vm1, 0.0, %v2333_v9 }
 0x4ff   :  { %v7279_v0 = vpop.permute.xlu0 %7278 }
 0x500   :  { %v7281_v56 = vunpack.i.h.bf16 %v7279_v0  ;;  %v7280_v51 = vunpack.i.l.bf16 %v7279_v0  ;;  %v9007_v0 = vld [vmem:[#allocation7 + $0x28] ss:$0 sm:$0xff] }
 0x502   :  { %v7284_v60 = vpop.permute.xlu1 %7283  ;;  %v2407_v59 = vsel %vm10376_vm2, %v2343_v3, %v7280_v51  ;;  %v2408_v14 = vsel %vm10380_vm7, %v2344_v41, %v7281_v56  ;;  %vm10383_vm7 = vmmov %vm10376_vm2 }
 0x503   :  { %v7286_v19 = vunpack.i.h.bf16 %v7284_v60  ;;  %v7285_v55 = vunpack.i.l.bf16 %v7284_v60  ;;  %v2439_v61 = vpack.c.bf16 %v2408_v14, %v2407_v59  ;;  %v7477_v14 = vld [vmem:[#allocation5 + $0x260] sm:$0xff]  }
 0x504   :  { %6356 = vmatprep.subr.bf16.mxu0 %v7477_v14 }
 0x505   :  { %2575 = vmatmul.mubr.bf16.gmra.mrb[52].mxu1 %v2439_v61  ;;  %v2409_v45 = vsel %vm10381_vm9, %v2345_v5, %v7285_v55  ;;  %v2410_v15 = vsel %vm10382_vm12, %v2346_v44, %v7286_v19  ;;  %vm10385_vm12 = vmmov %vm10376_vm2  ;;  %v7478_v19 = vld [vmem:[#allocation5 + $0x220] sm:$0xff]  }
 0x506   :  { %5868 = vmatprep.mubr.msk.bf16.mxu1 %vm10376_vm2, %v8928_v32  ;;  %v7289_v42 = vpop.permute.xlu0 %7288  ;;  %v2441_v48 = vpack.c.bf16 %v2410_v15, %v2409_v45  ;;  %6357 = vmatpush3.bf16.msra.mxu0 %v7478_v19 }
 0x507   :  { %v7291_v57 = vunpack.i.h.bf16 %v7289_v42  ;;  %v7290_v52 = vunpack.i.l.bf16 %v7289_v42 }
 0x509   :  { %v2411_v49 = vsel %vm10383_vm7, %v2347_v23, %v7290_v52  ;;  %v2412_v30 = vsel %vm10384_vm10, %v2348_v6, %v7291_v57  ;;  %v7480_v57 = vld [vmem:[#allocation5 + $0x228] sm:$0xff]   ;;  %v7481_v52 = vld [vmem:[#allocation5 + $0x270] sm:$0xff]   ;;  %vm10386_vm10 = vcmp.lt.s32.totalorder %v7871_v13, 7 }
 0x50a   :  { %v2443_v21 = vpack.c.bf16 %v2412_v30, %v2411_v49  ;;  %vm10387_vm9 = vmmov %vm10386_vm10 }
 0x50b   :  { %vm10388_vm2 = vmmov %vm10387_vm9 }
 0x50c   :  { %vm10389_vm7 = vmmov %vm10388_vm2 }
 0x50d   :  { %2583 = vmatmul.mubr.bf16.gmra.mrb[56].mxu1 %v2441_v48  ;;  %v7479_v48 = vld [vmem:[#allocation5 + $0x268] sm:$0xff]  }
 0x50e   :  { %5869 = vmatprep.mubr.msk.bf16.mxu1 %vm10385_vm12, %v8940_v22  ;;  %6358 = vmatprep.subr.bf16.mxu0 %v7479_v48  ;;  %v7484_v48 = vld [vmem:[#allocation5 + $0x238] sm:$0xff]   ;;  %vm10390_vm12 = vmmov %vm10388_vm2 }
 0x50f   :  { %6359 = vmatpush3.bf16.msra.mxu0 %v7480_v57  ;;  %v7485_v57 = vld [vmem:[#allocation5 + $0x280] sm:$0xff]  }
 0x510   :  { %6360 = vmatprep.subr.bf16.mxu0 %v7481_v52 }
 0x515   :  { %2591 = vmatmul.mubr.bf16.gmra.mrb[60].mxu1 %v2443_v21  ;;  %v7482_v21 = vld [vmem:[#allocation5 + $0x230] sm:$0xff]  }
 0x516   :  { %6361 = vmatpush3.bf16.msra.mxu0 %v7482_v21 }
 0x55e   :  { %v6332_v32 = vpop.f32.mrb[32].mxu1 }
 0x55f   :  { %v6333_v56 = vpop.f32.mrb[33].mxu1 }
 0x560   :  { %v6334_v51 = vadd.f32 %v6333_v56, %v6332_v32  ;;  %v6335_v3 = vpop.f32.mrb[34].mxu1 }
 0x561   :  { %v6336_v50 = vpop.f32.mrb[35].mxu1 }
 0x562   :  { %v1929_v41 = vadd.f32 %v6334_v51, %v9007_v0  ;;  %v6337_v9 = vadd.f32 %v6336_v50, %v6335_v3  ;;  %v7483_v51 = vld [vmem:[#allocation5 + $0x278] sm:$0xff]  }
 0x563   :  { %6362 = vmatprep.subr.bf16.mxu0 %v7483_v51 }
 0x564   :  { %v1959_v60 = vmax.f32 %v1929_v41, 0.0  ;;  %v1932_v59 = vadd.f32 %v6337_v9, %v9007_v0  ;;  %6363 = vmatpush3.bf16.msra.mxu0 %v7484_v48 }
 0x565   :  { %6364 = vmatprep.subr.bf16.mxu0 %v7485_v57  ;;  %v7489_v57 = vld [vmem:[#allocation5 + $0x290] sm:$0xff]  }
 0x566   :  { %v1960_v55 = vmax.f32 %v1932_v59, 0.0  ;;  %v6338_v61 = vpop.f32.mrb[36].mxu1  ;;  %v9011_v5 = vrot.slane %v1959_v60, 1 }
 0x567   :  { %v6339_v22 = vpop.f32.mrb[37].mxu1 }
 0x568   :  { %v2024_v44 = vrot.slane %v1960_v55, 1  ;;  %v6340_v45 = vadd.f32 %v6339_v22, %v6338_v61  ;;  %v6341_v15 = vpop.f32.mrb[38].mxu1  ;;  %v7292_v42 = vpack.i.bf16 %v1960_v55, %v1959_v60 }
 0x569   :  { %v6342_v23 = vpop.f32.mrb[39].mxu1 }
 0x56a   :  { %v1937_v6 = vadd.f32 %v6340_v45, %v9007_v0  ;;  %v6343_v49 = vadd.f32 %v6342_v23, %v6341_v15  ;;  %7293 = vrot.lane.b32.xlu1 %v7292_v42, %s7768_s22  ;;  %v9018_v30 = vsel %vm10386_vm10, %v9011_v5, %v2024_v44  ;;  %v7486_v23 = vld [vmem:[#allocation5 + $0x240] sm:$0xff]   ;;  %vm10391_vm10 = vmmov %vm10388_vm2 }
 0x56b   :  { %6365 = vmatpush3.bf16.msra.mxu0 %v7486_v23 }
 0x56c   :  { %v1961_v32 = vmax.f32 %v1937_v6, 0.0  ;;  %v1940_v56 = vadd.f32 %v6343_v49, %v9007_v0  ;;  %v7487_v6 = vld [vmem:[#allocation5 + $0x288] sm:$0xff]  }
 0x56d   :  { %6366 = vmatprep.subr.bf16.mxu0 %v7487_v6  ;;  %v2039_v6 = vsel %vm10375_vm11, 0.0, %v9018_v30 }
 0x56e   :  { %v2025_v3 = vrot.slane %v1961_v32, 1  ;;  %v1962_v50 = vmax.f32 %v1940_v56, 0.0  ;;  %v6344_v41 = vpop.f32.mrb[40].mxu1 }
 0x56f   :  { %v6345_v9 = vpop.f32.mrb[41].mxu1 }
 0x570   :  { %v2026_v60 = vrot.slane %v1962_v50, 1  ;;  %v6346_v59 = vadd.f32 %v6345_v9, %v6344_v41  ;;  %v6347_v14 = vpop.f32.mrb[42].mxu1  ;;  %v2036_v19 = vsel %vm10387_vm9, %v2024_v44, %v2025_v3  ;;  %v9023_v55 = vpack.i.bf16 %v1962_v50, %v1961_v32 }
 0x571   :  { %v6348_v61 = vpop.f32.mrb[43].mxu1  ;;  %v2040_v22 = vsel %vm10372_vm14, 0.0, %v2036_v19  ;;  %vm10392_vm9 = vnez %v10163_v10 }
 0x572   :  { %v1945_v45 = vadd.f32 %v6346_v59, %v9007_v0  ;;  %v6349_v15 = vadd.f32 %v6348_v61, %v6347_v14  ;;  %2057 = vrot.lane.b32.xlu1 %v2040_v22, %s7768_s22  ;;  %v2035_v42 = vsel %vm10388_vm2, %v2025_v3, %v2026_v60  ;;  %v7488_v59 = vld [vmem:[#allocation5 + $0x248] sm:$0xff]  }
 0x573   :  { %v2041_v19 = vsel %vm7923_vm3, 0.0, %v2035_v42  ;;  %6367 = vmatpush3.bf16.msra.mxu0 %v7488_v59  ;;  %v7491_v42 = vld [vmem:[#allocation5 + $0x298] sm:$0xff]  }
 0x574   :  { %v1963_v52 = vmax.f32 %v1945_v45, 0.0  ;;  %v1948_v44 = vadd.f32 %v6349_v15, %v9007_v0  ;;  %6368 = vmatprep.subr.bf16.mxu0 %v7489_v57 }
 0x576   :  { %v2027_v49 = vrot.slane %v1963_v52, 1  ;;  %v1964_v21 = vmax.f32 %v1948_v44, 0.0  ;;  %v6350_v32 = vpop.f32.mrb[44].mxu1  ;;  %v7490_v44 = vld [vmem:[#allocation5 + $0x250] sm:$0xff]  }
 0x577   :  { %v6351_v56 = vpop.f32.mrb[45].mxu1  ;;  %6369 = vmatpush3.bf16.msra.mxu0 %v7490_v44 }
 0x578   :  { %v2028_v51 = vrot.slane %v1964_v21, 1  ;;  %v6352_v50 = vadd.f32 %v6351_v56, %v6350_v32  ;;  %v6353_v41 = vpop.f32.mrb[46].mxu1  ;;  %v2034_v9 = vsel %vm10389_vm7, %v2026_v60, %v2027_v49  ;;  %v7312_v3 = vpack.i.bf16 %v1964_v21, %v1963_v52  ;;  %6370 = vmatprep.subr.bf16.mxu0 %v7491_v42  ;;  %vm10393_vm7 = vmmov %vm10388_vm2 }
 0x579   :  { %v6354_v14 = vpop.f32.mrb[47].mxu1  ;;  %v2042_v61 = vsel %vm10313_vm8, 0.0, %v2034_v9  ;;  %v7493_v9 = vld [vmem:[#allocation5 + $0x340] sm:$0xff]  }
 0x57a   :  { %v1953_v22 = vadd.f32 %v6352_v50, %v9007_v0  ;;  %v6355_v45 = vadd.f32 %v6354_v14, %v6353_v41  ;;  %v7307_v15 = vpack.i.bf16 %v2042_v61, %v2041_v19  ;;  %v2033_v48 = vsel %vm10390_vm12, %v2027_v49, %v2028_v51  ;;  %v7492_v50 = vld [vmem:[#allocation5 + $0x258] sm:$0xff]  }
 0x57b   :  { %6371 = vmatpush3.bf16.msra.mxu0 %v7492_v50  ;;  %vm10394_vm12 = vnez %v10168_v53 }
 0x57c   :  { %v1965_v60 = vmax.f32 %v1953_v22, 0.0  ;;  %v1956_v52 = vadd.f32 %v6355_v45, %v9007_v0  ;;  %7308 = vrot.lane.b32.xlu1 %v7307_v15, %s7768_s22  ;;  %v2043_v0 = vsel %vm10320_vm4, 0.0, %v2033_v48  ;;  %6396 = vmatprep.subr.bf16.mxu0 %v7493_v9  ;;  %vm10419_vm4 = vcmp.lt.s32.totalorder %v7871_v13, 1 }
 0x57e   :  { %v2029_v23 = vrot.slane %v1965_v60, 1  ;;  %v1966_v21 = vmax.f32 %v1956_v52, 0.0 }
 0x580   :  { %v2030_v32 = vrot.slane %v1966_v21, 1  ;;  %v7297_v56 = vpack.i.bf16 %v2039_v6, %v1966_v21  ;;  %v2032_v49 = vsel %vm10391_vm10, %v2028_v51, %v2029_v23  ;;  %vm10395_vm10 = vcmp.lt.s32.totalorder %v7871_v13, 1 }
 0x581   :  { %v2044_v41 = vsel %vm10392_vm9, 0.0, %v2032_v49  ;;  %vm10426_vm9 = vcmp.lt.s32.totalorder %v7871_v13, 1 }
 0x582   :  { %7298 = vrot.lane.b32.xlu0 %v7297_v56, %s7768_s22  ;;  %v7317_v59 = vpack.i.bf16 %v2044_v41, %v2043_v0  ;;  %v2038_v30 = vsel %vm10388_vm2, %v2030_v32, %v9011_v5  ;;  %v2031_v51 = vsel %vm10393_vm7, %v2029_v23, %v2030_v32  ;;  %v5853_v5 = vld [vmem:[#allocation7 + $0x38] ss:$0 sm:$0xff]  ;;  %vm10396_vm7 = vmmov %vm10395_vm10 }
 0x583   :  { %v2045_v14 = vsel %vm10367_vm6, 0.0, %v2031_v51  ;;  %v2046_v61 = vsel %vm10394_vm12, 0.0, %v2038_v30  ;;  %vm10398_vm6 = vmmov %vm10396_vm7 }
 0x584   :  { %7318 = vrot.lane.b32.xlu1 %v7317_v59, %s7768_s22  ;;  %v7322_v19 = vpack.i.bf16 %v2045_v14, %v1965_v60  ;;  %vm10427_vm3 = vmmov %vm10426_vm9 }
 0x586   :  { %7303 = vrot.lane.b32.xlu0 %v9023_v55, %s7768_s22 }
 0x588   :  { %2069 = vrot.lane.b32.xlu1 %v2046_v61, %s7768_s22 }
 0x58a   :  { %7313 = vrot.lane.b32.xlu0 %v7312_v3, %s7768_s22 }
 0x58e   :  { %7323 = vrot.lane.b32.xlu0 %v7322_v19, %s7768_s22 }
 0x5bb   :  { %v2568_v22 = vpop.f32.mrb[48].mxu1 }
 0x5bc   :  { %v2569_v45 = vadd.f32 %v5853_v5, %v2568_v22  ;;  %v2570_v15 = vpop.f32.mrb[49].mxu1 }
 0x5bd   :  { %v2571_v48 = vpop.f32.mrb[50].mxu1 }
 0x5be   :  { %v9068_v57 = vmax.f32 %v2569_v45, 0.0  ;;  %v2572_v60 = vadd.f32 %v5853_v5, %v2571_v48  ;;  %v2573_v52 = vpop.f32.mrb[51].mxu1 }
 0x5c0   :  { %v9070_v44 = vmax.f32 %v2572_v60, 0.0  ;;  %v10096_v55 = vrot.slane %v9068_v57, 7  ;;  %v10095_v42 = vrot.slane %v9068_v57, 1 }
 0x5c2   :  { %v2608_v23 = vrot.slane %v9070_v44, 7  ;;  %v2632_v3 = vrot.slane %v9070_v44, 1 }
 0x5c4   :  { %v9082_v6 = vsel %vm10395_vm10, %v10096_v55, %v2608_v23  ;;  %v9088_v32 = vsel %vm10388_vm2, %v10095_v42, %v2632_v3  ;;  %vm10397_vm10 = vmmov %vm10388_vm2 }
 0x5d8   :  { %v2576_v56 = vpop.f32.mrb[52].mxu1 }
 0x5d9   :  { %v2577_v49 = vadd.f32 %v5853_v5, %v2576_v56  ;;  %v2578_v50 = vpop.f32.mrb[53].mxu1 }
 0x5da   :  { %v2579_v0 = vpop.f32.mrb[54].mxu1 }
 0x5db   :  { %v9090_v41 = vmax.f32 %v2577_v49, 0.0  ;;  %v2580_v9 = vadd.f32 %v5853_v5, %v2579_v0  ;;  %v2581_v59 = vpop.f32.mrb[55].mxu1 }
 0x5dc   :  { %v7294_v20 = vpop.permute.xlu1 %7293 }
 0x5dd   :  { %v2609_v30 = vrot.slane %v9090_v41, 7  ;;  %v2633_v51 = vrot.slane %v9090_v41, 1  ;;  %v9094_v14 = vmax.f32 %v2580_v9, 0.0  ;;  %v7295_v18 = vunpack.i.l.bf16 %v7294_v20 }
 0x5df   :  { %v2610_v19 = vrot.slane %v9094_v14, 7  ;;  %v2634_v61 = vrot.slane %v9094_v14, 1  ;;  %v9102_v15 = vsel %vm10396_vm7, %v2608_v23, %v2609_v30  ;;  %v9106_v48 = vsel %vm10397_vm10, %v2632_v3, %v2633_v51  ;;  %vm10400_vm10 = vmmov %vm10396_vm7 }
 0x5e0   :  { %v2584_v45 = vpop.f32.mrb[56].mxu1  ;;  %v1999_v16 = vrot.slane %v7295_v18, 7 }
 0x5e1   :  { %v9110_v60 = vsel %vm10388_vm2, %v2633_v51, %v2634_v61  ;;  %v2585_v52 = vadd.f32 %v5853_v5, %v2584_v45  ;;  %v2586_v56 = vpop.f32.mrb[57].mxu1  ;;  %v9114_v49 = vsel %vm10398_vm6, %v2609_v30, %v2610_v19  ;;  %vm10399_vm6 = vmmov %vm10388_vm2 }
 0x5e2   :  { %v2587_v0 = vpop.f32.mrb[58].mxu1 }
 0x5e3   :  { %v9120_v9 = vmax.f32 %v2585_v52, 0.0  ;;  %v2588_v3 = vadd.f32 %v5853_v5, %v2587_v0  ;;  %v2589_v59 = vpop.f32.mrb[59].mxu1  ;;  %v7296_v0 = vunpack.i.h.bf16 %v7294_v20 }
 0x5e5   :  { %v2611_v51 = vrot.slane %v9120_v9, 7  ;;  %v2635_v45 = vrot.slane %v9120_v9, 1  ;;  %v9124_v56 = vmax.f32 %v2588_v3, 0.0  ;;  %v2000_v63 = vrot.slane %v7296_v0, 7 }
 0x5e7   :  { %v9128_v30 = vsel %vm10399_vm6, %v2634_v61, %v2635_v45  ;;  %v2612_v34 = vrot.slane %v9124_v56, 7  ;;  %v2636_v28 = vrot.slane %v9124_v56, 1  ;;  %v9138_v3 = vsel %vm10396_vm7, %v2610_v19, %v2611_v51  ;;  %vm10401_vm6 = vmmov %vm10396_vm7 }
 0x5e8   :  { %v2592_v59 = vpop.f32.mrb[60].mxu1  ;;  %vm10402_vm7 = vmmov %vm10388_vm2 }
 0x5e9   :  { %v2593_v50 = vadd.f32 %v5853_v5, %v2592_v59  ;;  %v2594_v23 = vpop.f32.mrb[61].mxu1  ;;  %v9142_v61 = vsel %vm10400_vm10, %v2611_v51, %v2612_v34  ;;  %v9146_v22 = vsel %vm10388_vm2, %v2635_v45, %v2636_v28  ;;  %vm10404_vm10 = vmmov %vm10401_vm6 }
 0x5ea   :  { %v2595_v52 = vpop.f32.mrb[62].mxu1  ;;  %vm10405_vm2 = vmmov %vm10401_vm6 }
 0x5eb   :  { %v9150_v42 = vmax.f32 %v2593_v50, 0.0  ;;  %v2596_v55 = vadd.f32 %v5853_v5, %v2595_v52  ;;  %v2597_v19 = vpop.f32.mrb[63].mxu1 }
 0x5ed   :  { %v2613_v23 = vrot.slane %v9150_v42, 7  ;;  %v2637_v59 = vrot.slane %v9150_v42, 1  ;;  %v9154_v51 = vmax.f32 %v2596_v55, 0.0  ;;  %v10403_v55 = vrot.slane %v9068_v57, 7 }
 0x5ef   :  { %v2614_v45 = vrot.slane %v9154_v51, 7  ;;  %v2638_v8 = vrot.slane %v9154_v51, 1  ;;  %v9162_v5 = vsel %vm10401_vm6, %v2612_v34, %v2613_v23  ;;  %v9166_v20 = vsel %vm10402_vm7, %v2636_v28, %v2637_v59  ;;  %vm10406_vm6 = vmmov %vm10402_vm7 }
 0x5f0   :  { %vm10409_vm7 = vmmov %vm10406_vm6 }
 0x5f1   :  { %v9172_v50 = vsel %vm10404_vm10, %v2614_v45, %v10403_v55  ;;  %v9176_v52 = vsel %vm10405_vm2, %v2613_v23, %v2614_v45  ;;  %v9182_v34 = vsel %vm10406_vm6, %v2637_v59, %v2638_v8  ;;  %v10408_v55 = vrot.slane %v9068_v57, 1  ;;  %v2058_v23 = vpop.permute.xlu1 %2057  ;;  %vm10411_vm10 = vmmov %vm10405_vm2 }
 0x5f2   :  { %10407 = vst [vmem:[#allocation46_spill] sm:$0xff] %v9182_v34  ;;  %v2013_v59 = vsel %vm10411_vm10, %v1999_v16, %v2000_v63  ;;  %vm10412_vm2 = vcmask 523264   ;;  %vm10415_vm12 = vmmov %vm10411_vm10 }
 0x5f3   :  { %v9192_v24 = vsel %vm10409_vm7, %v2638_v8, %v10408_v55  ;;  %v2088_v28 = vsel %vm10412_vm2, %v7296_v0, %v2058_v23  ;;  %vm10413_vm6 = vmmov %vm10412_vm2  ;;  %vm10414_vm7 = vnez %v10174_v1 }
 0x5f4   :  { %10410 = vst [vmem:[#allocation47_spill] sm:$0xff] %v9192_v24  ;;  %v7299_v19 = vpop.permute.xlu0 %7298  ;;  %v2016_v8 = vsel %vm10414_vm7, 0.0, %v2013_v59  ;;  %vm10416_vm10 = vmmov %vm10412_vm2 }
 0x5f5   :  { %v7301_v38 = vunpack.i.h.bf16 %v7299_v19  ;;  %v9198_v46 = vunpack.i.l.bf16 %v7299_v19  ;;  %v7309_v21 = vpop.permute.xlu1 %7308 }
 0x5f6   :  { %v7311_v36 = vunpack.i.h.bf16 %v7309_v21  ;;  %v7310_v47 = vunpack.i.l.bf16 %v7309_v21 }
 0x5f7   :  { %v10114_v39 = vrot.slane %v9198_v46, 7  ;;  %v2087_v17 = vsel %vm10413_vm6, %v7295_v18, %v7301_v38  ;;  %v2080_v38 = vsel %vm10416_vm10, %v2016_v8, %v7296_v0  ;;  %vm10417_vm6 = vmmov %vm10412_vm2 }
 0x5f8   :  { %v7304_v55 = vpop.permute.xlu0 %7303  ;;  %v2128_v54 = vpack.c.bf16 %v2088_v28, %v2087_v17  ;;  %v7494_v17 = vld [vmem:[#allocation5 + $0x300] sm:$0xff]   ;;  %vm10420_vm10 = vmmov %vm10419_vm4 }
 0x5f9   :  { %v2014_v45 = vsel %vm10415_vm12, %v10114_v39, %v1999_v16  ;;  %v7306_v2 = vunpack.i.h.bf16 %v7304_v55  ;;  %v7305_v19 = vunpack.i.l.bf16 %v7304_v55  ;;  %vm10418_vm12 = vmmov %vm10412_vm2  ;;  %v7495_v55 = vld [vmem:[#allocation5 + $0x348] sm:$0xff]   ;;  %v7319_v39 = vpop.permute.xlu1 %7318 }
 0x5fa   :  { %v2015_v23 = vsel %vm10256_vm15, 0.0, %v2014_v45  ;;  %2268 = vmatprep.mubr.bf16.mxu0 %v2128_v54 }
 0x5fb   :  { %v2002_v25 = vrot.slane %v7306_v2, 7  ;;  %v2001_v4 = vrot.slane %v7305_v19, 7  ;;  %v2079_v59 = vsel %vm10412_vm2, %v2015_v23, %v7295_v18  ;;  %v2089_v34 = vsel %vm10417_vm6, %v7305_v19, %v7310_v47  ;;  %v7496_v47 = vld [vmem:[#allocation5 + $0x308] sm:$0xff]  }
 0x5fc   :  { %v7314_v28 = vpop.permute.xlu0 %7313  ;;  %v2127_v27 = vpack.c.bf16 %v2080_v38, %v2079_v59  ;;  %v2090_v16 = vsel %vm10418_vm12, %v7306_v2, %v7311_v36  ;;  %vm10421_vm2 = vnez %v10177_v11  ;;  %v7321_v23 = vunpack.i.h.bf16 %v7319_v39  ;;  %v7497_v59 = vld [vmem:[#allocation5 + $0x350] sm:$0xff]  }
 0x5fd   :  { %v7316_v21 = vunpack.i.h.bf16 %v7314_v28  ;;  %v7315_v24 = vunpack.i.l.bf16 %v7314_v28  ;;  %v2130_v12 = vpack.c.bf16 %v2090_v16, %v2089_v34  ;;  %v2011_v54 = vsel %vm10419_vm4, %v2001_v4, %v2002_v25  ;;  %vm10422_vm4 = vmmov %vm10417_vm6 }
 0x5fe   :  { %2269 = vmatmul.mubr.bf16.vlgmr.msra.gmra.mrb[32].mxu0 %v2127_v27  ;;  %v2012_v0 = vsel %vm10420_vm10, %v2000_v63, %v2001_v4  ;;  %v2018_v18 = vsel %vm10379_vm13, 0.0, %v2011_v54  ;;  %v7320_v34 = vunpack.i.l.bf16 %v7319_v39  ;;  %vm10423_vm6 = vmmov %vm10422_vm4  ;;  %v7499_v54 = vld [vmem:[#allocation5 + $0x358] sm:$0xff]  }
 0x5ff   :  { %v2004_v45 = vrot.slane %v7316_v21, 7  ;;  %v2003_v8 = vrot.slane %v7315_v24, 7  ;;  %6397 = vmatpush3.bf16.msra.mxu0 %v7494_v17  ;;  %2276 = vmatprep.mubr.bf16.mxu0 %v2130_v12  ;;  %v2017_v36 = vsel %vm10421_vm2, 0.0, %v2012_v0  ;;  %v2082_v63 = vsel %vm10423_vm6, %v2018_v18, %v7306_v2  ;;  %vm10424_vm12 = vmmov %vm10422_vm4  ;;  %v7498_v12 = vld [vmem:[#allocation5 + $0x310] sm:$0xff]  }
 0x600   :  { %v7324_v38 = vpop.permute.xlu0 %7323  ;;  %6398 = vmatprep.subr.bf16.mxu0 %v7495_v55  ;;  %v2081_v27 = vsel %vm10422_vm4, %v2017_v36, %v7305_v19  ;;  %v2091_v4 = vsel %vm10424_vm12, %v7315_v24, %v7320_v34  ;;  %vm10425_vm10 = vmmov %vm10422_vm4  ;;  %vm10428_vm4 = vnez %v10186_v40  ;;  %v7500_v36 = vld [vmem:[#allocation5 + $0x318] sm:$0xff]   ;;  %v2070_v34 = vpop.permute.xlu1 %2069  ;;  %vm10433_vm12 = vcmp.lt.s32.totalorder %v7871_v13, 1 }
 0x601   :  { %v2092_v28 = vsel %vm10425_vm10, %v7316_v21, %v7321_v23  ;;  %v7325_v16 = vunpack.i.l.bf16 %v7324_v38  ;;  %v2009_v17 = vsel %vm10426_vm9, %v2003_v8, %v2004_v45  ;;  %v2010_v39 = vsel %vm10427_vm3, %v2002_v25, %v2003_v8  ;;  %v7501_v23 = vld [vmem:[#allocation5 + $0x360] sm:$0xff]   ;;  %vm10429_vm3 = vmmov %vm10423_vm6 }
 0x602   :  { %v2129_v55 = vpack.c.bf16 %v2082_v63, %v2081_v27  ;;  %v2132_v0 = vpack.c.bf16 %v2092_v28, %v2091_v4  ;;  %v7326_v19 = vunpack.i.h.bf16 %v7324_v38  ;;  %v2019_v2 = vsel %vm8270_vm0, 0.0, %v2010_v39  ;;  %vm10430_vm9 = vmmov %vm10429_vm3 }
 0x603   :  { %6399 = vmatpush3.bf16.msra.mxu0 %v7496_v47  ;;  %v2020_v18 = vsel %vm10428_vm4, 0.0, %v2009_v17  ;;  %v2005_v47 = vrot.slane %v7325_v16, 7  ;;  %v2083_v25 = vsel %vm10429_vm3, %v2019_v2, %v7315_v24  ;;  %vm10431_vm6 = vmmov %vm10429_vm3  ;;  %v10432_v27 = vrot.slane %v9198_v46, 7  ;;  %v7503_v24 = vld [vmem:[#allocation5 + $0x368] sm:$0xff]  }
 0x604   :  { %6400 = vmatprep.subr.bf16.mxu0 %v7497_v59  ;;  %v2084_v8 = vsel %vm10430_vm9, %v2020_v18, %v7316_v21  ;;  %v2093_v38 = vsel %vm10431_vm6, %v7325_v16, %v7326_v19  ;;  %v7502_v59 = vld [vmem:[#allocation5 + $0x320] sm:$0xff]   ;;  %vm10434_vm10 = vmmov %vm10433_vm12  ;;  %v7506_v19 = vld [vmem:[#allocation5 + $0x330] sm:$0xff]  }
 0x605   :  { %v2007_v63 = vsel %vm10433_vm12, %v2005_v47, %v10432_v27  ;;  %v2008_v4 = vsel %vm10434_vm10, %v2004_v45, %v2005_v47  ;;  %vm10435_vm8 = vmmov %vm10429_vm3  ;;  %v7507_v18 = vld [vmem:[#allocation5 + $0x378] sm:$0xff]   ;;  %v10437_v47 = vpack.c.bf16 %v9070_v44, %v9068_v57  ;;  %v10440_v57 = vpack.c.bf16 %v9082_v6, %v9172_v50 }
 0x606   :  { %2277 = vmatmul.mubr.bf16.gmra.mrb[36].mxu0 %v2129_v55  ;;  %v2094_v28 = vsel %vm10435_vm8, %v9198_v46, %v2070_v34  ;;  %v2021_v21 = vsel %vm8304_vm5, 0.0, %v2008_v4  ;;  %v2022_v39 = vsel %vm8310_vm1, 0.0, %v2007_v63  ;;  %v7504_v55 = vld [vmem:[#allocation5 + $0x328] sm:$0xff]   ;;  %vm10436_vm8 = vmmov %vm10429_vm3  ;;  %v10441_v44 = vpack.c.bf16 %v9094_v14, %v9090_v41  ;;  %v7511_v34 = vld [vmem:[#allocation5 + $0x390] sm:$0xff]  }
 0x607   :  { %6401 = vmatpush3.bf16.msra.mxu0 %v7498_v12  ;;  %2284 = vmatprep.mubr.bf16.mxu0 %v2132_v0  ;;  %v2131_v12 = vpack.c.bf16 %v2084_v8, %v2083_v25  ;;  %v2134_v17 = vpack.c.bf16 %v2094_v28, %v2093_v38  ;;  %v2085_v45 = vsel %vm10429_vm3, %v2021_v21, %v7325_v16  ;;  %vm5895_vm9 = vmneg %vm10414_vm7  ;;  %v7509_v16 = vld [vmem:[#allocation5 + $0x380] sm:$0xff]   ;;  %v7512_v6 = vld [vmem:[#allocation5 + $0x398] sm:$0xff]  }
 0x608   :  { %6402 = vmatprep.subr.bf16.mxu0 %v7499_v54  ;;  %v7505_v54 = vld [vmem:[#allocation5 + $0x370] sm:$0xff]   ;;  %v2086_v0 = vsel %vm10436_vm8, %v2022_v39, %v9198_v46  ;;  %vm5896_vm6 = vmneg %vm10256_vm15  ;;  %v10444_v50 = vpack.c.bf16 %v9114_v49, %v9102_v15  ;;  %v10445_v41 = vpack.c.bf16 %v9124_v56, %v9120_v9  ;;  %v7513_v14 = vld [vmem:[#allocation5 + $0x3a0] sm:$0xff]   ;;  %v10448_v49 = vpack.c.bf16 %v9142_v61, %v9138_v3 }
 0x609   :  { %v2133_v2 = vpack.c.bf16 %v2086_v0, %v2085_v45  ;;  %vm9260_vm12 = vmpackc.low %vm5895_vm9, %vm5896_vm6  ;;  %v7514_v15 = vld [vmem:[#allocation5 + $0x3a8] sm:$0xff]   ;;  %v10449_v9 = vpack.c.bf16 %v9154_v51, %v9150_v42  ;;  %v7515_v56 = vld [vmem:[#allocation5 + $0x3b0] sm:$0xff]   ;;  %v10454_v51 = vpack.c.bf16 %v9176_v52, %v9162_v5  ;;  %v10456_v38 = vpack.c.bf16 %v9106_v48, %v9088_v32 }
 0x60a   :  { %vm5900_vm10 = vmneg %vm10379_vm13  ;;  %v7516_v61 = vld [vmem:[#allocation5 + $0x3b8] sm:$0xff]   ;;  %vm10459_vm13 = vnez %v10161_v37  ;;  %v7518_v48 = vld [vmem:[#allocation5 + $0x3c8] sm:$0xff]   ;;  %v10464_v52 = vpack.c.bf16 %v9128_v30, %v9110_v60  ;;  %v10465_v27 = vpack.c.bf16 %v9166_v20, %v9146_v22 }
 0x60b   :  { %6403 = vmatpush3.bf16.msra.mxu0 %v7500_v36  ;;  %v7508_v36 = vld [vmem:[#allocation5 + $0x338] sm:$0xff]   ;;  %vm5901_vm3 = vmneg %vm10421_vm2  ;;  %v7519_v63 = vld [vmem:[#allocation5 + $0x3d0] sm:$0xff]  }
 0x60c   :  { %6404 = vmatprep.subr.bf16.mxu0 %v7501_v23  ;;  %v7510_v23 = vld [vmem:[#allocation5 + $0x388] sm:$0xff]   ;;  %vm9276_vm8 = vmpackc.low %vm5900_vm10, %vm5901_vm3  ;;  %v10467_v4 = vld [vmem:[#allocation12_spill] sm:$0xff] }
 0x60d   :  { %vm5905_vm9 = vmneg %vm10428_vm4  ;;  %v7520_v30 = vld [vmem:[#allocation5 + $0x3d8] sm:$0xff]   ;;  %v10471_v28 = vld [vmem:[#allocation47_spill] sm:$0xff] }
 0x60e   :  { %2285 = vmatmul.mubr.bf16.gmra.mrb[40].mxu0 %v2131_v12  ;;  %vm5906_vm6 = vmneg %vm8270_vm0  ;;  %v10472_v22 = vld [vmem:[#allocation46_spill] sm:$0xff]  ;;  %v10474_v12 = vld [vmem:[#allocation39_spill] sm:$0xff] }
 0x60f   :  { %6405 = vmatpush3.bf16.msra.mxu0 %v7502_v59  ;;  %2292 = vmatprep.mubr.bf16.mxu0 %v2134_v17  ;;  %vm9292_vm10 = vmpackc.low %vm5905_vm9, %vm5906_vm6  ;;  %v7517_v59 = vld [vmem:[#allocation5 + $0x3c0] sm:$0xff]   ;;  %v10473_v20 = vpack.c.bf16 %v10471_v28, %v10472_v22  ;;  %v10479_v39 = vld [vmem:[#allocation41_spill] sm:$0xff] }
 0x610   :  { %6406 = vmatprep.subr.bf16.mxu0 %v7503_v24  ;;  %vm5910_vm3 = vmneg %vm8310_vm1  ;;  %v10475_v24 = vld [vmem:[#allocation38_spill] sm:$0xff]  ;;  %v10483_v45 = vld [vmem:[#allocation43_spill] sm:$0xff] }
 0x611   :  { %vm5911_vm9 = vmneg %vm8304_vm5  ;;  %vm10455_vm5 = vnez %v10159_v35  ;;  %v10476_v17 = vpack.c.bf16 %v10474_v12, %v10475_v24  ;;  %v10478_v21 = vld [vmem:[#allocation42_spill] sm:$0xff]  ;;  %v7619_v46 = vld [vmem:[#allocation5 + $0x6f0] sm:$0xff]  }
 0x612   :  { %vm5915_vm6 = vmneg %vm10372_vm14  ;;  %v7617_v32 = vld [vmem:[#allocation5 + $0x6e0] sm:$0xff]   ;;  %v7620_v60 = vld [vmem:[#allocation5 + $0x6f8] sm:$0xff]  }
 0x613   :  { %6407 = vmatpush3.bf16.msra.mxu0 %v7504_v55  ;;  %vm5916_vm4 = vmneg %vm10375_vm11  ;;  %v10480_v55 = vpack.c.bf16 %v10478_v21, %v10479_v39  ;;  %v7621_v25 = vld [vmem:[#allocation5 + $0x700] sm:$0xff]   ;;  %v7622_v8 = vld [vmem:[#allocation5 + $0x708] sm:$0xff]  }
 0x614   :  { %6408 = vmatprep.subr.bf16.mxu0 %v7505_v54  ;;  %vm9312_vm0 = vmpackc.low %vm5910_vm3, %vm5911_vm9  ;;  %vm10458_vm9 = vnez %v10163_v10  ;;  %v10482_v54 = vld [vmem:[#allocation44_spill] sm:$0xff]  ;;  %v7624_v3 = vld [vmem:[#allocation5 + $0x718] sm:$0xff]  }
 0x615   :  { %vm9316_vm1 = vmpackc.low %vm5915_vm6, %vm5916_vm4  ;;  %vm10457_vm4 = vnez %v10157_v33  ;;  %v10484_v0 = vpack.c.bf16 %v10482_v54, %v10483_v45 }
 0x616   :  { %2293 = vmatmul.mubr.bf16.gmra.mrb[44].mxu0 %v2133_v2  ;;  %vm5920_vm2 = vmneg %vm10455_vm5  ;;  %v10487_v2 = vld [vmem:[#allocation45_spill] sm:$0xff] }
 0x617   :  { %6409 = vmatpush3.bf16.msra.mxu0 %v7506_v19  ;;  %2896 = vmatprep.mubr.bf16.mxu0 %v10437_v47  ;;  %vm5921_vm3 = vmneg %vm10457_vm4  ;;  %v10486_v19 = vld [vmem:[#allocation40_spill] sm:$0xff]  ;;  %v7521_v47 = vld [vmem:[#allocation5 + $0x420] sm:$0xff]  }
 0x618   :  { %6410 = vmatprep.subr.bf16.mxu0 %v7507_v18  ;;  %vm5925_vm6 = vmneg %vm10458_vm9  ;;  %v10488_v18 = vpack.c.bf16 %v10486_v19, %v10487_v2  ;;  %6456 = vmatprep.subr.bf16.mxu1 %v7521_v47 }
 0x619   :  { %vm5926_vm15 = vmneg %vm10459_vm13 }
 0x61a   :  { %vm9338_vm7 = vmpackc.low %vm5920_vm2, %vm5921_vm3  ;;  %vm10466_vm2 = vnez %v10168_v53  ;;  %vm10468_vm3 = vnez %v10467_v4 }
 0x61b   :  { %6411 = vmatpush3.bf16.msra.mxu0 %v7508_v36  ;;  %vm9342_vm5 = vmpackc.low %vm5925_vm6, %vm5926_vm15  ;;  %v7522_v36 = vld [vmem:[#allocation5 + $0x3e0] sm:$0xff]  }
 0x61c   :  { %6808 = vmatprep.subr.bf16.mxu0 %v7509_v16  ;;  %vm5930_vm15 = vmneg %vm10466_vm2  ;;  %vm10477_vm2 = vcmask 523264   ;;  %6457 = vmatpush3.bf16.msra.mxu1 %v7522_v36 }
 0x61d   :  { %vm5931_vm6 = vmneg %vm10468_vm3 }
 0x61e   :  { %5899 = vmatmul.mubr.msk.bf16.vlgmr.msra.gmra.mrb[48].mxu0 %vm9260_vm12, %v10440_v57  ;;  %vm9360_vm9 = vmpackc.low %vm5930_vm15, %vm5931_vm6  ;;  %v7525_v57 = vld [vmem:[#allocation5 + $0x430] sm:$0xff]  }
 0x61f   :  { %6809 = vmatpush3.bf16.msra.mxu0 %v7509_v16  ;;  %2904 = vmatprep.mubr.bf16.mxu0 %v10441_v44  ;;  %vm10481_vm15 = vmmov %vm10477_vm2  ;;  %v7523_v16 = vld [vmem:[#allocation5 + $0x428] sm:$0xff]   ;;  %v7526_v44 = vld [vmem:[#allocation5 + $0x3f0] sm:$0xff]  }
 0x620   :  { %6810 = vmatprep.subr.bf16.mxu0 %v7510_v23  ;;  %vm10485_vm6 = vmmov %vm10477_vm2  ;;  %6458 = vmatprep.subr.bf16.mxu1 %v7523_v16 }
 0x621   :  { %vm10489_vm3 = vmmov %vm10477_vm2 }
 0x623   :  { %6811 = vmatpush3.bf16.msra.mxu0 %v7510_v23  ;;  %v7524_v23 = vld [vmem:[#allocation5 + $0x3e8] sm:$0xff]  }
 0x624   :  { %6812 = vmatprep.subr.bf16.mxu0 %v7511_v34  ;;  %6459 = vmatpush3.bf16.msra.mxu1 %v7524_v23 }
 0x625   :  { %6460 = vmatprep.subr.bf16.mxu1 %v7525_v57 }
 0x626   :  { %5904 = vmatmul.mubr.msk.bf16.gmra.mrb[52].mxu0 %vm9276_vm8, %v10444_v50  ;;  %v7529_v50 = vld [vmem:[#allocation5 + $0x440] sm:$0xff]  }
 0x627   :  { %6813 = vmatpush3.bf16.msra.mxu0 %v7511_v34  ;;  %2912 = vmatprep.mubr.bf16.mxu0 %v10445_v41  ;;  %v7527_v34 = vld [vmem:[#allocation5 + $0x438] sm:$0xff]   ;;  %v7530_v41 = vld [vmem:[#allocation5 + $0x400] sm:$0xff]  }
 0x628   :  { %6814 = vmatprep.subr.bf16.mxu0 %v7512_v6  ;;  %6461 = vmatpush3.bf16.msra.mxu1 %v7526_v44 }
 0x629   :  { %6462 = vmatprep.subr.bf16.mxu1 %v7527_v34 }
 0x62b   :  { %6815 = vmatpush3.bf16.msra.mxu0 %v7512_v6  ;;  %v7528_v6 = vld [vmem:[#allocation5 + $0x3f8] sm:$0xff]  }
 0x62c   :  { %6816 = vmatprep.subr.bf16.mxu0 %v7513_v14  ;;  %6463 = vmatpush3.bf16.msra.mxu1 %v7528_v6 }
 0x62d   :  { %6464 = vmatprep.subr.bf16.mxu1 %v7529_v50 }
 0x62e   :  { %5909 = vmatmul.mubr.msk.bf16.gmra.mrb[56].mxu0 %vm9292_vm10, %v10448_v49  ;;  %v7533_v49 = vld [vmem:[#allocation5 + $0x450] sm:$0xff]  }
 0x62f   :  { %6817 = vmatpush3.bf16.msra.mxu0 %v7513_v14  ;;  %2920 = vmatprep.mubr.bf16.mxu0 %v10449_v9  ;;  %v7531_v14 = vld [vmem:[#allocation5 + $0x448] sm:$0xff]   ;;  %v7534_v9 = vld [vmem:[#allocation5 + $0x410] sm:$0xff]  }
 0x630   :  { %6818 = vmatprep.subr.bf16.mxu0 %v7514_v15  ;;  %6465 = vmatpush3.bf16.msra.mxu1 %v7530_v41 }
 0x631   :  { %6466 = vmatprep.subr.bf16.mxu1 %v7531_v14 }
 0x633   :  { %6819 = vmatpush3.bf16.msra.mxu0 %v7514_v15  ;;  %v7532_v15 = vld [vmem:[#allocation5 + $0x408] sm:$0xff]  }
 0x634   :  { %6820 = vmatprep.subr.bf16.mxu0 %v7515_v56  ;;  %6467 = vmatpush3.bf16.msra.mxu1 %v7532_v15 }
 0x635   :  { %6468 = vmatprep.subr.bf16.mxu1 %v7533_v49 }
 0x636   :  { %5914 = vmatmul.mubr.msk.bf16.gmra.mrb[60].mxu0 %vm9312_vm0, %v10454_v51  ;;  %v9385_v51 = vld [vmem:[#allocation5 + $0x460] sm:$0xff]  }
 0x637   :  { %6821 = vmatpush3.bf16.msra.mxu0 %v7515_v56  ;;  %6824 = vmatprep.mubr.msk.bf16.mxu0 %vm9316_vm1, %v10456_v38  ;;  %v7535_v56 = vld [vmem:[#allocation5 + $0x458] sm:$0xff]  }
 0x638   :  { %6822 = vmatprep.subr.bf16.mxu0 %v7516_v61  ;;  %6469 = vmatpush3.bf16.msra.mxu1 %v7534_v9 }
 0x639   :  { %6470 = vmatprep.subr.bf16.mxu1 %v7535_v56 }
 0x63b   :  { %6823 = vmatpush3.bf16.msra.mxu0 %v7516_v61  ;;  %v7536_v61 = vld [vmem:[#allocation5 + $0x418] sm:$0xff]  }
 0x63c   :  { %6832 = vmatprep.subr.bf16.mxu0 %v7517_v59  ;;  %6471 = vmatpush3.bf16.msra.mxu1 %v7536_v61 }
 0x63d   :  { %6848 = vmatprep.subr.bf16.mxu1 %v9385_v51 }
 0x63e   :  { %6825 = vmatmul.mubr.msk.bf16.vlgmr.msra.gmra.mrb[64].mxu0 %vm9338_vm7, %v10464_v52 }
 0x63f   :  { %6833 = vmatpush3.bf16.msra.mxu0 %v7517_v59  ;;  %6828 = vmatprep.mubr.msk.bf16.mxu0 %vm9342_vm5, %v10465_v27 }
 0x640   :  { %6834 = vmatprep.subr.bf16.mxu0 %v7518_v48 }
 0x643   :  { %6835 = vmatpush3.bf16.msra.mxu0 %v7518_v48 }
 0x644   :  { %6836 = vmatprep.subr.bf16.mxu0 %v7519_v63 }
 0x646   :  { %6829 = vmatmul.mubr.msk.bf16.gmra.mrb[68].mxu0 %vm9360_vm9, %v10473_v20 }
 0x647   :  { %6837 = vmatpush3.bf16.msra.mxu0 %v7519_v63  ;;  %6840 = vmatprep.mubr.msk.bf16.mxu0 %vm10477_vm2, %v10476_v17  ;;  %vm10490_vm2 = vcmp.lt.s32.totalorder %v7871_v13, 1 }
 0x648   :  { %6838 = vmatprep.subr.bf16.mxu0 %v7520_v30 }
 0x64b   :  { %6839 = vmatpush3.bf16.msra.mxu0 %v7520_v30 }
 0x64e   :  { %6841 = vmatmul.mubr.msk.bf16.vlgmr.msra.gmra.mrb[64].mxu0 %vm10481_vm15, %v10480_v55  ;;  %vm10492_vm15 = vmmov %vm10490_vm2 }
 0x64f   :  { %6844 = vmatprep.mubr.msk.bf16.mxu0 %vm10485_vm6, %v10484_v0  ;;  %vm10493_vm6 = vmmov %vm10490_vm2 }
 0x656   :  { %6845 = vmatmul.mubr.msk.bf16.gmra.mrb[68].mxu0 %vm10489_vm3, %v10488_v18  ;;  %vm10491_vm3 = vmmov %vm10490_vm2 }
 0x6d1   :  { %v6372_v38 = vpop.f32.mrb[32].mxu0 }
 0x6d2   :  { %v6373_v59 = vpop.f32.mrb[33].mxu0 }
 0x6d3   :  { %v9388_v48 = vadd.f32 %v6373_v59, %v6372_v38  ;;  %v6375_v52 = vpop.f32.mrb[34].mxu0 }
 0x6d4   :  { %v6376_v27 = vpop.f32.mrb[35].mxu0 }
 0x6d5   :  { %v9390_v63 = vadd.f32 %v6376_v27, %v6375_v52 }
 0x6d9   :  { %v6378_v30 = vpop.f32.mrb[36].mxu0 }
 0x6da   :  { %v6379_v28 = vpop.f32.mrb[37].mxu0 }
 0x6db   :  { %v9392_v22 = vadd.f32 %v6379_v28, %v6378_v30  ;;  %v6381_v20 = vpop.f32.mrb[38].mxu0 }
 0x6dc   :  { %v6382_v12 = vpop.f32.mrb[39].mxu0 }
 0x6dd   :  { %v9394_v24 = vadd.f32 %v6382_v12, %v6381_v20 }
 0x6e1   :  { %v6384_v17 = vpop.f32.mrb[40].mxu0 }
 0x6e2   :  { %v6385_v21 = vpop.f32.mrb[41].mxu0 }
 0x6e3   :  { %v9396_v39 = vadd.f32 %v6385_v21, %v6384_v17  ;;  %v6387_v55 = vpop.f32.mrb[42].mxu0 }
 0x6e4   :  { %v6388_v54 = vpop.f32.mrb[43].mxu0 }
 0x6e5   :  { %v9398_v45 = vadd.f32 %v6388_v54, %v6387_v55  ;;  %v5870_v55 = vld [vmem:[#allocation7 + $0x40] ss:$0 sm:$0xff] }
 0x6e9   :  { %v6390_v0 = vpop.f32.mrb[44].mxu0 }
 0x6ea   :  { %v6391_v19 = vpop.f32.mrb[45].mxu0 }
 0x6eb   :  { %v9400_v2 = vadd.f32 %v6391_v19, %v6390_v0  ;;  %v6393_v18 = vpop.f32.mrb[46].mxu0 }
 0x6ec   :  { %v6394_v47 = vpop.f32.mrb[47].mxu0 }
 0x6ed   :  { %v9402_v36 = vadd.f32 %v6394_v47, %v6393_v18  ;;  %v5935_v18 = vld [vmem:[#allocation7 + $0x48] ss:$0 sm:$0xff] }
 0x6f1   :  { %v6412_v16 = vpop.f32.mrb[48].mxu0 }
 0x6f2   :  { %v6413_v23 = vpop.f32.mrb[49].mxu0 }
 0x6f3   :  { %v6414_v57 = vadd.f32 %v6413_v23, %v6412_v16  ;;  %v6415_v44 = vpop.f32.mrb[50].mxu0 }
 0x6f4   :  { %v6416_v34 = vpop.f32.mrb[51].mxu0 }
 0x6f5   :  { %v6417_v6 = vadd.f32 %v6416_v34, %v6415_v44  ;;  %v2899_v16 = vadd.f32 %v6414_v57, %v5870_v55 }
 0x6f7   :  { %v2902_v0 = vadd.f32 %v6417_v6, %v5870_v55 }
 0x6f9   :  { %v6418_v50 = vpop.f32.mrb[52].mxu0 }
 0x6fa   :  { %v6419_v41 = vpop.f32.mrb[53].mxu0 }
 0x6fb   :  { %v6420_v14 = vadd.f32 %v6419_v41, %v6418_v50  ;;  %v6421_v15 = vpop.f32.mrb[54].mxu0 }
 0x6fc   :  { %v6422_v49 = vpop.f32.mrb[55].mxu0 }
 0x6fd   :  { %v6423_v9 = vadd.f32 %v6422_v49, %v6421_v15  ;;  %v2907_v19 = vadd.f32 %v6420_v14, %v5870_v55  ;;  %v6998_v15 = vadd.f32 %v5935_v18, %v2902_v0 }
 0x6ff   :  { %v2910_v54 = vadd.f32 %v6423_v9, %v5870_v55 }
 0x701   :  { %v6424_v56 = vpop.f32.mrb[56].mxu0  ;;  %v6996_v34 = vadd.f32 %v5935_v18, %v2910_v54 }
 0x702   :  { %v6425_v61 = vpop.f32.mrb[57].mxu0 }
 0x703   :  { %v6426_v38 = vadd.f32 %v6425_v61, %v6424_v56  ;;  %v6427_v59 = vpop.f32.mrb[58].mxu0 }
 0x704   :  { %v6428_v52 = vpop.f32.mrb[59].mxu0 }
 0x705   :  { %v6429_v27 = vadd.f32 %v6428_v52, %v6427_v59  ;;  %v2915_v59 = vadd.f32 %v6426_v38, %v5870_v55 }
 0x709   :  { %v6430_v30 = vpop.f32.mrb[60].mxu0 }
 0x70a   :  { %v6431_v28 = vpop.f32.mrb[61].mxu0 }
 0x70b   :  { %v6432_v20 = vadd.f32 %v6431_v28, %v6430_v30  ;;  %v6433_v12 = vpop.f32.mrb[62].mxu0 }
 0x70c   :  { %v6434_v17 = vpop.f32.mrb[63].mxu0 }
 0x70d   :  { %v6435_v21 = vadd.f32 %v6434_v17, %v6433_v12  ;;  %v2923_v49 = vadd.f32 %v6432_v20, %v5870_v55  ;;  %v2918_v12 = vadd.f32 %v6429_v27, %v5870_v55  ;;  %v7002_v17 = vadd.f32 %v5935_v18, %v2915_v59 }
 0x70f   :  { %v2926_v28 = vadd.f32 %v6435_v21, %v5870_v55  ;;  %v7000_v14 = vadd.f32 %v5935_v18, %v2923_v49  ;;  %v7006_v38 = vadd.f32 %v5935_v18, %v2918_v12 }
 0x721   :  { %v6842_v47 = vpop.f32.mrb[64].mxu0 }
 0x722   :  { %v6992_v23 = vadd.f32 %v6842_v47, %v2907_v19  ;;  %v3081_v44 = vpop.f32.mrb[65].mxu0  ;;  %v7004_v47 = vadd.f32 %v5935_v18, %v2926_v28 }
 0x723   :  { %v6994_v50 = vadd.f32 %v3081_v44, %v2899_v16  ;;  %v6843_v41 = vpop.f32.mrb[66].mxu0 }
 0x724   :  { %v6997_v56 = vadd.f32 %v6996_v34, %v6843_v41  ;;  %v3084_v61 = vpop.f32.mrb[67].mxu0  ;;  %v6993_v44 = vadd.f32 %v6992_v23, %v5935_v18 }
 0x725   :  { %v6995_v52 = vadd.f32 %v6994_v50, %v5935_v18  ;;  %v6999_v30 = vadd.f32 %v6998_v15, %v3084_v61 }
 0x726   :  { %v9414_v15 = vmax.f32 %v6993_v44, 0.0  ;;  %v9416_v49 = vmax.f32 %v6997_v56, 0.0  ;;  %v7539_v56 = vld [vmem:[#allocation5 + $0x470] sm:$0xff]   ;;  %v7541_v44 = vld [vmem:[#allocation5 + $0x480] sm:$0xff]  }
 0x727   :  { %v9404_v9 = vmax.f32 %v6995_v52, 0.0  ;;  %v9406_v6 = vmax.f32 %v6999_v30, 0.0  ;;  %v7538_v52 = vld [vmem:[#allocation5 + $0x468] sm:$0xff]  }
 0x728   :  { %v3130_v30 = vrot.slane %v9414_v15, 7  ;;  %v3131_v28 = vrot.slane %v9416_v49, 7  ;;  %v3228_v12 = vpack.c.bf16 %v9416_v49, %v9414_v15 }
 0x729   :  { %v6846_v57 = vpop.f32.mrb[68].mxu0  ;;  %v3225_v20 = vpack.c.bf16 %v9406_v6, %v9404_v9  ;;  %v3128_v55 = vrot.slane %v9404_v9, 7  ;;  %v3129_v50 = vrot.slane %v9406_v6, 7 }
 0x72a   :  { %v7001_v19 = vadd.f32 %v7000_v14, %v6846_v57  ;;  %v3097_v54 = vpop.f32.mrb[69].mxu0  ;;  %v3140_v57 = vsel %vm10492_vm15, %v3130_v30, %v3131_v28  ;;  %vm10495_vm15 = vmmov %vm10490_vm2 }
 0x72b   :  { %v7003_v0 = vadd.f32 %v7002_v17, %v3097_v54  ;;  %v6847_v16 = vpop.f32.mrb[70].mxu0  ;;  %3417 = vmatprep.mubr.bf16.mxu1 %v3225_v20  ;;  %v3142_v59 = vsel %vm10490_vm2, %v3128_v55, %v3129_v50  ;;  %v3141_v17 = vsel %vm10493_vm6, %v3129_v50, %v3130_v30  ;;  %v7540_v20 = vld [vmem:[#allocation5 + $0x478] sm:$0xff]   ;;  %vm10496_vm6 = vmmov %vm10490_vm2 }
 0x72c   :  { %v7005_v34 = vadd.f32 %v7004_v47, %v6847_v16  ;;  %v3100_v27 = vpop.f32.mrb[71].mxu0  ;;  %v5977_v47 = vpack.c.bf16 %v3140_v57, %v3141_v17  ;;  %v7544_v17 = vld [vmem:[#allocation5 + $0x498] sm:$0xff]  }
 0x72d   :  { %v7007_v21 = vadd.f32 %v7006_v38, %v3100_v27  ;;  %v9436_v54 = vmax.f32 %v7003_v0, 0.0 }
 0x72e   :  { %v9412_v41 = vmax.f32 %v7005_v34, 0.0  ;;  %v9446_v34 = vmax.f32 %v7001_v19, 0.0 }
 0x72f   :  { %v9430_v14 = vmax.f32 %v7007_v21, 0.0  ;;  %v3132_v38 = vrot.slane %v9436_v54, 7 }
 0x730   :  { %v3135_v61 = vrot.slane %v9412_v41, 7  ;;  %v3234_v50 = vpack.c.bf16 %v9412_v41, %v9446_v34  ;;  %v3134_v19 = vrot.slane %v9446_v34, 7 }
 0x731   :  { %v3133_v16 = vrot.slane %v9430_v14, 7 }
 0x732   :  { %v3143_v18 = vsel %vm10491_vm3, %v3135_v61, %v3128_v55  ;;  %vm10494_vm3 = vmmov %vm10490_vm2  ;;  %v7542_v55 = vld [vmem:[#allocation5 + $0x488] sm:$0xff]   ;;  %v3136_v30 = vsel %vm10495_vm15, %v3134_v19, %v3135_v61  ;;  %v3155_v61 = vrot.slane %v9416_v49, 1 }
 0x733   :  { %v5972_v23 = vpack.c.bf16 %v3142_v59, %v3143_v18  ;;  %v3138_v0 = vsel %vm10490_vm2, %v3132_v38, %v3133_v16  ;;  %v3139_v27 = vsel %vm10494_vm3, %v3131_v28, %v3132_v38  ;;  %v3154_v59 = vrot.slane %v9414_v15, 1 }
 0x734   :  { %v5982_v21 = vpack.c.bf16 %v3138_v0, %v3139_v27  ;;  %v3152_v18 = vrot.slane %v9404_v9, 1  ;;  %v3137_v28 = vsel %vm10496_vm6, %v3133_v16, %v3134_v19  ;;  %vm10497_vm2 = vcmp.lt.s32.totalorder %v7871_v13, 7 }
 0x735   :  { %5973 = vmatmul.mubr.msk.bf16.vlgmr.msra.gmra.mrb[64].mxu1 %vm9260_vm12, %v5972_v23  ;;  %v3153_v23 = vrot.slane %v9406_v6, 1  ;;  %vm10498_vm3 = vmmov %vm10497_vm2  ;;  %v5987_v57 = vpack.c.bf16 %v3136_v30, %v3137_v28  ;;  %v3158_v16 = vrot.slane %v9446_v34, 1  ;;  %v7546_v30 = vld [vmem:[#allocation5 + $0x4e0] sm:$0xff]  }
 0x736   :  { %6849 = vmatpush3.bf16.msra.mxu1 %v9385_v51  ;;  %3425 = vmatprep.mubr.bf16.mxu1 %v3228_v12  ;;  %v3231_v51 = vpack.c.bf16 %v9430_v14, %v9436_v54  ;;  %vm10499_vm15 = vmmov %vm10497_vm2  ;;  %v7547_v28 = vld [vmem:[#allocation5 + $0x4a0] sm:$0xff]  }
 0x737   :  { %6850 = vmatprep.subr.bf16.mxu1 %v7538_v52  ;;  %v3165_v12 = vsel %vm10497_vm2, %v3153_v23, %v3154_v59  ;;  %vm10500_vm6 = vmmov %vm10497_vm2  ;;  %6508 = vmatprep.subr.bf16.mxu0 %v7546_v30 }
 0x738   :  { %6509 = vmatpush3.bf16.msra.mxu0 %v7547_v28  ;;  %vm10507_vm13 = vmmov %vm10497_vm2 }
 0x73a   :  { %6851 = vmatpush3.bf16.msra.mxu1 %v7538_v52  ;;  %v7543_v52 = vld [vmem:[#allocation5 + $0x490] sm:$0xff]  }
 0x73b   :  { %6852 = vmatprep.subr.bf16.mxu1 %v7539_v56 }
 0x73d   :  { %5978 = vmatmul.mubr.msk.bf16.gmra.mrb[68].mxu1 %vm9276_vm8, %v5977_v47  ;;  %v3156_v47 = vrot.slane %v9436_v54, 1 }
 0x73e   :  { %6853 = vmatpush3.bf16.msra.mxu1 %v7539_v56  ;;  %3433 = vmatprep.mubr.bf16.mxu1 %v3231_v51  ;;  %v3166_v56 = vsel %vm10498_vm3, %v3152_v18, %v3153_v23  ;;  %v3157_v51 = vrot.slane %v9430_v14, 1  ;;  %vm10501_vm3 = vmmov %vm10497_vm2 }
 0x73f   :  { %6854 = vmatprep.subr.bf16.mxu1 %v7540_v20  ;;  %v3163_v38 = vsel %vm10499_vm15, %v3155_v61, %v3156_v47  ;;  %v3164_v27 = vsel %vm10501_vm3, %v3154_v59, %v3155_v61  ;;  %vm10502_vm15 = vmmov %vm10497_vm2  ;;  %v7545_v59 = vld [vmem:[#allocation5 + $0x520] sm:$0xff]   ;;  %v7556_v61 = vld [vmem:[#allocation5 + $0x4b8] sm:$0xff]   ;;  %vm10504_vm3 = vcmp.lt.s32.totalorder %v7871_v13, 1 }
 0x740   :  { %v3162_v0 = vsel %vm10497_vm2, %v3156_v47, %v3157_v51  ;;  %v7553_v47 = vld [vmem:[#allocation5 + $0x4b0] sm:$0xff]  }
 0x742   :  { %6855 = vmatpush3.bf16.msra.mxu1 %v7540_v20  ;;  %v5992_v20 = vpack.c.bf16 %v3165_v12, %v3166_v56  ;;  %v7548_v12 = vld [vmem:[#allocation5 + $0x528] sm:$0xff]  }
 0x743   :  { %6856 = vmatprep.subr.bf16.mxu1 %v7541_v44  ;;  %v7549_v56 = vld [vmem:[#allocation5 + $0x4e8] sm:$0xff]  }
 0x744   :  { %6510 = vmatprep.subr.bf16.mxu0 %v7549_v56 }
 0x745   :  { %5983 = vmatmul.mubr.msk.bf16.gmra.mrb[72].mxu1 %vm9292_vm10, %v5982_v21  ;;  %v5997_v21 = vpack.c.bf16 %v3163_v38, %v3164_v27  ;;  %v7558_v38 = vld [vmem:[#allocation5 + $0x500] sm:$0xff]   ;;  %v7561_v27 = vld [vmem:[#allocation5 + $0x508] sm:$0xff]  }
 0x746   :  { %6857 = vmatpush3.bf16.msra.mxu1 %v7541_v44  ;;  %3441 = vmatprep.mubr.bf16.mxu1 %v3234_v50  ;;  %v3161_v44 = vsel %vm10500_vm6, %v3157_v51, %v3158_v16  ;;  %vm10503_vm6 = vmmov %vm10497_vm2  ;;  %v7555_v51 = vld [vmem:[#allocation5 + $0x4f8] sm:$0xff]  }
 0x747   :  { %6858 = vmatprep.subr.bf16.mxu1 %v7542_v55  ;;  %v6002_v50 = vpack.c.bf16 %v3161_v44, %v3162_v0  ;;  %v7559_v44 = vld [vmem:[#allocation5 + $0x4c0] sm:$0xff]   ;;  %v7560_v0 = vld [vmem:[#allocation5 + $0x548] sm:$0xff]  }
 0x74a   :  { %6859 = vmatpush3.bf16.msra.mxu1 %v7542_v55  ;;  %v3159_v55 = vrot.slane %v9412_v41, 1 }
 0x74b   :  { %6860 = vmatprep.subr.bf16.mxu1 %v7543_v52 }
 0x74c   :  { %v3160_v23 = vsel %vm10502_vm15, %v3158_v16, %v3159_v55  ;;  %v3167_v19 = vsel %vm10503_vm6, %v3159_v55, %v3152_v18  ;;  %v7552_v18 = vld [vmem:[#allocation5 + $0x4f0] sm:$0xff]   ;;  %v7557_v16 = vld [vmem:[#allocation5 + $0x540] sm:$0xff]   ;;  %vm10505_vm15 = vmmov %vm10504_vm3 }
 0x74d   :  { %5988 = vmatmul.mubr.msk.bf16.gmra.mrb[76].mxu1 %vm9312_vm0, %v5987_v57  ;;  %v7550_v57 = vld [vmem:[#allocation5 + $0x4a8] sm:$0xff]   ;;  %v7563_v55 = vld [vmem:[#allocation5 + $0x550] sm:$0xff]   ;;  %vm10506_vm6 = vmmov %vm10497_vm2 }
 0x74e   :  { %6861 = vmatpush3.bf16.msra.mxu1 %v7543_v52  ;;  %6864 = vmatprep.mubr.msk.bf16.mxu1 %vm9316_vm1, %v5992_v20  ;;  %v6007_v52 = vpack.c.bf16 %v3167_v19, %v3160_v23  ;;  %v7554_v20 = vld [vmem:[#allocation5 + $0x538] sm:$0xff]   ;;  %v7565_v23 = vld [vmem:[#allocation5 + $0x4d0] sm:$0xff]  }
 0x74f   :  { %6862 = vmatprep.subr.bf16.mxu1 %v7544_v17  ;;  %6511 = vmatpush3.bf16.msra.mxu0 %v7550_v57  ;;  %v7566_v19 = vld [vmem:[#allocation5 + $0x558] sm:$0xff]  }
 0x750   :  { %6512 = vmatprep.subr.bf16.mxu0 %v7552_v18 }
 0x752   :  { %6863 = vmatpush3.bf16.msra.mxu1 %v7544_v17  ;;  %v7551_v17 = vld [vmem:[#allocation5 + $0x530] sm:$0xff]  }
 0x753   :  { %6872 = vmatprep.subr.bf16.mxu1 %v7545_v59  ;;  %6513 = vmatpush3.bf16.msra.mxu0 %v7553_v47 }
 0x754   :  { %6514 = vmatprep.subr.bf16.mxu0 %v7555_v51 }
 0x755   :  { %6865 = vmatmul.mubr.msk.bf16.vlgmr.msra.gmra.mrb[80].mxu1 %vm9338_vm7, %v5997_v21  ;;  %v7562_v21 = vld [vmem:[#allocation5 + $0x4c8] sm:$0xff]  }
 0x756   :  { %6868 = vmatprep.mubr.msk.bf16.mxu1 %vm9342_vm5, %v6002_v50  ;;  %6873 = vmatpush3.bf16.msra.mxu1 %v7545_v59  ;;  %v7564_v50 = vld [vmem:[#allocation5 + $0x510] sm:$0xff]   ;;  %v7568_v59 = vld [vmem:[#allocation5 + $0x4d8] sm:$0xff]  }
 0x757   :  { %6874 = vmatprep.subr.bf16.mxu1 %v7548_v12  ;;  %6515 = vmatpush3.bf16.msra.mxu0 %v7556_v61 }
 0x758   :  { %6516 = vmatprep.subr.bf16.mxu0 %v7558_v38 }
 0x75a   :  { %6875 = vmatpush3.bf16.msra.mxu1 %v7548_v12 }
 0x75b   :  { %6876 = vmatprep.subr.bf16.mxu1 %v7551_v17  ;;  %6517 = vmatpush3.bf16.msra.mxu0 %v7559_v44 }
 0x75c   :  { %6518 = vmatprep.subr.bf16.mxu0 %v7561_v27 }
 0x75d   :  { %6869 = vmatmul.mubr.msk.bf16.gmra.mrb[84].mxu1 %vm9360_vm9, %v6007_v52  ;;  %v7567_v52 = vld [vmem:[#allocation5 + $0x518] sm:$0xff]  }
 0x75e   :  { %6877 = vmatpush3.bf16.msra.mxu1 %v7551_v17 }
 0x75f   :  { %6878 = vmatprep.subr.bf16.mxu1 %v7554_v20  ;;  %6519 = vmatpush3.bf16.msra.mxu0 %v7562_v21 }
 0x760   :  { %6520 = vmatprep.subr.bf16.mxu0 %v7564_v50 }
 0x762   :  { %6879 = vmatpush3.bf16.msra.mxu1 %v7554_v20 }
 0x763   :  { %6880 = vmatprep.subr.bf16.mxu1 %v7557_v16  ;;  %6521 = vmatpush3.bf16.msra.mxu0 %v7565_v23 }
 0x764   :  { %6522 = vmatprep.subr.bf16.mxu0 %v7567_v52 }
 0x766   :  { %6881 = vmatpush3.bf16.msra.mxu1 %v7557_v16 }
 0x767   :  { %6882 = vmatprep.subr.bf16.mxu1 %v7560_v0  ;;  %6523 = vmatpush3.bf16.msra.mxu0 %v7568_v59 }
 0x76a   :  { %6883 = vmatpush3.bf16.msra.mxu1 %v7560_v0 }
 0x76b   :  { %6884 = vmatprep.subr.bf16.mxu1 %v7563_v55 }
 0x76e   :  { %6885 = vmatpush3.bf16.msra.mxu1 %v7563_v55 }
 0x76f   :  { %6886 = vmatprep.subr.bf16.mxu1 %v7566_v19 }
 0x772   :  { %6887 = vmatpush3.bf16.msra.mxu1 %v7566_v19 }
 0x808   :  { %v6472_v30 = vpop.f32.mrb[64].mxu1 }
 0x809   :  { %v6473_v28 = vpop.f32.mrb[65].mxu1 }
 0x80a   :  { %v6474_v12 = vadd.f32 %v6473_v28, %v6472_v30  ;;  %v6475_v56 = vpop.f32.mrb[66].mxu1  ;;  %v5944_v28 = vld [vmem:[#allocation7 + $0x50] ss:$0 sm:$0xff] }
 0x80b   :  { %v6476_v57 = vpop.f32.mrb[67].mxu1 }
 0x80c   :  { %v6477_v17 = vadd.f32 %v6476_v57, %v6475_v56  ;;  %v3420_v62 = vadd.f32 %v6474_v12, %v5944_v28 }
 0x80e   :  { %v3423_v40 = vadd.f32 %v6477_v17, %v5944_v28 }
 0x810   :  { %v6478_v18 = vpop.f32.mrb[68].mxu1 }
 0x811   :  { %v6479_v47 = vpop.f32.mrb[69].mxu1 }
 0x812   :  { %v6480_v20 = vadd.f32 %v6479_v47, %v6478_v18  ;;  %v6481_v51 = vpop.f32.mrb[70].mxu1 }
 0x813   :  { %v6482_v61 = vpop.f32.mrb[71].mxu1 }
 0x814   :  { %v6483_v16 = vadd.f32 %v6482_v61, %v6481_v51  ;;  %v3428_v56 = vadd.f32 %v6480_v20, %v5944_v28 }
 0x816   :  { %v3431_v58 = vadd.f32 %v6483_v16, %v5944_v28 }
 0x818   :  { %v6484_v38 = vpop.f32.mrb[72].mxu1 }
 0x819   :  { %v6485_v44 = vpop.f32.mrb[73].mxu1 }
 0x81a   :  { %v6486_v0 = vadd.f32 %v6485_v44, %v6484_v38  ;;  %v6487_v27 = vpop.f32.mrb[74].mxu1 }
 0x81b   :  { %v6488_v21 = vpop.f32.mrb[75].mxu1 }
 0x81c   :  { %v6489_v55 = vadd.f32 %v6488_v21, %v6487_v27 }
 0x820   :  { %v6490_v50 = vpop.f32.mrb[76].mxu1 }
 0x821   :  { %v6491_v23 = vpop.f32.mrb[77].mxu1 }
 0x822   :  { %v6492_v19 = vadd.f32 %v6491_v23, %v6490_v50  ;;  %v6493_v52 = vpop.f32.mrb[78].mxu1  ;;  %v3436_v23 = vadd.f32 %v6486_v0, %v5944_v28 }
 0x823   :  { %v6494_v59 = vpop.f32.mrb[79].mxu1 }
 0x824   :  { %v6495_v30 = vadd.f32 %v6494_v59, %v6493_v52  ;;  %v3439_v52 = vadd.f32 %v6489_v55, %v5944_v28 }
 0x828   :  { %v6866_v57 = vpop.f32.mrb[80].mxu1 }
 0x829   :  { %v3493_v18 = vadd.f32 %v6866_v57, %v3428_v56  ;;  %v3484_v47 = vpop.f32.mrb[81].mxu1  ;;  %v3444_v56 = vadd.f32 %v6492_v19, %v5944_v28 }
 0x82a   :  { %v3485_v51 = vadd.f32 %v3484_v47, %v3420_v62  ;;  %v6867_v61 = vpop.f32.mrb[82].mxu1 }
 0x82b   :  { %v9493_v38 = vmax.f32 %v3493_v18, 0.0  ;;  %v3496_v44 = vadd.f32 %v6867_v61, %v3431_v58  ;;  %v3487_v27 = vpop.f32.mrb[83].mxu1 }
 0x82c   :  { %v3515_v21 = vmax.f32 %v3485_v51, 0.0  ;;  %v3488_v26 = vadd.f32 %v3487_v27, %v3423_v40 }
 0x82d   :  { %v9495_v50 = vmax.f32 %v3496_v44, 0.0  ;;  %v3525_v20 = vrot.slane %v9493_v38, 7  ;;  %v3549_v12 = vrot.slane %v9493_v38, 1 }
 0x82e   :  { %v3516_v59 = vmax.f32 %v3488_v26, 0.0  ;;  %v3523_v16 = vrot.slane %v3515_v21, 7  ;;  %v3547_v57 = vrot.slane %v3515_v21, 1  ;;  %v3447_v26 = vadd.f32 %v6495_v30, %v5944_v28 }
 0x82f   :  { %v3526_v62 = vrot.slane %v9495_v50, 7  ;;  %v3550_v17 = vrot.slane %v9495_v50, 1  ;;  %v3623_v58 = vpack.c.bf16 %v9495_v50, %v9493_v38 }
 0x830   :  { %v3524_v40 = vrot.slane %v3516_v59, 7  ;;  %v3548_v18 = vrot.slane %v3516_v59, 1  ;;  %v6870_v47 = vpop.f32.mrb[84].mxu1  ;;  %v3620_v0 = vpack.c.bf16 %v3516_v59, %v3515_v21 }
 0x831   :  { %v3559_v55 = vsel %vm10497_vm2, %v3549_v12, %v3550_v17  ;;  %v3509_v51 = vadd.f32 %v6870_v47, %v3444_v56  ;;  %v3500_v61 = vpop.f32.mrb[85].mxu1  ;;  %v3535_v19 = vsel %vm10504_vm3, %v3525_v20, %v3526_v62  ;;  %vm10508_vm2 = vmmov %vm10504_vm3 }
 0x832   :  { %v3537_v44 = vsel %vm10505_vm15, %v3523_v16, %v3524_v40  ;;  %v3501_v27 = vadd.f32 %v3500_v61, %v3436_v23  ;;  %v6871_v11 = vpop.f32.mrb[86].mxu1  ;;  %3812 = vmatprep.mubr.bf16.mxu0 %v3620_v0  ;;  %v3560_v38 = vsel %vm10506_vm6, %v3548_v18, %v3549_v12  ;;  %v3561_v21 = vsel %vm10507_vm13, %v3547_v57, %v3548_v18  ;;  %vm10509_vm13 = vmmov %vm10506_vm6 }
 0x833   :  { %v3521_v50 = vmax.f32 %v3509_v51, 0.0  ;;  %v3512_v59 = vadd.f32 %v6871_v11, %v3447_v26  ;;  %v3503_v56 = vpop.f32.mrb[87].mxu1  ;;  %v6057_v47 = vpack.c.bf16 %v3560_v38, %v3561_v21  ;;  %v3536_v30 = vsel %vm10508_vm2, %v3524_v40, %v3525_v20  ;;  %vm10510_vm3 = vmmov %vm10508_vm2 }
 0x834   :  { %v3519_v28 = vmax.f32 %v3501_v27, 0.0  ;;  %v3504_v43 = vadd.f32 %v3503_v56, %v3439_v52  ;;  %v6042_v7 = vpack.c.bf16 %v3535_v19, %v3536_v30  ;;  %vm10511_vm15 = vmmov %vm10506_vm6  ;;  %v7572_v30 = vld [vmem:[#allocation5 + $0x5a0] sm:$0xff]  }
 0x835   :  { %v3522_v1 = vmax.f32 %v3512_v59, 0.0  ;;  %6888 = vmatprep.mubr.msk.bf16.mxu1 %vm9316_vm1, %v6057_v47  ;;  %v3529_v23 = vrot.slane %v3521_v50, 7  ;;  %v3553_v0 = vrot.slane %v3521_v50, 1  ;;  %vm10512_vm2 = vmmov %vm10506_vm6  ;;  %6560 = vmatprep.subr.bf16.mxu0 %v7572_v30 }
 0x836   :  { %v3551_v12 = vrot.slane %v3519_v28, 1  ;;  %v3520_v61 = vmax.f32 %v3504_v43, 0.0  ;;  %v3527_v53 = vrot.slane %v3519_v28, 7  ;;  %vm10513_vm4 = vmmov %vm10512_vm2 }
 0x837   :  { %v3530_v18 = vrot.slane %v3522_v1, 7  ;;  %v3554_v51 = vrot.slane %v3522_v1, 1  ;;  %v3629_v11 = vpack.c.bf16 %v3522_v1, %v3521_v50 }
 0x838   :  { %v3558_v26 = vsel %vm10509_vm13, %v3550_v17, %v3551_v12  ;;  %v3528_v38 = vrot.slane %v3520_v61, 7  ;;  %v3552_v20 = vrot.slane %v3520_v61, 1  ;;  %v3626_v40 = vpack.c.bf16 %v3520_v61, %v3519_v28  ;;  %vm10514_vm13 = vmmov %vm10510_vm3  ;;  %v7573_v28 = vld [vmem:[#allocation5 + $0x560] sm:$0xff]   ;;  %v7578_v61 = vld [vmem:[#allocation5 + $0x5b0] sm:$0xff]  }
 0x839   :  { %v6062_v52 = vpack.c.bf16 %v3558_v26, %v3559_v55  ;;  %v3538_v19 = vsel %vm10510_vm3, %v3530_v18, %v3523_v16  ;;  %v3555_v27 = vsel %vm10511_vm15, %v3553_v0, %v3554_v51  ;;  %v3562_v43 = vsel %vm10506_vm6, %v3554_v51, %v3547_v57  ;;  %vm10515_vm15 = vmmov %vm10510_vm3  ;;  %v7580_v51 = vld [vmem:[#allocation5 + $0x608] sm:$0xff]   ;;  %v7582_v26 = vld [vmem:[#allocation5 + $0x578] sm:$0xff]  }
 0x83a   :  { %v6037_v21 = vpack.c.bf16 %v3537_v44, %v3538_v19  ;;  %v3556_v1 = vsel %vm10512_vm2, %v3552_v20, %v3553_v0  ;;  %v3557_v17 = vsel %vm10513_vm4, %v3551_v12, %v3552_v20  ;;  %v6072_v50 = vpack.c.bf16 %v3562_v43, %v3555_v27  ;;  %vm10516_vm4 = vmmov %vm10510_vm3  ;;  %v7576_v0 = vld [vmem:[#allocation5 + $0x568] sm:$0xff]   ;;  %v7577_v12 = vld [vmem:[#allocation5 + $0x600] sm:$0xff]  }
 0x83b   :  { %6889 = vmatmul.mubr.msk.bf16.vlgmr.msra.gmra.mrb[88].mxu1 %vm9338_vm7, %v6062_v52  ;;  %v6067_v55 = vpack.c.bf16 %v3556_v1, %v3557_v17  ;;  %v3533_v16 = vsel %vm10514_vm13, %v3527_v53, %v3528_v38  ;;  %v3534_v59 = vsel %vm10510_vm3, %v3526_v62, %v3527_v53  ;;  %v3531_v57 = vsel %vm10515_vm15, %v3529_v23, %v3530_v18  ;;  %v7569_v53 = vld [vmem:[#allocation5 + $0x5e0] sm:$0xff]   ;;  %v7570_v62 = vld [vmem:[#allocation5 + $0x5e8] sm:$0xff]   ;;  %v7579_v18 = vld [vmem:[#allocation5 + $0x570] sm:$0xff]  }
 0x83c   :  { %6038 = vmatmul.mubr.msk.bf16.vlgmr.msra.gmra.mrb[72].mxu0 %vm9260_vm12, %v6037_v21  ;;  %v6047_v44 = vpack.c.bf16 %v3533_v16, %v3534_v59  ;;  %v3532_v56 = vsel %vm10516_vm4, %v3528_v38, %v3529_v23  ;;  %6896 = vmatprep.subr.bf16.mxu1 %v7569_v53  ;;  %v7575_v23 = vld [vmem:[#allocation5 + $0x5a8] sm:$0xff]   ;;  %v7583_v38 = vld [vmem:[#allocation5 + $0x610] sm:$0xff]   ;;  %v7584_v20 = vld [vmem:[#allocation5 + $0x5c0] sm:$0xff]  }
 0x83d   :  { %3820 = vmatprep.mubr.bf16.mxu0 %v3623_v58  ;;  %6892 = vmatprep.mubr.msk.bf16.mxu1 %vm9342_vm5, %v6067_v55  ;;  %v6052_v47 = vpack.c.bf16 %v3531_v57, %v3532_v56  ;;  %v7571_v58 = vld [vmem:[#allocation5 + $0x5f0] sm:$0xff]   ;;  %v7586_v52 = vld [vmem:[#allocation5 + $0x618] sm:$0xff]   ;;  %v7587_v19 = vld [vmem:[#allocation5 + $0x5c8] sm:$0xff]  }
 0x83e   :  { %6897 = vmatpush3.bf16.msra.mxu1 %v7569_v53  ;;  %6561 = vmatpush3.bf16.msra.mxu0 %v7573_v28  ;;  %v7588_v27 = vld [vmem:[#allocation5 + $0x588] sm:$0xff]   ;;  %v7589_v43 = vld [vmem:[#allocation5 + $0x5d0] sm:$0xff]   ;;  %v7591_v1 = vld [vmem:[#allocation5 + $0x5d8] sm:$0xff]  }
 0x83f   :  { %6898 = vmatprep.subr.bf16.mxu1 %v7570_v62  ;;  %6562 = vmatprep.subr.bf16.mxu0 %v7575_v23  ;;  %v7590_v21 = vld [vmem:[#allocation5 + $0x590] sm:$0xff]   ;;  %v7592_v17 = vld [vmem:[#allocation5 + $0x598] sm:$0xff]   ;;  %vm10517_vm6 = vmmov %vm10512_vm2 }
 0x840   :  { %v9551_v59 = vld [vmem:[#allocation7 + $0x58] ss:$0 sm:$0xff]  ;;  %vm10518_vm13 = vmmov %vm10512_vm2 }
 0x841   :  { %vm10519_vm3 = vmmov %vm10512_vm2 }
 0x842   :  { %6899 = vmatpush3.bf16.msra.mxu1 %v7570_v62  ;;  %6563 = vmatpush3.bf16.msra.mxu0 %v7576_v0  ;;  %vm10520_vm15 = vmmov %vm10512_vm2 }
 0x843   :  { %6893 = vmatmul.mubr.msk.bf16.gmra.mrb[92].mxu1 %vm9360_vm9, %v6072_v50  ;;  %6900 = vmatprep.subr.bf16.mxu1 %v7571_v58  ;;  %vm10521_vm4 = vmmov %vm10512_vm2 }
 0x844   :  { %6043 = vmatmul.mubr.msk.bf16.gmra.mrb[76].mxu0 %vm9276_vm8, %v6042_v7  ;;  %v7574_v7 = vld [vmem:[#allocation5 + $0x5f8] sm:$0xff]   ;;  %6564 = vmatprep.subr.bf16.mxu0 %v7578_v61 }
 0x845   :  { %3828 = vmatprep.mubr.bf16.mxu0 %v3626_v40  ;;  %v7585_v40 = vld [vmem:[#allocation5 + $0x580] sm:$0xff]  }
 0x846   :  { %6901 = vmatpush3.bf16.msra.mxu1 %v7571_v58  ;;  %6565 = vmatpush3.bf16.msra.mxu0 %v7579_v18 }
 0x847   :  { %6902 = vmatprep.subr.bf16.mxu1 %v7574_v7 }
 0x84a   :  { %6903 = vmatpush3.bf16.msra.mxu1 %v7574_v7 }
 0x84b   :  { %6904 = vmatprep.subr.bf16.mxu1 %v7577_v12 }
 0x84c   :  { %6048 = vmatmul.mubr.msk.bf16.gmra.mrb[80].mxu0 %vm9292_vm10, %v6047_v44 }
 0x84d   :  { %3836 = vmatprep.mubr.bf16.mxu0 %v3629_v11  ;;  %v7581_v11 = vld [vmem:[#allocation5 + $0x5b8] sm:$0xff]  }
 0x84e   :  { %6905 = vmatpush3.bf16.msra.mxu1 %v7577_v12  ;;  %6566 = vmatprep.subr.bf16.mxu0 %v7581_v11 }
 0x84f   :  { %6906 = vmatprep.subr.bf16.mxu1 %v7580_v51  ;;  %6567 = vmatpush3.bf16.msra.mxu0 %v7582_v26 }
 0x850   :  { %6568 = vmatprep.subr.bf16.mxu0 %v7584_v20 }
 0x852   :  { %6907 = vmatpush3.bf16.msra.mxu1 %v7580_v51 }
 0x853   :  { %6908 = vmatprep.subr.bf16.mxu1 %v7583_v38  ;;  %6569 = vmatpush3.bf16.msra.mxu0 %v7585_v40 }
 0x854   :  { %6053 = vmatmul.mubr.msk.bf16.gmra.mrb[84].mxu0 %vm9312_vm0, %v6052_v47  ;;  %6570 = vmatprep.subr.bf16.mxu0 %v7587_v19 }
 0x856   :  { %6909 = vmatpush3.bf16.msra.mxu1 %v7583_v38 }
 0x857   :  { %6910 = vmatprep.subr.bf16.mxu1 %v7586_v52  ;;  %6571 = vmatpush3.bf16.msra.mxu0 %v7588_v27 }
 0x858   :  { %6572 = vmatprep.subr.bf16.mxu0 %v7589_v43 }
 0x85a   :  { %6911 = vmatpush3.bf16.msra.mxu1 %v7586_v52 }
 0x85b   :  { %6573 = vmatpush3.bf16.msra.mxu0 %v7590_v21 }
 0x85c   :  { %6574 = vmatprep.subr.bf16.mxu0 %v7591_v1 }
 0x85f   :  { %6575 = vmatpush3.bf16.msra.mxu0 %v7592_v17 }
 0x90e   :  { %v6890_v50 = vpop.f32.mrb[88].mxu1 }
 0x90f   :  { %v6524_v55 = vpop.f32.mrb[72].mxu0  ;;  %v3879_v16 = vpop.f32.mrb[89].mxu1 }
 0x910   :  { %v6525_v57 = vpop.f32.mrb[73].mxu0  ;;  %v6891_v44 = vpop.f32.mrb[90].mxu1 }
 0x911   :  { %v6526_v56 = vadd.f32 %v6525_v57, %v6524_v55  ;;  %v6527_v47 = vpop.f32.mrb[74].mxu0  ;;  %v3882_v53 = vpop.f32.mrb[91].mxu1 }
 0x912   :  { %v6528_v62 = vpop.f32.mrb[75].mxu0 }
 0x913   :  { %v3815_v58 = vadd.f32 %v6526_v56, %v9551_v59  ;;  %v6529_v30 = vadd.f32 %v6528_v62, %v6527_v47 }
 0x915   :  { %v3880_v28 = vadd.f32 %v3879_v16, %v3815_v58  ;;  %v3818_v7 = vadd.f32 %v6529_v30, %v9551_v59 }
 0x916   :  { %v6894_v23 = vpop.f32.mrb[92].mxu1 }
 0x917   :  { %v3910_v0 = vadd.f32 %v3880_v28, %v9404_v9  ;;  %v3883_v12 = vadd.f32 %v3882_v53, %v3818_v7  ;;  %v6530_v61 = vpop.f32.mrb[76].mxu0  ;;  %v3895_v18 = vpop.f32.mrb[93].mxu1 }
 0x918   :  { %v6531_v51 = vpop.f32.mrb[77].mxu0  ;;  %v6895_v11 = vpop.f32.mrb[94].mxu1 }
 0x919   :  { %v3911_v26 = vadd.f32 %v3883_v12, %v9406_v6  ;;  %v6532_v38 = vadd.f32 %v6531_v51, %v6530_v61  ;;  %v6533_v20 = vpop.f32.mrb[78].mxu0  ;;  %v3898_v40 = vpop.f32.mrb[95].mxu1  ;;  %v9557_v19 = vmax.f32 %v3910_v0, 0.0 }
 0x91a   :  { %v6534_v52 = vpop.f32.mrb[79].mxu0 }
 0x91b   :  { %v9559_v27 = vmax.f32 %v3911_v26, 0.0  ;;  %v3823_v43 = vadd.f32 %v6532_v38, %v9551_v59  ;;  %v6535_v21 = vadd.f32 %v6534_v52, %v6533_v20  ;;  %v3950_v7 = vrot.slane %v9557_v19, 1 }
 0x91d   :  { %v3888_v1 = vadd.f32 %v6890_v50, %v3823_v43  ;;  %v3826_v9 = vadd.f32 %v6535_v21, %v9551_v59  ;;  %v4023_v17 = vpack.c.bf16 %v9559_v27, %v9557_v19  ;;  %v3951_v58 = vrot.slane %v9559_v27, 1 }
 0x91f   :  { %v3912_v55 = vadd.f32 %v3888_v1, %v9414_v15  ;;  %v3891_v6 = vadd.f32 %v6891_v44, %v3826_v9  ;;  %v6536_v16 = vpop.f32.mrb[80].mxu0  ;;  %4215 = vmatprep.mubr.bf16.mxu0 %v4023_v17  ;;  %v3964_v61 = vsel %vm10512_vm2, %v3950_v7, %v3951_v58 }
 0x920   :  { %v6537_v57 = vpop.f32.mrb[81].mxu0 }
 0x921   :  { %v9566_v56 = vmax.f32 %v3912_v55, 0.0  ;;  %v3913_v47 = vadd.f32 %v3891_v6, %v9416_v49  ;;  %v6538_v53 = vadd.f32 %v6537_v57, %v6536_v16  ;;  %v6539_v62 = vpop.f32.mrb[82].mxu0 }
 0x922   :  { %v6540_v50 = vpop.f32.mrb[83].mxu0 }
 0x923   :  { %v3831_v30 = vadd.f32 %v6538_v53, %v9551_v59  ;;  %v6541_v28 = vadd.f32 %v6540_v50, %v6539_v62  ;;  %v3952_v15 = vrot.slane %v9566_v56, 1  ;;  %v9573_v44 = vmax.f32 %v3913_v47, 0.0 }
 0x925   :  { %v3896_v0 = vadd.f32 %v3895_v18, %v3831_v30  ;;  %v3834_v12 = vadd.f32 %v6541_v28, %v9551_v59  ;;  %v3963_v49 = vsel %vm10517_vm6, %v3951_v58, %v3952_v15  ;;  %v3953_v52 = vrot.slane %v9573_v44, 1 }
 0x926   :  { %v6122_v51 = vpack.c.bf16 %v3963_v49, %v3964_v61  ;;  %vm10522_vm6 = vcmp.lt.s32.totalorder %v7871_v13, 1 }
 0x927   :  { %v3914_v26 = vadd.f32 %v3896_v0, %v9436_v54  ;;  %v3899_v38 = vadd.f32 %v3898_v40, %v3834_v12  ;;  %v6542_v20 = vpop.f32.mrb[84].mxu0  ;;  %v3962_v40 = vsel %vm10518_vm13, %v3952_v15, %v3953_v52  ;;  %v3926_v0 = vrot.slane %v9557_v19, 7  ;;  %vm10523_vm2 = vmmov %vm10522_vm6 }
 0x928   :  { %v6543_v43 = vpop.f32.mrb[85].mxu0  ;;  %6912 = vmatprep.mubr.msk.bf16.mxu1 %vm9316_vm1, %v6122_v51  ;;  %vm10524_vm13 = vmmov %vm10519_vm3 }
 0x929   :  { %v9584_v18 = vmax.f32 %v3914_v26, 0.0  ;;  %v3915_v21 = vadd.f32 %v3899_v38, %v9430_v14  ;;  %v6544_v1 = vadd.f32 %v6543_v43, %v6542_v20  ;;  %v6545_v9 = vpop.f32.mrb[86].mxu0  ;;  %v4026_v43 = vpack.c.bf16 %v9573_v44, %v9566_v56 }
 0x92a   :  { %v6546_v17 = vpop.f32.mrb[87].mxu0 }
 0x92b   :  { %v3954_v55 = vrot.slane %v9584_v18, 1  ;;  %v3839_v6 = vadd.f32 %v6544_v1, %v9551_v59  ;;  %v6547_v54 = vadd.f32 %v6546_v17, %v6545_v9  ;;  %v9591_v16 = vmax.f32 %v3915_v21, 0.0 }
 0x92c   :  { %v3929_v21 = vrot.slane %v9573_v44, 7  ;;  %v3928_v1 = vrot.slane %v9566_v56, 7 }
 0x92d   :  { %v3904_v57 = vadd.f32 %v6894_v23, %v3839_v6  ;;  %v3842_v47 = vadd.f32 %v6547_v54, %v9551_v59  ;;  %v3961_v53 = vsel %vm10519_vm3, %v3953_v52, %v3954_v55  ;;  %v3955_v28 = vrot.slane %v9591_v16, 1 }
 0x92e   :  { %v6127_v14 = vpack.c.bf16 %v3961_v53, %v3962_v40  ;;  %v3927_v23 = vrot.slane %v9559_v27, 7  ;;  %v3931_v6 = vrot.slane %v9591_v16, 7  ;;  %v3930_v54 = vrot.slane %v9584_v18, 7 }
 0x92f   :  { %v3916_v62 = vadd.f32 %v3904_v57, %v9446_v34  ;;  %v3907_v58 = vadd.f32 %v6895_v11, %v3842_v47  ;;  %v3960_v12 = vsel %vm10521_vm4, %v3954_v55, %v3955_v28  ;;  %vm10526_vm4 = vmmov %vm10523_vm2  ;;  %v4029_v55 = vpack.c.bf16 %v9591_v16, %v9584_v18 }
 0x930   :  { %6913 = vmatmul.mubr.msk.bf16.vlgmr.msra.gmra.mrb[96].mxu1 %vm9338_vm7, %v6127_v14  ;;  %v3940_v61 = vsel %vm10522_vm6, %v3926_v0, %v3927_v23  ;;  %v3939_v9 = vsel %vm10526_vm4, %v3927_v23, %v3928_v1  ;;  %vm10527_vm6 = vmmov %vm10523_vm2  ;;  %v3937_v57 = vsel %vm10523_vm2, %v3929_v21, %v3930_v54  ;;  %v7594_v23 = vld [vmem:[#allocation5 + $0x6a8] sm:$0xff]   ;;  %vm10531_vm4 = vcmp.lt.s32.totalorder %v7871_v13, 7 }
 0x931   :  { %v9599_v50 = vmax.f32 %v3916_v62, 0.0  ;;  %v3917_v30 = vadd.f32 %v3907_v58, %v9412_v41  ;;  %v3936_v40 = vsel %vm10527_vm6, %v3930_v54, %v3931_v6  ;;  %v7616_v54 = vld [vmem:[#allocation5 + $0x658] sm:$0xff]   ;;  %vm10532_vm6 = vmmov %vm10531_vm4 }
 0x932   :  { %v6112_v47 = vpack.c.bf16 %v3936_v40, %v3937_v57 }
 0x933   :  { %v9604_v15 = vmax.f32 %v3917_v30, 0.0  ;;  %v3956_v59 = vrot.slane %v9599_v50, 1  ;;  %v3932_v14 = vrot.slane %v9599_v50, 7 }
 0x935   :  { %v3933_v34 = vrot.slane %v9604_v15, 7  ;;  %v3959_v11 = vsel %vm10520_vm15, %v3955_v28, %v3956_v59  ;;  %v3957_v41 = vrot.slane %v9604_v15, 1  ;;  %vm10525_vm15 = vmmov %vm10523_vm2  ;;  %v4032_v53 = vpack.c.bf16 %v9604_v15, %v9599_v50  ;;  %v7593_v28 = vld [vmem:[#allocation5 + $0x6a0] sm:$0xff]  }
 0x936   :  { %v6132_v49 = vpack.c.bf16 %v3959_v11, %v3960_v12  ;;  %6920 = vmatprep.subr.bf16.mxu1 %v7593_v28  ;;  %v7597_v11 = vld [vmem:[#allocation5 + $0x620] sm:$0xff]   ;;  %v7599_v12 = vld [vmem:[#allocation5 + $0x668] sm:$0xff]  }
 0x937   :  { %v3941_v51 = vsel %vm10523_vm2, %v3933_v34, %v3926_v0  ;;  %v3958_v26 = vsel %vm10524_vm13, %v3956_v59, %v3957_v41  ;;  %v3965_v38 = vsel %vm10519_vm3, %v3957_v41, %v3950_v7  ;;  %v3938_v7 = vsel %vm10525_vm15, %v3928_v1, %v3929_v21  ;;  %vm10528_vm13 = vmmov %vm10523_vm2  ;;  %6921 = vmatpush3.bf16.msra.mxu1 %v7593_v28  ;;  %v7595_v59 = vld [vmem:[#allocation5 + $0x6b0] sm:$0xff]   ;;  %v7596_v0 = vld [vmem:[#allocation5 + $0x660] sm:$0xff]  }
 0x938   :  { %6916 = vmatprep.mubr.msk.bf16.mxu1 %vm9342_vm5, %v6132_v49  ;;  %v6102_v20 = vpack.c.bf16 %v3940_v61, %v3941_v51  ;;  %v6137_v52 = vpack.c.bf16 %v3965_v38, %v3958_v26  ;;  %v6107_v17 = vpack.c.bf16 %v3938_v7, %v3939_v9  ;;  %v3934_v62 = vsel %vm10528_vm13, %v3932_v14, %v3933_v34  ;;  %vm10529_vm3 = vmmov %vm10523_vm2  ;;  %v7598_v34 = vld [vmem:[#allocation5 + $0x6b8] sm:$0xff]   ;;  %v7600_v41 = vld [vmem:[#allocation5 + $0x628] sm:$0xff]  }
 0x939   :  { %v3935_v58 = vsel %vm10529_vm3, %v3931_v6, %v3932_v14  ;;  %6922 = vmatprep.subr.bf16.mxu1 %v7594_v23  ;;  %6612 = vmatprep.subr.bf16.mxu0 %v7596_v0  ;;  %v7601_v49 = vld [vmem:[#allocation5 + $0x6c0] sm:$0xff]   ;;  %v7602_v61 = vld [vmem:[#allocation5 + $0x670] sm:$0xff]   ;;  %v7604_v26 = vld [vmem:[#allocation5 + $0x6c8] sm:$0xff]  }
 0x93a   :  { %6103 = vmatmul.mubr.msk.bf16.vlgmr.msra.gmra.mrb[88].mxu0 %vm9260_vm12, %v6102_v20  ;;  %6917 = vmatmul.mubr.msk.bf16.gmra.mrb[100].mxu1 %vm9360_vm9, %v6137_v52  ;;  %v6117_v30 = vpack.c.bf16 %v3934_v62, %v3935_v58  ;;  %v7603_v51 = vld [vmem:[#allocation5 + $0x630] sm:$0xff]   ;;  %v7605_v38 = vld [vmem:[#allocation5 + $0x678] sm:$0xff]   ;;  %v7609_v21 = vld [vmem:[#allocation5 + $0x640] sm:$0xff]  }
 0x93b   :  { %4223 = vmatprep.mubr.bf16.mxu0 %v4026_v43  ;;  %6923 = vmatpush3.bf16.msra.mxu1 %v7594_v23  ;;  %v7607_v20 = vld [vmem:[#allocation5 + $0x6d0] sm:$0xff]   ;;  %v7606_v52 = vld [vmem:[#allocation5 + $0x638] sm:$0xff]   ;;  %v7608_v43 = vld [vmem:[#allocation5 + $0x680] sm:$0xff]  }
 0x93c   :  { %6924 = vmatprep.subr.bf16.mxu1 %v7595_v59  ;;  %6613 = vmatpush3.bf16.msra.mxu0 %v7597_v11  ;;  %v7610_v1 = vld [vmem:[#allocation5 + $0x6d8] sm:$0xff]   ;;  %v7611_v7 = vld [vmem:[#allocation5 + $0x688] sm:$0xff]   ;;  %v9659_v58 = vld [vmem:[#allocation7 + $0x60] ss:$0 sm:$0xff] }
 0x93d   :  { %6614 = vmatprep.subr.bf16.mxu0 %v7599_v12  ;;  %v7612_v9 = vld [vmem:[#allocation5 + $0x648] sm:$0xff]   ;;  %v7615_v6 = vld [vmem:[#allocation5 + $0x698] sm:$0xff]   ;;  %vm10530_vm15 = vmmov %vm10523_vm2 }
 0x93e   :  { %vm10533_vm13 = vmmov %vm10531_vm4 }
 0x93f   :  { %6925 = vmatpush3.bf16.msra.mxu1 %v7595_v59  ;;  %vm10534_vm3 = vmmov %vm10523_vm2 }
 0x940   :  { %6926 = vmatprep.subr.bf16.mxu1 %v7598_v34  ;;  %6615 = vmatpush3.bf16.msra.mxu0 %v7600_v41 }
 0x941   :  { %6616 = vmatprep.subr.bf16.mxu0 %v7602_v61 }
 0x942   :  { %6108 = vmatmul.mubr.msk.bf16.gmra.mrb[92].mxu0 %vm9276_vm8, %v6107_v17  ;;  %v7613_v17 = vld [vmem:[#allocation5 + $0x690] sm:$0xff]  }
 0x943   :  { %4231 = vmatprep.mubr.bf16.mxu0 %v4029_v55  ;;  %6927 = vmatpush3.bf16.msra.mxu1 %v7598_v34  ;;  %v7614_v55 = vld [vmem:[#allocation5 + $0x650] sm:$0xff]  }
 0x944   :  { %6928 = vmatprep.subr.bf16.mxu1 %v7601_v49  ;;  %6617 = vmatpush3.bf16.msra.mxu0 %v7603_v51 }
 0x945   :  { %6618 = vmatprep.subr.bf16.mxu0 %v7605_v38 }
 0x947   :  { %6929 = vmatpush3.bf16.msra.mxu1 %v7601_v49 }
 0x948   :  { %6930 = vmatprep.subr.bf16.mxu1 %v7604_v26  ;;  %6619 = vmatpush3.bf16.msra.mxu0 %v7606_v52 }
 0x949   :  { %6620 = vmatprep.subr.bf16.mxu0 %v7608_v43 }
 0x94a   :  { %6113 = vmatmul.mubr.msk.bf16.gmra.mrb[96].mxu0 %vm9292_vm10, %v6112_v47 }
 0x94b   :  { %4239 = vmatprep.mubr.bf16.mxu0 %v4032_v53  ;;  %6931 = vmatpush3.bf16.msra.mxu1 %v7604_v26 }
 0x94c   :  { %6932 = vmatprep.subr.bf16.mxu1 %v7607_v20  ;;  %6621 = vmatpush3.bf16.msra.mxu0 %v7609_v21 }
 0x94d   :  { %6622 = vmatprep.subr.bf16.mxu0 %v7611_v7 }
 0x94f   :  { %6933 = vmatpush3.bf16.msra.mxu1 %v7607_v20 }
 0x950   :  { %6934 = vmatprep.subr.bf16.mxu1 %v7610_v1  ;;  %6623 = vmatpush3.bf16.msra.mxu0 %v7612_v9 }
 0x951   :  { %6624 = vmatprep.subr.bf16.mxu0 %v7613_v17 }
 0x952   :  { %6118 = vmatmul.mubr.msk.bf16.gmra.mrb[100].mxu0 %vm9312_vm0, %v6117_v30 }
 0x953   :  { %6935 = vmatpush3.bf16.msra.mxu1 %v7610_v1 }
 0x954   :  { %6625 = vmatpush3.bf16.msra.mxu0 %v7614_v55 }
 0x955   :  { %6626 = vmatprep.subr.bf16.mxu0 %v7615_v6 }
 0x958   :  { %6627 = vmatpush3.bf16.msra.mxu0 %v7616_v54 }
 0x959   :  { %6944 = vmatprep.subr.bf16.mxu0 %v7617_v32 }
 0xa03   :  { %v6914_v40 = vpop.f32.mrb[96].mxu1 }
 0xa04   :  { %v4282_v57 = vpop.f32.mrb[97].mxu1 }
 0xa05   :  { %v6915_v47 = vpop.f32.mrb[98].mxu1 }
 0xa06   :  { %v4285_v53 = vpop.f32.mrb[99].mxu1 }
 0xa0d   :  { %v6576_v14 = vpop.f32.mrb[88].mxu0  ;;  %v9657_v62 = vpop.f32.mrb[100].mxu1 }
 0xa0e   :  { %v6577_v30 = vpop.f32.mrb[89].mxu0  ;;  %v4298_v28 = vpop.f32.mrb[101].mxu1 }
 0xa0f   :  { %v6578_v23 = vadd.f32 %v6577_v30, %v6576_v14  ;;  %v6579_v59 = vpop.f32.mrb[90].mxu0  ;;  %v9661_v0 = vpop.f32.mrb[102].mxu1 }
 0xa10   :  { %v6580_v11 = vpop.f32.mrb[91].mxu0  ;;  %v4301_v34 = vpop.f32.mrb[103].mxu1 }
 0xa11   :  { %v4218_v12 = vadd.f32 %v6578_v23, %v9659_v58  ;;  %v6581_v41 = vadd.f32 %v6580_v11, %v6579_v59 }
 0xa13   :  { %v4283_v49 = vadd.f32 %v4282_v57, %v4218_v12  ;;  %v4221_v61 = vadd.f32 %v6581_v41, %v9659_v58 }
 0xa15   :  { %v9665_v51 = vmax.f32 %v4283_v49, 0.0  ;;  %v4286_v26 = vadd.f32 %v4285_v53, %v4221_v61  ;;  %v6582_v38 = vpop.f32.mrb[92].mxu0 }
 0xa16   :  { %v6583_v20 = vpop.f32.mrb[93].mxu0 }
 0xa17   :  { %v4314_v52 = vmax.f32 %v4286_v26, 0.0  ;;  %v6584_v43 = vadd.f32 %v6583_v20, %v6582_v38  ;;  %v6585_v21 = vpop.f32.mrb[94].mxu0  ;;  %v4321_v1 = vrot.slane %v9665_v51, 7  ;;  %v10151_v7 = vrot.slane %v9665_v51, 1 }
 0xa18   :  { %v6586_v9 = vpop.f32.mrb[95].mxu0 }
 0xa19   :  { %v4322_v17 = vrot.slane %v4314_v52, 7  ;;  %v4346_v55 = vrot.slane %v4314_v52, 1  ;;  %v4226_v6 = vadd.f32 %v6584_v43, %v9659_v58  ;;  %v6587_v54 = vadd.f32 %v6586_v9, %v6585_v21 }
 0xa1a   :  { %v4418_v57 = vpack.c.bf16 %v4314_v52, %v9665_v51 }
 0xa1b   :  { %v9675_v53 = vsel %vm10530_vm15, %v4321_v1, %v4322_v17  ;;  %v4291_v14 = vadd.f32 %v6914_v40, %v4226_v6  ;;  %v4229_v30 = vadd.f32 %v6587_v54, %v9659_v58  ;;  %v4359_v23 = vsel %vm10531_vm4, %v10151_v7, %v4346_v55  ;;  %vm10535_vm15 = vmmov %vm10531_vm4 }
 0xa1c   :  { %4610 = vmatprep.mubr.bf16.mxu0 %v4418_v57 }
 0xa1d   :  { %v9682_v59 = vmax.f32 %v4291_v14, 0.0  ;;  %v4294_v11 = vadd.f32 %v6915_v47, %v4229_v30  ;;  %v6588_v12 = vpop.f32.mrb[96].mxu0 }
 0xa1e   :  { %v6589_v41 = vpop.f32.mrb[97].mxu0 }
 0xa1f   :  { %v4323_v49 = vrot.slane %v9682_v59, 7  ;;  %v4347_v61 = vrot.slane %v9682_v59, 1  ;;  %v9686_v26 = vmax.f32 %v4294_v11, 0.0  ;;  %v6590_v40 = vadd.f32 %v6589_v41, %v6588_v12  ;;  %v6591_v38 = vpop.f32.mrb[98].mxu0 }
 0xa20   :  { %v6592_v20 = vpop.f32.mrb[99].mxu0 }
 0xa21   :  { %v4324_v52 = vrot.slane %v9686_v26, 7  ;;  %v4348_v43 = vrot.slane %v9686_v26, 1  ;;  %v4234_v21 = vadd.f32 %v6590_v40, %v9659_v58  ;;  %v6593_v9 = vadd.f32 %v6592_v20, %v6591_v38 }
 0xa22   :  { %v4358_v47 = vsel %vm10532_vm6, %v4346_v55, %v4347_v61  ;;  %v4421_v6 = vpack.c.bf16 %v9686_v26, %v9682_v59  ;;  %v4334_v54 = vsel %vm10523_vm2, %v4322_v17, %v4323_v49 }
 0xa23   :  { %v4357_v57 = vsel %vm10533_vm13, %v4347_v61, %v4348_v43  ;;  %v4299_v14 = vadd.f32 %v4298_v28, %v4234_v21  ;;  %v4237_v30 = vadd.f32 %v6593_v9, %v9659_v58  ;;  %v6187_v11 = vpack.c.bf16 %v4358_v47, %v4359_v23 }
 0xa24   :  { %v4333_v12 = vsel %vm10534_vm3, %v4323_v49, %v4324_v52 }
 0xa25   :  { %v4317_v41 = vmax.f32 %v4299_v14, 0.0  ;;  %v4302_v40 = vadd.f32 %v4301_v34, %v4237_v30  ;;  %6936 = vmatprep.mubr.msk.bf16.mxu1 %vm9316_vm1, %v6187_v11  ;;  %v6594_v55 = vpop.f32.mrb[100].mxu0  ;;  %v6172_v59 = vpack.c.bf16 %v4333_v12, %v4334_v54  ;;  %vm10536_vm1 = vmmov %vm10523_vm2 }
 0xa26   :  { %v6595_v26 = vpop.f32.mrb[101].mxu0  ;;  %vm10537_vm6 = vmmov %vm10536_vm1 }
 0xa27   :  { %v4325_v38 = vrot.slane %v4317_v41, 7  ;;  %v4349_v17 = vrot.slane %v4317_v41, 1  ;;  %v4318_v20 = vmax.f32 %v4302_v40, 0.0  ;;  %v6596_v7 = vadd.f32 %v6595_v26, %v6594_v55  ;;  %v6597_v61 = vpop.f32.mrb[102].mxu0  ;;  %vm10538_vm2 = vmmov %vm10531_vm4 }
 0xa28   :  { %v6598_v28 = vpop.f32.mrb[103].mxu0  ;;  %vm10539_vm13 = vmmov %vm10536_vm1 }
 0xa29   :  { %v4356_v23 = vsel %vm10535_vm15, %v4348_v43, %v4349_v17  ;;  %v4326_v21 = vrot.slane %v4318_v20, 7  ;;  %v4350_v9 = vrot.slane %v4318_v20, 1  ;;  %v4242_v49 = vadd.f32 %v6596_v7, %v9659_v58  ;;  %vm10541_vm3 = vmmov %vm10538_vm2 }
 0xa2a   :  { %v6192_v34 = vpack.c.bf16 %v4356_v23, %v4357_v57  ;;  %v6599_v47 = vadd.f32 %v6598_v28, %v6597_v61  ;;  %v4424_v42 = vpack.c.bf16 %v4318_v20, %v4317_v41  ;;  %v4332_v54 = vsel %vm10536_vm1, %v4324_v52, %v4325_v38  ;;  %vm10543_vm15 = vmmov %vm10538_vm2 }
 0xa2b   :  { %v4307_v14 = vadd.f32 %v9657_v62, %v4242_v49  ;;  %v4355_v30 = vsel %vm10531_vm4, %v4349_v17, %v4350_v9  ;;  %v4331_v11 = vsel %vm10537_vm6, %v4325_v38, %v4326_v21  ;;  %v10542_v20 = vrot.slane %v9665_v51, 1  ;;  %v7618_v51 = vld [vmem:[#allocation5 + $0x6e8] sm:$0xff]  }
 0xa2c   :  { %v4245_v43 = vadd.f32 %v6599_v47, %v9659_v58  ;;  %6937 = vmatmul.mubr.msk.bf16.vlgmr.msra.gmra.mrb[104].mxu1 %vm9338_vm7, %v6192_v34  ;;  %v6177_v7 = vpack.c.bf16 %v4331_v11, %v4332_v54  ;;  %vm10540_vm7 = vmmov %vm10536_vm1 }
 0xa2d   :  { %v4319_v57 = vmax.f32 %v4307_v14, 0.0 }
 0xa2e   :  { %v4310_v12 = vadd.f32 %v9661_v0, %v4245_v43 }
 0xa2f   :  { %v4327_v41 = vrot.slane %v4319_v57, 7  ;;  %v4351_v40 = vrot.slane %v4319_v57, 1 }
 0xa30   :  { %v4320_v52 = vmax.f32 %v4310_v12, 0.0 }
 0xa31   :  { %v4354_v62 = vsel %vm10538_vm2, %v4350_v9, %v4351_v40  ;;  %v4330_v55 = vsel %vm10539_vm13, %v4326_v21, %v4327_v41  ;;  %vm10561_vm13 = vnez %v10163_v10 }
 0xa32   :  { %v4328_v26 = vrot.slane %v4320_v52, 7  ;;  %v4352_v38 = vrot.slane %v4320_v52, 1  ;;  %v6197_v17 = vpack.c.bf16 %v4354_v62, %v4355_v30  ;;  %v4427_v58 = vpack.c.bf16 %v4320_v52, %v4319_v57 }
 0xa34   :  { %v4336_v5 = vsel %vm10540_vm7, %v4328_v26, %v4321_v1  ;;  %6940 = vmatprep.mubr.msk.bf16.mxu1 %vm9342_vm5, %v6197_v17  ;;  %v4353_v0 = vsel %vm10541_vm3, %v4351_v40, %v4352_v38  ;;  %v4360_v61 = vsel %vm10543_vm15, %v4352_v38, %v10542_v20  ;;  %v4329_v28 = vsel %vm10536_vm1, %v4327_v41, %v4328_v26  ;;  %v7623_v1 = vld [vmem:[#allocation5 + $0x710] sm:$0xff]  }
 0xa35   :  { %v6167_v23 = vpack.c.bf16 %v9675_v53, %v4336_v5  ;;  %v6202_v21 = vpack.c.bf16 %v4360_v61, %v4353_v0  ;;  %v6182_v9 = vpack.c.bf16 %v4329_v28, %v4330_v55  ;;  %vm10564_vm15 = vnez %v10467_v4  ;;  %v7659_v4 = vld [vmem:[#allocation5 + $0x830] sm:$0xff]  }
 0xa37   :  { %6168 = vmatmul.mubr.msk.bf16.vlgmr.msra.gmra.mrb[104].mxu0 %vm9260_vm12, %v6167_v23  ;;  %6941 = vmatmul.mubr.msk.bf16.gmra.mrb[108].mxu1 %vm9360_vm9, %v6202_v21  ;;  %vm10557_vm9 = vnez %v10159_v35 }
 0xa38   :  { %4618 = vmatprep.mubr.bf16.mxu0 %v4421_v6  ;;  %6945 = vmatpush3.bf16.msra.mxu0 %v7617_v32 }
 0xa39   :  { %6946 = vmatprep.subr.bf16.mxu0 %v7618_v51 }
 0xa3c   :  { %6947 = vmatpush3.bf16.msra.mxu0 %v7618_v51 }
 0xa3d   :  { %6948 = vmatprep.subr.bf16.mxu0 %v7619_v46 }
 0xa3f   :  { %6173 = vmatmul.mubr.msk.bf16.gmra.mrb[108].mxu0 %vm9276_vm8, %v6172_v59 }
 0xa40   :  { %4626 = vmatprep.mubr.bf16.mxu0 %v4424_v42  ;;  %6949 = vmatpush3.bf16.msra.mxu0 %v7619_v46  ;;  %v6139_v42 = vld [vmem:[#allocation7 + $0x68] ss:$0 sm:$0xff] }
 0xa41   :  { %6950 = vmatprep.subr.bf16.mxu0 %v7620_v60 }
 0xa44   :  { %6951 = vmatpush3.bf16.msra.mxu0 %v7620_v60 }
 0xa45   :  { %6952 = vmatprep.subr.bf16.mxu0 %v7621_v25 }
 0xa47   :  { %6178 = vmatmul.mubr.msk.bf16.gmra.mrb[112].mxu0 %vm9292_vm10, %v6177_v7  ;;  %vm10556_vm10 = vnez %v10157_v33 }
 0xa48   :  { %4634 = vmatprep.mubr.bf16.mxu0 %v4427_v58  ;;  %6953 = vmatpush3.bf16.msra.mxu0 %v7621_v25 }
 0xa49   :  { %6954 = vmatprep.subr.bf16.mxu0 %v7622_v8 }
 0xa4c   :  { %6955 = vmatpush3.bf16.msra.mxu0 %v7622_v8 }
 0xa4d   :  { %6956 = vmatprep.subr.bf16.mxu0 %v7623_v1 }
 0xa4f   :  { %6183 = vmatmul.mubr.msk.bf16.gmra.mrb[116].mxu0 %vm9312_vm0, %v6182_v9  ;;  %vm10548_vm0 = vmmov %vm10538_vm2  ;;  %vm10560_vm2 = vnez %v10161_v37 }
 0xa50   :  { %6957 = vmatpush3.bf16.msra.mxu0 %v7623_v1  ;;  %vm10553_vm5 = vmmov %vm10548_vm0 }
 0xa51   :  { %6958 = vmatprep.subr.bf16.mxu0 %v7624_v3  ;;  %vm10554_vm12 = vmmov %vm10548_vm0 }
 0xa52   :  { %vm10555_vm8 = vmmov %vm10548_vm0 }
 0xa53   :  { %vm10558_vm4 = vmmov %vm10548_vm0 }
 0xa54   :  { %6959 = vmatpush3.bf16.msra.mxu0 %v7624_v3  ;;  %vm10559_vm6 = vmmov %vm10548_vm0 }
 0xa55   :  { %vm10562_vm7 = vmmov %vm10548_vm0 }
 0xa56   :  { %vm10563_vm3 = vmmov %vm10548_vm0 }
 0xaff   :  { %v6938_v53 = vpop.f32.mrb[104].mxu1 }
 0xb00   :  { %v4677_v6 = vpop.f32.mrb[105].mxu1 }
 0xb01   :  { %v6939_v59 = vpop.f32.mrb[106].mxu1 }
 0xb02   :  { %v4680_v49 = vpop.f32.mrb[107].mxu1 }
 0xb0a   :  { %v6628_v34 = vpop.f32.mrb[104].mxu0  ;;  %v6942_v47 = vpop.f32.mrb[108].mxu1 }
 0xb0b   :  { %v6629_v54 = vpop.f32.mrb[105].mxu0  ;;  %v4693_v14 = vpop.f32.mrb[109].mxu1 }
 0xb0c   :  { %v6630_v30 = vadd.f32 %v6629_v54, %v6628_v34  ;;  %v6631_v11 = vpop.f32.mrb[106].mxu0  ;;  %v6943_v43 = vpop.f32.mrb[110].mxu1 }
 0xb0d   :  { %v6632_v7 = vpop.f32.mrb[107].mxu0  ;;  %v4696_v57 = vpop.f32.mrb[111].mxu1 }
 0xb0e   :  { %v4613_v12 = vadd.f32 %v6630_v30, %v6139_v42  ;;  %v6633_v41 = vadd.f32 %v6632_v7, %v6631_v11 }
 0xb10   :  { %v4678_v40 = vadd.f32 %v4677_v6, %v4613_v12  ;;  %v4616_v52 = vadd.f32 %v6633_v41, %v6139_v42 }
 0xb12   :  { %v4681_v62 = vadd.f32 %v4680_v49, %v4616_v52  ;;  %v6634_v55 = vpop.f32.mrb[108].mxu0  ;;  %v4708_v26 = vadd.f32 %v4678_v40, %v9557_v19 }
 0xb13   :  { %v6635_v38 = vpop.f32.mrb[109].mxu0 }
 0xb14   :  { %v6636_v17 = vadd.f32 %v6635_v38, %v6634_v55  ;;  %v6637_v58 = vpop.f32.mrb[110].mxu0  ;;  %v4709_v5 = vadd.f32 %v4681_v62, %v9559_v27  ;;  %v4716_v28 = vmax.f32 %v4708_v26, 0.0 }
 0xb15   :  { %v6638_v0 = vpop.f32.mrb[111].mxu0 }
 0xb16   :  { %v4621_v20 = vadd.f32 %v6636_v17, %v6139_v42  ;;  %v6639_v61 = vadd.f32 %v6638_v0, %v6637_v58  ;;  %v4717_v23 = vmax.f32 %v4709_v5, 0.0 }
 0xb18   :  { %v4686_v21 = vadd.f32 %v6938_v53, %v4621_v20  ;;  %v4624_v9 = vadd.f32 %v6639_v61, %v6139_v42  ;;  %v4740_v32 = vpack.c.bf16 %v4717_v23, %v4716_v28  ;;  %v7625_v61 = vld [vmem:[#allocation5 + $0x760] sm:$0xff]   ;;  %v7627_v28 = vld [vmem:[#allocation5 + $0x768] sm:$0xff]  }
 0xb19   :  { %6676 = vmatprep.subr.bf16.mxu1 %v7625_v61  ;;  %v7628_v23 = vld [vmem:[#allocation5 + $0x728] sm:$0xff]  }
 0xb1a   :  { %v4710_v51 = vadd.f32 %v4686_v21, %v9566_v56  ;;  %v4689_v46 = vadd.f32 %v6939_v59, %v4624_v9  ;;  %v6640_v60 = vpop.f32.mrb[112].mxu0  ;;  %6960 = vmatprep.mubr.bf16.mxu0 %v4740_v32  ;;  %v9759_v21 = vld [vmem:[#allocation7 + $0x70] ss:$0 sm:$0xff] }
 0xb1b   :  { %v6641_v25 = vpop.f32.mrb[113].mxu0  ;;  %v10544_v9 = vld [vmem:[#allocation32_spill] sm:$0xff] }
 0xb1c   :  { %v4711_v19 = vadd.f32 %v4689_v46, %v9573_v44  ;;  %v6642_v8 = vadd.f32 %v6641_v25, %v6640_v60  ;;  %v6643_v1 = vpop.f32.mrb[114].mxu0  ;;  %v4718_v27 = vmax.f32 %v4710_v51, 0.0  ;;  %v10545_v51 = vld [vmem:[#allocation30_spill] sm:$0xff]  ;;  %v10546_v25 = vld [vmem:[#allocation33_spill] sm:$0xff] }
 0xb1d   :  { %v6644_v3 = vpop.f32.mrb[115].mxu0 }
 0xb1e   :  { %v4719_v6 = vmax.f32 %v4711_v19, 0.0  ;;  %v4629_v49 = vadd.f32 %v6642_v8, %v6139_v42  ;;  %v6645_v34 = vadd.f32 %v6644_v3, %v6643_v1  ;;  %v10547_v3 = vld [vmem:[#allocation31_spill] sm:$0xff] }
 0xb20   :  { %v4741_v54 = vpack.c.bf16 %v4719_v6, %v4718_v27  ;;  %v4694_v30 = vadd.f32 %v4693_v14, %v4629_v49  ;;  %v4632_v53 = vadd.f32 %v6645_v34, %v6139_v42 }
 0xb22   :  { %v4697_v11 = vadd.f32 %v4696_v57, %v4632_v53  ;;  %v6646_v7 = vpop.f32.mrb[116].mxu0  ;;  %6961 = vmatmul.mubr.bf16.vlgmr.msra.gmra.mrb[120].mxu0 %v4741_v54  ;;  %v4712_v56 = vadd.f32 %v4694_v30, %v9584_v18 }
 0xb23   :  { %v6647_v59 = vpop.f32.mrb[117].mxu0 }
 0xb24   :  { %v6648_v12 = vadd.f32 %v6647_v59, %v6646_v7  ;;  %v6649_v41 = vpop.f32.mrb[118].mxu0  ;;  %v4713_v44 = vadd.f32 %v4697_v11, %v9591_v16  ;;  %v4720_v55 = vmax.f32 %v4712_v56, 0.0  ;;  %v7626_v16 = vld [vmem:[#allocation5 + $0x720] sm:$0xff]   ;;  %v7629_v56 = vld [vmem:[#allocation5 + $0x770] sm:$0xff]  }
 0xb25   :  { %v6650_v40 = vpop.f32.mrb[119].mxu0  ;;  %6677 = vmatpush3.bf16.msra.mxu1 %v7626_v16  ;;  %v7630_v59 = vld [vmem:[#allocation5 + $0x730] sm:$0xff]  }
 0xb26   :  { %v4637_v52 = vadd.f32 %v6648_v12, %v6139_v42  ;;  %v6651_v62 = vadd.f32 %v6650_v40, %v6649_v41  ;;  %v4721_v26 = vmax.f32 %v4713_v44, 0.0  ;;  %6678 = vmatprep.subr.bf16.mxu1 %v7627_v28  ;;  %v7631_v12 = vld [vmem:[#allocation5 + $0x778] sm:$0xff]   ;;  %v10549_v16 = vld [vmem:[#allocation36_spill] sm:$0xff] }
 0xb28   :  { %v4702_v38 = vadd.f32 %v6942_v47, %v4637_v52  ;;  %v4640_v17 = vadd.f32 %v6651_v62, %v6139_v42  ;;  %v4742_v58 = vpack.c.bf16 %v4721_v26, %v4720_v55  ;;  %v5836_v47 = vld [vmem:[#allocation7 + $0x30] ss:$0 sm:$0xff]  ;;  %v7632_v55 = vld [vmem:[#allocation5 + $0x738] sm:$0xff]   ;;  %v7633_v26 = vld [vmem:[#allocation5 + $0x780] sm:$0xff]  }
 0xb29   :  { %6679 = vmatpush3.bf16.msra.mxu1 %v7628_v23  ;;  %v2279_v42 = vadd.f32 %v9392_v22, %v5836_v47  ;;  %v2290_v61 = vadd.f32 %v9398_v45, %v5836_v47  ;;  %v10550_v23 = vld [vmem:[#allocation34_spill] sm:$0xff] }
 0xb2a   :  { %v4705_v14 = vadd.f32 %v6943_v43, %v4640_v17  ;;  %6964 = vmatprep.mubr.bf16.mxu0 %v4742_v58  ;;  %v4714_v57 = vadd.f32 %v4702_v38, %v9599_v50  ;;  %v2271_v43 = vadd.f32 %v9388_v48, %v5836_v47  ;;  %v2282_v50 = vadd.f32 %v9394_v24, %v5836_v47 }
 0xb2b   :  { %v2303_v32 = vadd.f32 %v2279_v42, %v10544_v9  ;;  %6680 = vmatprep.subr.bf16.mxu1 %v7629_v56 }
 0xb2c   :  { %v4715_v5 = vadd.f32 %v4705_v14, %v9604_v15  ;;  %v4722_v18 = vmax.f32 %v4714_v57, 0.0  ;;  %v2274_v15 = vadd.f32 %v9390_v63, %v5836_v47  ;;  %v2301_v46 = vadd.f32 %v2271_v43, %v10545_v51  ;;  %v7636_v43 = vld [vmem:[#allocation5 + $0x748] sm:$0xff]  }
 0xb2d   :  { %v2304_v19 = vadd.f32 %v2282_v50, %v10546_v25  ;;  %v2311_v24 = vmax.f32 %v2303_v32, 0.0  ;;  %6681 = vmatpush3.bf16.msra.mxu1 %v7630_v59  ;;  %v2295_v14 = vadd.f32 %v9400_v2, %v5836_v47  ;;  %v2287_v57 = vadd.f32 %v9396_v39, %v5836_v47  ;;  %v10551_v50 = vld [vmem:[#allocation37_spill] sm:$0xff]  ;;  %v10552_v32 = vld [vmem:[#allocation35_spill] sm:$0xff] }
 0xb2e   :  { %v4723_v0 = vmax.f32 %v4715_v5, 0.0  ;;  %v2302_v22 = vadd.f32 %v2274_v15, %v10547_v3  ;;  %v2309_v34 = vmax.f32 %v2301_v46, 0.0  ;;  %6682 = vmatprep.subr.bf16.mxu1 %v7631_v12  ;;  %v2306_v45 = vadd.f32 %v2290_v61, %v10552_v32 }
 0xb2f   :  { %v2312_v11 = vmax.f32 %v2304_v19, 0.0  ;;  %v2307_v28 = vadd.f32 %v2295_v14, %v10549_v16  ;;  %v2305_v39 = vadd.f32 %v2287_v57, %v10550_v23 }
 0xb30   :  { %v4743_v20 = vpack.c.bf16 %v4723_v0, %v4722_v18  ;;  %v2310_v44 = vmax.f32 %v2302_v22, 0.0  ;;  %v7634_v18 = vld [vmem:[#allocation5 + $0x740] sm:$0xff]   ;;  %v2298_v0 = vadd.f32 %v9402_v36, %v5836_v47 }
 0xb31   :  { %6683 = vmatpush3.bf16.msra.mxu1 %v7632_v55  ;;  %v2313_v22 = vmax.f32 %v2305_v39, 0.0 }
 0xb32   :  { %6965 = vmatmul.mubr.bf16.gmra.mrb[124].mxu0 %v4743_v20  ;;  %6684 = vmatprep.subr.bf16.mxu1 %v7633_v26  ;;  %v7635_v20 = vld [vmem:[#allocation5 + $0x788] sm:$0xff]   ;;  %v2308_v15 = vadd.f32 %v2298_v0, %v10551_v50 }
 0xb35   :  { %6685 = vmatpush3.bf16.msra.mxu1 %v7634_v18 }
 0xb36   :  { %6686 = vmatprep.subr.bf16.mxu1 %v7635_v20 }
 0xb39   :  { %6687 = vmatpush3.bf16.msra.mxu1 %v7636_v43  ;;  %v10565_v43 = vld [vmem:[#allocation13_spill] sm:$0xff] }
 0xb3a   :  { %vm10566_vm1 = vnez %v10565_v43 }
 0xbf5   :  { %v6962_v60 = vpop.f32.mrb[120].mxu0 }
 0xbf6   :  { %v4840_v8 = vadd.f32 %v6962_v60, %v9759_v21  ;;  %v4831_v1 = vpop.f32.mrb[121].mxu0  ;;  %v2315_v60 = vmax.f32 %v2307_v28, 0.0 }
 0xbf7   :  { %v4832_v48 = vadd.f32 %v9759_v21, %v4831_v1  ;;  %v6963_v27 = vpop.f32.mrb[122].mxu0  ;;  %v7637_v1 = vld [vmem:[#allocation5 + $0x790] sm:$0xff]  }
 0xbf8   :  { %v4864_v6 = vmax.f32 %v4840_v8, 0.0  ;;  %v4843_v63 = vadd.f32 %v6963_v27, %v9759_v21  ;;  %v4834_v49 = vpop.f32.mrb[123].mxu0  ;;  %6688 = vmatprep.subr.bf16.mxu1 %v7637_v1 }
 0xbf9   :  { %v4862_v54 = vmax.f32 %v4832_v48, 0.0  ;;  %v4835_v30 = vadd.f32 %v9759_v21, %v4834_v49 }
 0xbfa   :  { %v9769_v53 = vadd.f32 %v4864_v6, %v2311_v24  ;;  %v4865_v7 = vmax.f32 %v4843_v63, 0.0  ;;  %v7638_v24 = vld [vmem:[#allocation5 + $0x750] sm:$0xff]   ;;  %v2316_v63 = vmax.f32 %v2308_v15, 0.0 }
 0xbfb   :  { %v9771_v41 = vadd.f32 %v4862_v54, %v2309_v34  ;;  %v4863_v40 = vmax.f32 %v4835_v30, 0.0  ;;  %v7639_v54 = vld [vmem:[#allocation5 + $0x798] sm:$0xff]   ;;  %6689 = vmatpush3.bf16.msra.mxu1 %v7638_v24 }
 0xbfc   :  { %v9773_v52 = vadd.f32 %v4865_v7, %v2312_v11  ;;  %v4936_v58 = vrot.slane %v9769_v53, 1  ;;  %v2314_v11 = vmax.f32 %v2306_v45, 0.0  ;;  %6690 = vmatprep.subr.bf16.mxu1 %v7639_v54 }
 0xbfd   :  { %v9775_v62 = vadd.f32 %v4863_v40, %v2310_v44  ;;  %v4934_v46 = vrot.slane %v9771_v41, 1  ;;  %v7640_v40 = vld [vmem:[#allocation5 + $0x758] sm:$0xff]  }
 0xbfe   :  { %v4937_v3 = vrot.slane %v9773_v52, 1  ;;  %v7337_v20 = vpack.i.bf16 %v9773_v52, %v9769_v53 }
 0xbff   :  { %v7327_v38 = vpack.i.bf16 %v9775_v62, %v9771_v41  ;;  %v4935_v17 = vrot.slane %v9775_v62, 1  ;;  %6691 = vmatpush3.bf16.msra.mxu1 %v7640_v40 }
 0xc00   :  { %v4946_v44 = vsel %vm10554_vm12, %v4936_v58, %v4937_v3  ;;  %vm10570_vm12 = vcmask 523264  }
 0xc01   :  { %7328 = vrot.lane.b32.xlu0 %v7327_v38, %s7768_s22  ;;  %v4947_v5 = vsel %vm10548_vm0, %v4935_v17, %v4936_v58  ;;  %v4948_v34 = vsel %vm10553_vm5, %v4934_v46, %v4935_v17  ;;  %v4952_v14 = vsel %vm10556_vm10, 0.0, %v4946_v44  ;;  %vm10567_vm0 = vcmp.lt.s32.totalorder %v7871_v13, 1 }
 0xc02   :  { %v4951_v2 = vsel %vm10372_vm14, 0.0, %v4947_v5  ;;  %v4950_v12 = vsel %vm10375_vm11, 0.0, %v4948_v34 }
 0xc05   :  { %v6966_v42 = vpop.f32.mrb[124].mxu0  ;;  %4968 = vrot.lane.b32.xlu0 %v4951_v2, %s7768_s22 }
 0xc06   :  { %v4856_v36 = vadd.f32 %v6966_v42, %v9759_v21  ;;  %v4847_v9 = vpop.f32.mrb[125].mxu0 }
 0xc07   :  { %v4848_v47 = vadd.f32 %v9759_v21, %v4847_v9  ;;  %v6967_v51 = vpop.f32.mrb[126].mxu0 }
 0xc08   :  { %v4868_v25 = vmax.f32 %v4856_v36, 0.0  ;;  %v4859_v19 = vadd.f32 %v6967_v51, %v9759_v21  ;;  %v4850_v8 = vpop.f32.mrb[127].mxu0 }
 0xc09   :  { %v4866_v48 = vmax.f32 %v4848_v47, 0.0  ;;  %v4851_v27 = vadd.f32 %v9759_v21, %v4850_v8  ;;  %v10568_v8 = vld [vmem:[#allocation15_spill] sm:$0xff] }
 0xc0a   :  { %v9801_v6 = vadd.f32 %v4868_v25, %v2315_v60  ;;  %v4869_v49 = vmax.f32 %v4859_v19, 0.0  ;;  %vm10569_vm5 = vnez %v10568_v8 }
 0xc0b   :  { %v9805_v30 = vadd.f32 %v4866_v48, %v2313_v22  ;;  %v4867_v7 = vmax.f32 %v4851_v27, 0.0 }
 0xc0c   :  { %v9807_v56 = vadd.f32 %v4869_v49, %v2316_v63  ;;  %v4940_v26 = vrot.slane %v9801_v6, 1 }
 0xc0d   :  { %v4938_v59 = vrot.slane %v9805_v30, 1  ;;  %v9810_v21 = vadd.f32 %v4867_v7, %v2314_v11 }
 0xc0e   :  { %v7332_v55 = vpack.i.bf16 %v4950_v12, %v9807_v56  ;;  %v4941_v57 = vrot.slane %v9807_v56, 1  ;;  %v10574_v12 = vld [vmem:[#allocation14_spill] sm:$0xff] }
 0xc0f   :  { %v4939_v38 = vrot.slane %v9810_v21, 1  ;;  %v4945_v17 = vsel %vm10555_vm8, %v4937_v3, %v4938_v59  ;;  %v7347_v23 = vpack.i.bf16 %v9810_v21, %v9805_v30  ;;  %vm10571_vm8 = vmmov %vm10570_vm12 }
 0xc10   :  { %7333 = vrot.lane.b32.xlu1 %v7332_v55, %s7768_s22  ;;  %v4953_v58 = vsel %vm10557_vm9, 0.0, %v4945_v17  ;;  %v4942_v28 = vsel %vm10562_vm7, %v4940_v26, %v4941_v57  ;;  %v4949_v39 = vsel %vm10563_vm3, %v4941_v57, %v4934_v46  ;;  %vm10575_vm7 = vnez %v10574_v12 }
 0xc11   :  { %v7342_v5 = vpack.i.bf16 %v4953_v58, %v4952_v14  ;;  %v4943_v18 = vsel %vm10558_vm4, %v4939_v38, %v4940_v26  ;;  %v4944_v0 = vsel %vm10559_vm6, %v4938_v59, %v4939_v38  ;;  %v4956_v42 = vsel %vm10564_vm15, 0.0, %v4942_v28  ;;  %vm10572_vm4 = vmmov %vm10567_vm0 }
 0xc12   :  { %v4954_v61 = vsel %vm10560_vm2, 0.0, %v4944_v0  ;;  %v4955_v16 = vsel %vm10561_vm13, 0.0, %v4943_v18  ;;  %v4957_v50 = vsel %vm10566_vm1, 0.0, %v4949_v39  ;;  %v7357_v15 = vpack.i.bf16 %v4956_v42, %v9801_v6  ;;  %vm10573_vm6 = vmmov %vm10571_vm8 }
 0xc13   :  { %7343 = vrot.lane.b32.xlu0 %v7342_v5, %s7768_s22  ;;  %v7352_v2 = vpack.i.bf16 %v4955_v16, %v4954_v61  ;;  %vm10576_vm3 = vmmov %vm10573_vm6 }
 0xc14   :  { %7338 = vrot.lane.b32.xlu1 %v7337_v20, %s7768_s22 }
 0xc17   :  { %7353 = vrot.lane.b32.xlu0 %v7352_v2, %s7768_s22  ;;  %v10580_v2 = vld [vmem:[#allocation17_spill] sm:$0xff] }
 0xc18   :  { %7348 = vrot.lane.b32.xlu1 %v7347_v23, %s7768_s22 }
 0xc1b   :  { %4980 = vrot.lane.b32.xlu0 %v4957_v50, %s7768_s22  ;;  %v10582_v50 = vld [vmem:[#allocation16_spill] sm:$0xff] }
 0xc1c   :  { %7358 = vrot.lane.b32.xlu1 %v7357_v15, %s7768_s22 }
 0xc73   :  { %v7329_v36 = vpop.permute.xlu0 %7328 }
 0xc74   :  { %v7331_v9 = vunpack.i.h.bf16 %v7329_v36  ;;  %v7330_v32 = vunpack.i.l.bf16 %v7329_v36 }
 0xc76   :  { %v4911_v45 = vrot.slane %v7331_v9, 7  ;;  %v4910_v47 = vrot.slane %v7330_v32, 7 }
 0xc77   :  { %v4969_v51 = vpop.permute.xlu0 %4968 }
 0xc78   :  { %v4924_v46 = vsel %vm10567_vm0, %v4910_v47, %v4911_v45  ;;  %v4999_v3 = vsel %vm10570_vm12, %v7331_v9, %v4969_v51  ;;  %vm10577_vm0 = vmmov %vm10576_vm3 }
 0xc79   :  { %v4927_v1 = vsel %vm10569_vm5, 0.0, %v4924_v46  ;;  %vm10578_vm12 = vmmov %vm10577_vm0 }
 0xc7a   :  { %v4991_v59 = vsel %vm10573_vm6, %v4927_v1, %v7331_v9  ;;  %vm10581_vm6 = vnez %v10580_v2 }
 0xc82   :  { %v7334_v60 = vpop.permute.xlu1 %7333 }
 0xc83   :  { %v7336_v25 = vunpack.i.h.bf16 %v7334_v60  ;;  %v9856_v19 = vunpack.i.l.bf16 %v7334_v60 }
 0xc85   :  { %v4917_v22 = vrot.slane %v9856_v19, 7  ;;  %v7344_v48 = vpop.permute.xlu0 %7343  ;;  %v4998_v27 = vsel %vm10571_vm8, %v7330_v32, %v7336_v25  ;;  %vm10579_vm8 = vmmov %vm10572_vm4 }
 0xc86   :  { %v7346_v24 = vunpack.i.h.bf16 %v7344_v48  ;;  %v7345_v63 = vunpack.i.l.bf16 %v7344_v48  ;;  %v7339_v49 = vpop.permute.xlu1 %7338  ;;  %v5039_v34 = vpack.c.bf16 %v4999_v3, %v4998_v27  ;;  %v10588_v48 = vld [vmem:[#allocation18_spill] sm:$0xff] }
 0xc87   :  { %v4925_v54 = vsel %vm10572_vm4, %v4917_v22, %v4910_v47  ;;  %v7341_v11 = vunpack.i.h.bf16 %v7339_v49  ;;  %v7340_v7 = vunpack.i.l.bf16 %v7339_v49 }
 0xc88   :  { %v4926_v44 = vsel %vm10575_vm7, 0.0, %v4925_v54  ;;  %5179 = vmatprep.mubr.bf16.mxu1 %v5039_v34  ;;  %vm10586_vm7 = vmmov %vm10577_vm0 }
 0xc89   :  { %v4913_v40 = vrot.slane %v7341_v11, 7  ;;  %v4912_v55 = vrot.slane %v7340_v7, 7  ;;  %v7354_v26 = vpop.permute.xlu0 %7353  ;;  %v4990_v38 = vsel %vm10576_vm3, %v4926_v44, %v7330_v32  ;;  %v5000_v17 = vsel %vm10577_vm0, %v7340_v7, %v7345_v63 }
 0xc8a   :  { %v7349_v14 = vpop.permute.xlu1 %7348  ;;  %v5038_v58 = vpack.c.bf16 %v4991_v59, %v4990_v38  ;;  %v5001_v57 = vsel %vm10578_vm12, %v7341_v11, %v7346_v24  ;;  %v7356_v61 = vunpack.i.h.bf16 %v7354_v26  ;;  %v7355_v16 = vunpack.i.l.bf16 %v7354_v26  ;;  %vm10584_vm12 = vmmov %vm10577_vm0  ;;  %v10590_v24 = vld [vmem:[#allocation19_spill] sm:$0xff]  ;;  %v10596_v38 = vld [vmem:[#allocation20_spill] sm:$0xff] }
 0xc8b   :  { %v7351_v5 = vunpack.i.h.bf16 %v7349_v14  ;;  %v7350_v18 = vunpack.i.l.bf16 %v7349_v14  ;;  %v5041_v0 = vpack.c.bf16 %v5001_v57, %v5000_v17  ;;  %v4922_v20 = vsel %vm10579_vm8, %v4912_v55, %v4913_v40  ;;  %vm10585_vm8 = vmmov %vm10577_vm0  ;;  %v10598_v14 = vld [vmem:[#allocation21_spill] sm:$0xff] }
 0xc8c   :  { %5180 = vmatmul.mubr.bf16.vlgmr.msra.gmra.mrb[112].mxu1 %v5038_v58  ;;  %v4923_v28 = vsel %vm10572_vm4, %v4911_v45, %v4912_v55  ;;  %v4929_v23 = vsel %vm10581_vm6, 0.0, %v4922_v20  ;;  %vm10583_vm3 = vnez %v10582_v50  ;;  %vm10587_vm6 = vmmov %vm10572_vm4 }
 0xc8d   :  { %v4915_v39 = vrot.slane %v7351_v5, 7  ;;  %v4914_v42 = vrot.slane %v7350_v18, 7  ;;  %5187 = vmatprep.mubr.bf16.mxu1 %v5041_v0  ;;  %v4928_v15 = vsel %vm10583_vm3, 0.0, %v4923_v28  ;;  %v4993_v32 = vsel %vm10584_vm12, %v4929_v23, %v7341_v11  ;;  %v4981_v34 = vpop.permute.xlu0 %4980  ;;  %vm10592_vm12 = vmmov %vm10586_vm7  ;;  %v9907_v0 = vld [vmem:[#allocation7 + $0x78] ss:$0 sm:$0xff] }
 0xc8e   :  { %v7359_v36 = vpop.permute.xlu1 %7358  ;;  %v4992_v9 = vsel %vm10577_vm0, %v4928_v15, %v7340_v7  ;;  %v5002_v47 = vsel %vm10585_vm8, %v7350_v18, %v7355_v16  ;;  %v5003_v51 = vsel %vm10586_vm7, %v7351_v5, %v7356_v61  ;;  %vm10589_vm3 = vnez %v10588_v48  ;;  %vm10593_vm8 = vmmov %vm10586_vm7  ;;  %v7642_v15 = vld [vmem:[#allocation5 + $0x7a0] sm:$0xff]  }
 0xc8f   :  { %v7360_v46 = vunpack.i.l.bf16 %v7359_v36  ;;  %v4920_v45 = vsel %vm10572_vm4, %v4914_v42, %v4915_v39  ;;  %v4921_v60 = vsel %vm10587_vm6, %v4913_v40, %v4914_v42  ;;  %v5040_v25 = vpack.c.bf16 %v4993_v32, %v4992_v9  ;;  %vm10594_vm6 = vmmov %vm10572_vm4  ;;  %v7641_v42 = vld [vmem:[#allocation5 + $0x7e0] sm:$0xff]  }
 0xc90   :  { %v5043_v1 = vpack.c.bf16 %v5003_v51, %v5002_v47  ;;  %v7361_v3 = vunpack.i.h.bf16 %v7359_v36  ;;  %v4930_v27 = vsel %vm10589_vm3, 0.0, %v4921_v60  ;;  %vm10591_vm0 = vnez %v10590_v24  ;;  %vm10595_vm3 = vmmov %vm10586_vm7  ;;  %v7643_v36 = vld [vmem:[#allocation5 + $0x7e8] sm:$0xff]   ;;  %6716 = vmatprep.subr.bf16.mxu0 %v7641_v42 }
 0xc91   :  { %v4931_v63 = vsel %vm10591_vm0, 0.0, %v4920_v45  ;;  %v4916_v49 = vrot.slane %v7360_v46, 7  ;;  %v4994_v54 = vsel %vm10586_vm7, %v4930_v27, %v7350_v18  ;;  %v5005_v40 = vsel %vm10595_vm3, %v9856_v19, %v4981_v34  ;;  %6717 = vmatpush3.bf16.msra.mxu0 %v7642_v15  ;;  %v7644_v51 = vld [vmem:[#allocation5 + $0x7a8] sm:$0xff]   ;;  %v7645_v45 = vld [vmem:[#allocation5 + $0x7f0] sm:$0xff]   ;;  %v7650_v15 = vld [vmem:[#allocation5 + $0x7c0] sm:$0xff]  }
 0xc92   :  { %v4995_v11 = vsel %vm10592_vm12, %v4931_v63, %v7351_v5  ;;  %v5004_v7 = vsel %vm10593_vm8, %v7360_v46, %v7361_v3  ;;  %vm10597_vm0 = vnez %v10596_v38  ;;  %vm10599_vm7 = vnez %v10598_v14  ;;  %vm10600_vm12 = vmmov %vm10595_vm3  ;;  %6718 = vmatprep.subr.bf16.mxu0 %v7643_v36  ;;  %v7651_v36 = vld [vmem:[#allocation5 + $0x808] sm:$0xff]   ;;  %v7663_v38 = vld [vmem:[#allocation5 + $0x850] sm:$0xff]  }
 0xc93   :  { %v4918_v59 = vsel %vm10594_vm6, %v4916_v49, %v4917_v22  ;;  %v4919_v44 = vsel %vm10572_vm4, %v4915_v39, %v4916_v49  ;;  %v5042_v55 = vpack.c.bf16 %v4995_v11, %v4994_v54  ;;  %v5045_v26 = vpack.c.bf16 %v5005_v40, %v5004_v7  ;;  %vm10601_vm8 = vmmov %vm10595_vm3  ;;  %v7646_v11 = vld [vmem:[#allocation5 + $0x7b0] sm:$0xff]   ;;  %v7647_v7 = vld [vmem:[#allocation5 + $0x7f8] sm:$0xff]  }
 0xc94   :  { %5188 = vmatmul.mubr.bf16.gmra.mrb[116].mxu1 %v5040_v25  ;;  %v4932_v17 = vsel %vm10597_vm0, 0.0, %v4919_v44  ;;  %v4933_v58 = vsel %vm10599_vm7, 0.0, %v4918_v59  ;;  %vm10602_vm3 = vcmp.lt.s32.totalorder %v7871_v13, 7  ;;  %v7664_v14 = vld [vmem:[#allocation5 + $0x858] sm:$0xff]  }
 0xc95   :  { %5195 = vmatprep.mubr.bf16.mxu1 %v5043_v1  ;;  %v4996_v57 = vsel %vm10600_vm12, %v4932_v17, %v7360_v46  ;;  %v4997_v22 = vsel %vm10601_vm8, %v4933_v58, %v9856_v19  ;;  %6719 = vmatpush3.bf16.msra.mxu0 %v7644_v51  ;;  %v7648_v17 = vld [vmem:[#allocation5 + $0x7b8] sm:$0xff]   ;;  %vm10603_vm6 = vmmov %vm10602_vm3 }
 0xc96   :  { %v5044_v5 = vpack.c.bf16 %v4997_v22, %v4996_v57  ;;  %6720 = vmatprep.subr.bf16.mxu0 %v7645_v45  ;;  %v7649_v57 = vld [vmem:[#allocation5 + $0x800] sm:$0xff]   ;;  %vm10604_vm4 = vmmov %vm10602_vm3 }
 0xc97   :  { %vm10606_vm12 = vmmov %vm10602_vm3 }
 0xc99   :  { %6721 = vmatpush3.bf16.msra.mxu0 %v7646_v11 }
 0xc9a   :  { %6722 = vmatprep.subr.bf16.mxu0 %v7647_v7 }
 0xc9c   :  { %5196 = vmatmul.mubr.bf16.gmra.mrb[120].mxu1 %v5042_v55 }
 0xc9d   :  { %5203 = vmatprep.mubr.bf16.mxu1 %v5045_v26  ;;  %6723 = vmatpush3.bf16.msra.mxu0 %v7648_v17 }
 0xc9e   :  { %6724 = vmatprep.subr.bf16.mxu0 %v7649_v57  ;;  %v7656_v57 = vld [vmem:[#allocation5 + $0x7d8] sm:$0xff]  }
 0xca1   :  { %6725 = vmatpush3.bf16.msra.mxu0 %v7650_v15 }
 0xca2   :  { %6726 = vmatprep.subr.bf16.mxu0 %v7651_v36 }
 0xca4   :  { %5204 = vmatmul.mubr.bf16.gmra.mrb[124].mxu1 %v5044_v5 }
 0xca5   :  { %6727 = vmatpush3.bf16.msra.mxu0 %v7652_v31 }
 0xd5f   :  { %v6692_v18 = vpop.f32.mrb[112].mxu1 }
 0xd60   :  { %v6693_v20 = vpop.f32.mrb[113].mxu1 }
 0xd61   :  { %v6694_v61 = vadd.f32 %v6693_v20, %v6692_v18  ;;  %v6695_v16 = vpop.f32.mrb[114].mxu1 }
 0xd62   :  { %v6696_v28 = vpop.f32.mrb[115].mxu1 }
 0xd63   :  { %v5182_v23 = vadd.f32 %v6694_v61, %v9907_v0  ;;  %v6697_v39 = vadd.f32 %v6696_v28, %v6695_v16 }
 0xd65   :  { %v5212_v9 = vmax.f32 %v5182_v23, 0.0  ;;  %v5185_v32 = vadd.f32 %v6697_v39, %v9907_v0 }
 0xd67   :  { %v5213_v19 = vmax.f32 %v5185_v32, 0.0  ;;  %v6698_v47 = vpop.f32.mrb[116].mxu1  ;;  %v9911_v60 = vrot.slane %v5212_v9, 1 }
 0xd68   :  { %v6699_v46 = vpop.f32.mrb[117].mxu1 }
 0xd69   :  { %v5277_v25 = vrot.slane %v5213_v19, 1  ;;  %v6700_v1 = vadd.f32 %v6699_v46, %v6698_v47  ;;  %v6701_v3 = vpop.f32.mrb[118].mxu1  ;;  %v7362_v27 = vpack.i.bf16 %v5213_v19, %v5212_v9 }
 0xd6a   :  { %v6702_v63 = vpop.f32.mrb[119].mxu1 }
 0xd6b   :  { %v5190_v49 = vadd.f32 %v6700_v1, %v9907_v0  ;;  %v6703_v34 = vadd.f32 %v6702_v63, %v6701_v3  ;;  %7363 = vrot.lane.b32.xlu1 %v7362_v27, %s7768_s22  ;;  %v9918_v54 = vsel %vm10602_vm3, %v9911_v60, %v5277_v25 }
 0xd6d   :  { %v5214_v59 = vmax.f32 %v5190_v49, 0.0  ;;  %v5193_v44 = vadd.f32 %v6703_v34, %v9907_v0 }
 0xd6f   :  { %v5278_v40 = vrot.slane %v5214_v59, 1  ;;  %v5215_v55 = vmax.f32 %v5193_v44, 0.0  ;;  %v6704_v26 = vpop.f32.mrb[120].mxu1 }
 0xd70   :  { %v6705_v58 = vpop.f32.mrb[121].mxu1 }
 0xd71   :  { %v5279_v22 = vrot.slane %v5215_v55, 1  ;;  %v6706_v5 = vadd.f32 %v6705_v58, %v6704_v26  ;;  %v6707_v18 = vpop.f32.mrb[122].mxu1  ;;  %v5289_v20 = vsel %vm10603_vm6, %v5277_v25, %v5278_v40  ;;  %v7372_v61 = vpack.i.bf16 %v5215_v55, %v5214_v59  ;;  %v7654_v55 = vld [vmem:[#allocation5 + $0x7d0] sm:$0xff]   ;;  %v7655_v26 = vld [vmem:[#allocation5 + $0x818] sm:$0xff]  }
 0xd72   :  { %v6708_v16 = vpop.f32.mrb[123].mxu1  ;;  %v5293_v28 = vsel %vm10372_vm14, 0.0, %v5289_v20  ;;  %vm10605_vm14 = vmmov %vm10602_vm3 }
 0xd73   :  { %v5198_v23 = vadd.f32 %v6706_v5, %v9907_v0  ;;  %v6709_v39 = vadd.f32 %v6708_v16, %v6707_v18  ;;  %5310 = vrot.lane.b32.xlu1 %v5293_v28, %s7768_s22  ;;  %v5288_v42 = vsel %vm10604_vm4, %v5278_v40, %v5279_v22  ;;  %v7653_v40 = vld [vmem:[#allocation5 + $0x810] sm:$0xff]  }
 0xd74   :  { %v5294_v49 = vsel %vm10556_vm10, 0.0, %v5288_v42  ;;  %6728 = vmatprep.subr.bf16.mxu0 %v7653_v40  ;;  %vm10607_vm10 = vmmov %vm10602_vm3 }
 0xd75   :  { %v5216_v9 = vmax.f32 %v5198_v23, 0.0  ;;  %v5201_v32 = vadd.f32 %v6709_v39, %v9907_v0  ;;  %6729 = vmatpush3.bf16.msra.mxu0 %v7654_v55  ;;  %v7658_v39 = vld [vmem:[#allocation5 + $0x828] sm:$0xff]  }
 0xd76   :  { %6730 = vmatprep.subr.bf16.mxu0 %v7655_v26 }
 0xd77   :  { %v5280_v19 = vrot.slane %v5216_v9, 1  ;;  %v5217_v47 = vmax.f32 %v5201_v32, 0.0  ;;  %v6710_v51 = vpop.f32.mrb[124].mxu1 }
 0xd78   :  { %v6711_v46 = vpop.f32.mrb[125].mxu1 }
 0xd79   :  { %v5281_v45 = vrot.slane %v5217_v47, 1  ;;  %v6712_v25 = vadd.f32 %v6711_v46, %v6710_v51  ;;  %v6713_v1 = vpop.f32.mrb[126].mxu1  ;;  %v5287_v3 = vsel %vm10605_vm14, %v5279_v22, %v5280_v19  ;;  %v7382_v27 = vpack.i.bf16 %v5217_v47, %v5216_v9  ;;  %6731 = vmatpush3.bf16.msra.mxu0 %v7656_v57 }
 0xd7a   :  { %v6714_v63 = vpop.f32.mrb[127].mxu1  ;;  %v5295_v34 = vsel %vm10557_vm9, 0.0, %v5287_v3  ;;  %v5292_v22 = vsel %vm10375_vm11, 0.0, %v9918_v54  ;;  %vm10608_vm9 = vmmov %vm10602_vm3 }
 0xd7b   :  { %v5206_v11 = vadd.f32 %v6712_v25, %v9907_v0  ;;  %v6715_v7 = vadd.f32 %v6714_v63, %v6713_v1  ;;  %v7377_v59 = vpack.i.bf16 %v5295_v34, %v5294_v49  ;;  %v5286_v44 = vsel %vm10606_vm12, %v5280_v19, %v5281_v45  ;;  %vm10609_vm11 = vmmov %vm10602_vm3 }
 0xd7d   :  { %v5218_v17 = vmax.f32 %v5206_v11, 0.0  ;;  %v5209_v58 = vadd.f32 %v6715_v7, %v9907_v0  ;;  %7378 = vrot.lane.b32.xlu1 %v7377_v59, %s7768_s22  ;;  %v5296_v0 = vsel %vm10560_vm2, 0.0, %v5286_v44  ;;  %vm10610_vm2 = vcmp.lt.s32.totalorder %v7871_v13, 1 }
 0xd7f   :  { %v5282_v33 = vrot.slane %v5218_v17, 1  ;;  %v5219_v35 = vmax.f32 %v5209_v58, 0.0 }
 0xd81   :  { %v5283_v5 = vrot.slane %v5219_v35, 1  ;;  %v7367_v18 = vpack.i.bf16 %v5292_v22, %v5219_v35  ;;  %v5285_v20 = vsel %vm10607_vm10, %v5281_v45, %v5282_v33  ;;  %vm10621_vm10 = vnez %v10580_v2 }
 0xd82   :  { %v5297_v16 = vsel %vm10561_vm13, 0.0, %v5285_v20  ;;  %vm10611_vm13 = vmmov %vm10601_vm8 }
 0xd83   :  { %7368 = vrot.lane.b32.xlu0 %v7367_v18, %s7768_s22  ;;  %v7387_v28 = vpack.i.bf16 %v5297_v16, %v5296_v0  ;;  %v5291_v29 = vsel %vm10608_vm9, %v5283_v5, %v9911_v60  ;;  %v5284_v54 = vsel %vm10609_vm11, %v5282_v33, %v5283_v5  ;;  %v7657_v60 = vld [vmem:[#allocation5 + $0x820] sm:$0xff]   ;;  %vm10615_vm3 = vmmov %vm10611_vm13  ;;  %vm10622_vm9 = vnez %v10582_v50 }
 0xd84   :  { %v5298_v23 = vsel %vm10564_vm15, 0.0, %v5284_v54  ;;  %v5299_v10 = vsel %vm10566_vm1, 0.0, %v5291_v29  ;;  %6968 = vmatprep.subr.bf16.mxu1 %v7657_v60  ;;  %vm10612_vm15 = vmmov %vm10601_vm8  ;;  %vm10614_vm8 = vnez %v10574_v12 }
 0xd85   :  { %7388 = vrot.lane.b32.xlu1 %v7387_v28, %s7768_s22  ;;  %v7392_v37 = vpack.i.bf16 %v5298_v23, %v5218_v17  ;;  %6969 = vmatpush3.bf16.msra.mxu1 %v7657_v60  ;;  %vm10613_vm1 = vmmov %vm10610_vm2 }
 0xd86   :  { %6970 = vmatprep.subr.bf16.mxu1 %v7658_v39  ;;  %vm10616_vm6 = vmmov %vm10615_vm3 }
 0xd87   :  { %7373 = vrot.lane.b32.xlu0 %v7372_v61, %s7768_s22  ;;  %vm10618_vm4 = vmmov %vm10615_vm3 }
 0xd88   :  { %vm10619_vm14 = vmmov %vm10613_vm1 }
 0xd89   :  { %5322 = vrot.lane.b32.xlu1 %v5299_v10, %s7768_s22  ;;  %6971 = vmatpush3.bf16.msra.mxu1 %v7658_v39  ;;  %vm10620_vm12 = vmmov %vm10613_vm1 }
 0xd8a   :  { %6972 = vmatprep.subr.bf16.mxu1 %v7659_v4  ;;  %vm10623_vm11 = vmmov %vm10615_vm3 }
 0xd8b   :  { %7383 = vrot.lane.b32.xlu0 %v7382_v27, %s7768_s22 }
 0xd8d   :  { %6973 = vmatpush3.bf16.msra.mxu1 %v7659_v4 }
 0xd8f   :  { %7393 = vrot.lane.b32.xlu0 %v7392_v37, %s7768_s22  ;;  %s7777_s22 = smov [#allocation8]  }
 0xd90   :  { %s5737_s25 = sshll.u32 %s7777_s22, 4  ;;  %s5738_s25 = int_to_ptr.vmem [resolvable:$true] %s5737_s25 }
 0xd91   :  { %s7739_s26 = scalar_lea.vmem %s5738_s25, 1024  ;;  %p7744_p11 = scmp.lt.s32.totalorder %s5738_s25, %s5738_s25 }
 0xd92   :  { %p7740_p10 = scmp.ne.s32.totalorder %s5738_s25, %s7739_s26  ;;  %p7745_p12 = scmp.lt.s32.totalorder %s7739_s26, %s7739_s26 }
 0xd94   :  { %p7746_p13 = por %p7745_p12, %p7744_p11 }
 0xd96   :  { %p7747_p0 = pnand %p7746_p13, %p7740_p10 }
 0xddd   :  { %v7364_v42 = vpop.permute.xlu1 %7363 }
 0xdde   :  { %v7366_v61 = vunpack.i.h.bf16 %v7364_v42  ;;  %v7365_v15 = vunpack.i.l.bf16 %v7364_v42 }
 0xde0   :  { %v5253_v43 = vrot.slane %v7366_v61, 7  ;;  %v5252_v36 = vrot.slane %v7365_v15, 7 }
 0xde2   :  { %v5266_v19 = vsel %vm10610_vm2, %v5252_v36, %v5253_v43  ;;  %vm10624_vm2 = vmmov %vm10615_vm3 }
 0xde3   :  { %v5269_v1 = vsel %vm10569_vm5, 0.0, %v5266_v19  ;;  %vm10617_vm5 = vmmov %vm10615_vm3 }
 0xde4   :  { %v5333_v44 = vsel %vm10615_vm3, %v5269_v1, %v7366_v61  ;;  %vm10628_vm3 = vnez %v10588_v48 }
 0xde5   :  { %v5311_v9 = vpop.permute.xlu1 %5310 }
 0xde6   :  { %v5341_v31 = vsel %vm10611_vm13, %v7366_v61, %v5311_v9  ;;  %vm10625_vm13 = vmmov %vm10624_vm2 }
 0xdef   :  { %v7379_v46 = vpop.permute.xlu1 %7378 }
 0xdf0   :  { %v7381_v11 = vunpack.i.h.bf16 %v7379_v46  ;;  %v7380_v7 = vunpack.i.l.bf16 %v7379_v46 }
 0xdf5   :  { %v7369_v32 = vpop.permute.xlu0 %7368 }
 0xdf6   :  { %v7371_v47 = vunpack.i.h.bf16 %v7369_v32  ;;  %v9967_v51 = vunpack.i.l.bf16 %v7369_v32 }
 0xdf7   :  { %v7389_v35 = vpop.permute.xlu1 %7388 }
 0xdf8   :  { %v5259_v45 = vrot.slane %v9967_v51, 7  ;;  %v5340_v25 = vsel %vm10612_vm15, %v7365_v15, %v7371_v47  ;;  %v7391_v29 = vunpack.i.h.bf16 %v7389_v35  ;;  %v7390_v54 = vunpack.i.l.bf16 %v7389_v35  ;;  %vm10626_vm15 = vmmov %vm10624_vm2 }
 0xdf9   :  { %v7374_v3 = vpop.permute.xlu0 %7373  ;;  %v5381_v27 = vpack.c.bf16 %v5341_v31, %v5340_v25 }
 0xdfa   :  { %v5267_v63 = vsel %vm10613_vm1, %v5259_v45, %v5252_v36  ;;  %v7376_v49 = vunpack.i.h.bf16 %v7374_v3  ;;  %v7375_v34 = vunpack.i.l.bf16 %v7374_v3 }
 0xdfb   :  { %v5268_v59 = vsel %vm10614_vm8, 0.0, %v5267_v63  ;;  %5521 = vmatprep.mubr.bf16.mxu0 %v5381_v27  ;;  %vm10627_vm8 = vmmov %vm10613_vm1  ;;  %v5323_v32 = vpop.permute.xlu1 %5322 }
 0xdfc   :  { %v5255_v40 = vrot.slane %v7376_v49, 7  ;;  %v5254_v55 = vrot.slane %v7375_v34, 7  ;;  %v5332_v8 = vsel %vm10616_vm6, %v5268_v59, %v7365_v15  ;;  %v5342_v58 = vsel %vm10617_vm5, %v7375_v34, %v7380_v7  ;;  %vm10630_vm5 = vmmov %vm10624_vm2  ;;  %v6230_v59 = vld [vmem:[#allocation7 + $0x80] ss:$0 sm:$0xff] }
 0xdfd   :  { %v7384_v26 = vpop.permute.xlu0 %7383  ;;  %v5380_v17 = vpack.c.bf16 %v5333_v44, %v5332_v8  ;;  %v5343_v33 = vsel %vm10618_vm4, %v7376_v49, %v7381_v11  ;;  %vm10629_vm6 = vnez %v10590_v24  ;;  %vm10631_vm4 = vmmov %vm10624_vm2  ;;  %v7662_v11 = vld [vmem:[#allocation5 + $0x848] sm:$0xff]  }
 0xdfe   :  { %v7386_v57 = vunpack.i.h.bf16 %v7384_v26  ;;  %v7385_v22 = vunpack.i.l.bf16 %v7384_v26  ;;  %v5383_v5 = vpack.c.bf16 %v5343_v33, %v5342_v58  ;;  %v5264_v12 = vsel %vm10619_vm14, %v5254_v55, %v5255_v40  ;;  %vm10632_vm14 = vmmov %vm10624_vm2 }
 0xdff   :  { %5522 = vmatmul.mubr.bf16.vlgmr.msra.gmra.mrb[128].mxu0 %v5380_v17  ;;  %v5265_v18 = vsel %vm10620_vm12, %v5253_v43, %v5254_v55  ;;  %v5271_v20 = vsel %vm10621_vm10, 0.0, %v5264_v12  ;;  %vm10633_vm12 = vmmov %vm10613_vm1 }
 0xe00   :  { %v5257_v0 = vrot.slane %v7386_v57, 7  ;;  %v5256_v16 = vrot.slane %v7385_v22, 7  ;;  %5529 = vmatprep.mubr.bf16.mxu0 %v5383_v5  ;;  %v5270_v28 = vsel %vm10622_vm9, 0.0, %v5265_v18  ;;  %v5335_v10 = vsel %vm10624_vm2, %v5271_v20, %v7376_v49  ;;  %vm10634_vm10 = vmmov %vm10613_vm1  ;;  %v7660_v49 = vld [vmem:[#allocation5 + $0x838] sm:$0xff]  }
 0xe01   :  { %v7394_v23 = vpop.permute.xlu0 %7393  ;;  %v5334_v37 = vsel %vm10623_vm11, %v5270_v28, %v7375_v34  ;;  %v5344_v60 = vsel %vm10625_vm13, %v7385_v22, %v7390_v54  ;;  %v5345_v39 = vsel %vm10626_vm15, %v7386_v57, %v7391_v29  ;;  %vm10635_vm9 = vmmov %vm10624_vm2  ;;  %6974 = vmatprep.subr.bf16.mxu1 %v7660_v49  ;;  %v7661_v34 = vld [vmem:[#allocation5 + $0x840] sm:$0xff]  }
 0xe02   :  { %v7395_v4 = vunpack.i.l.bf16 %v7394_v23  ;;  %v5262_v2 = vsel %vm10613_vm1, %v5256_v16, %v5257_v0  ;;  %v5263_v42 = vsel %vm10627_vm8, %v5255_v40, %v5256_v16  ;;  %v5382_v50 = vpack.c.bf16 %v5335_v10, %v5334_v37  ;;  %vm10636_vm11 = vmmov %vm10624_vm2  ;;  %6975 = vmatpush3.bf16.msra.mxu1 %v7660_v49 }
 0xe03   :  { %v5385_v61 = vpack.c.bf16 %v5345_v39, %v5344_v60  ;;  %v7396_v15 = vunpack.i.h.bf16 %v7394_v23  ;;  %v5272_v43 = vsel %vm10628_vm3, 0.0, %v5263_v42  ;;  %v5273_v36 = vsel %vm10629_vm6, 0.0, %v5262_v2  ;;  %6976 = vmatprep.subr.bf16.mxu1 %v7661_v34 }
 0xe04   :  { %v5258_v9 = vrot.slane %v7395_v4, 7  ;;  %v5336_v19 = vsel %vm10630_vm5, %v5272_v43, %v7385_v22  ;;  %v5337_v47 = vsel %vm10631_vm4, %v5273_v36, %v7386_v57  ;;  %v5347_v48 = vsel %vm10635_vm9, %v9967_v51, %v5323_v32 }
 0xe05   :  { %v5346_v31 = vsel %vm10632_vm14, %v7395_v4, %v7396_v15  ;;  %v5384_v24 = vpack.c.bf16 %v5337_v47, %v5336_v19 }
 0xe06   :  { %v5260_v46 = vsel %vm10633_vm12, %v5258_v9, %v5259_v45  ;;  %v5261_v25 = vsel %vm10634_vm10, %v5257_v0, %v5258_v9  ;;  %v5387_v1 = vpack.c.bf16 %v5347_v48, %v5346_v31  ;;  %6977 = vmatpush3.bf16.msra.mxu1 %v7661_v34  ;;  %v10639_v34 = vld [vmem:[#allocation25_spill] sm:$0xff] }
 0xe07   :  { %5530 = vmatmul.mubr.bf16.gmra.mrb[132].mxu0 %v5382_v50  ;;  %v5274_v3 = vsel %vm10597_vm0, 0.0, %v5261_v25  ;;  %v5275_v27 = vsel %vm10599_vm7, 0.0, %v5260_v46  ;;  %6978 = vmatprep.subr.bf16.mxu1 %v7662_v11 }
 0xe08   :  { %5537 = vmatprep.mubr.bf16.mxu0 %v5385_v61  ;;  %v5338_v63 = vsel %vm10636_vm11, %v5274_v3, %v7395_v4  ;;  %v5339_v45 = vsel %vm10624_vm2, %v5275_v27, %v9967_v51 }
 0xe09   :  { %v5386_v13 = vpack.c.bf16 %v5339_v45, %v5338_v63  ;;  %v10637_v63 = vld [vmem:[#allocation24_spill] sm:$0xff] }
 0xe0a   :  { %6979 = vmatpush3.bf16.msra.mxu1 %v7662_v11 }
 0xe0b   :  { %6980 = vmatprep.subr.bf16.mxu1 %v7663_v38 }
 0xe0e   :  { %6981 = vmatpush3.bf16.msra.mxu1 %v7663_v38  ;;  %v10640_v38 = vld [vmem:[#allocation23_spill] sm:$0xff] }
 0xe0f   :  { %5538 = vmatmul.mubr.bf16.gmra.mrb[136].mxu0 %v5384_v24  ;;  %6982 = vmatprep.subr.bf16.mxu1 %v7664_v14 }
 0xe10   :  { %5545 = vmatprep.mubr.bf16.mxu0 %v5387_v1 }
 0xe12   :  { %6983 = vmatpush3.bf16.msra.mxu1 %v7664_v14 }
 0xe17   :  { %5546 = vmatmul.mubr.bf16.gmra.mrb[140].mxu0 %v5386_v13  ;;  %v10638_v13 = vld [vmem:[#allocation22_spill] sm:$0xff] }
 0xed2   :  { %v6732_v7 = vpop.f32.mrb[128].mxu0 }
 0xed3   :  { %v6733_v51 = vpop.f32.mrb[129].mxu0 }
 0xed4   :  { %v6734_v44 = vadd.f32 %v6733_v51, %v6732_v7  ;;  %v6735_v40 = vpop.f32.mrb[130].mxu0  ;;  %v6247_v7 = vld [vmem:[#allocation7 + $0x88] ss:$0 sm:$0xff]  ;;  %v7665_v51 = vld [vmem:[#allocation2 + $0x10] sm:$0xff] }
 0xed5   :  { %v6736_v55 = vpop.f32.mrb[131].mxu0 }
 0xed6   :  { %v5524_v8 = vadd.f32 %v6734_v44, %v6230_v59  ;;  %v6737_v26 = vadd.f32 %v6736_v55, %v6735_v40 }
 0xed8   :  { %v5554_v17 = vadd.f32 %v5524_v8, %v9771_v41  ;;  %v5527_v58 = vadd.f32 %v6737_v26, %v6230_v59 }
 0xeda   :  { %v5555_v33 = vadd.f32 %v5527_v58, %v9775_v62  ;;  %v6738_v35 = vpop.f32.mrb[132].mxu0  ;;  %v5562_v22 = vmax.f32 %v5554_v17, 0.0  ;;  %v7668_v17 = vld [vmem:[#allocation2 + $0x8] sm:$0xff] }
 0xedb   :  { %v6739_v57 = vpop.f32.mrb[133].mxu0 }
 0xedc   :  { %v5563_v5 = vmax.f32 %v5555_v33, 0.0  ;;  %v6740_v12 = vadd.f32 %v6739_v57, %v6738_v35  ;;  %v6741_v18 = vpop.f32.mrb[134].mxu0 }
 0xedd   :  { %v6742_v20 = vpop.f32.mrb[135].mxu0 }
 0xede   :  { %v5532_v0 = vadd.f32 %v6740_v12, %v6230_v59  ;;  %v6743_v16 = vadd.f32 %v6742_v20, %v6741_v18  ;;  %v5586_v28 = vpack.c.bf16 %v5563_v5, %v5562_v22 }
 0xee0   :  { %v5556_v29 = vadd.f32 %v5532_v0, %v9769_v53  ;;  %v5535_v54 = vadd.f32 %v6743_v16, %v6230_v59  ;;  %6984 = vmatprep.mubr.bf16.mxu1 %v5586_v28 }
 0xee2   :  { %v5557_v23 = vadd.f32 %v5535_v54, %v9773_v52  ;;  %v6744_v41 = vpop.f32.mrb[136].mxu0  ;;  %v5564_v10 = vmax.f32 %v5556_v29, 0.0 }
 0xee3   :  { %v6745_v37 = vpop.f32.mrb[137].mxu0 }
 0xee4   :  { %v5565_v62 = vmax.f32 %v5557_v23, 0.0  ;;  %v6746_v60 = vadd.f32 %v6745_v37, %v6744_v41  ;;  %v6747_v39 = vpop.f32.mrb[138].mxu0 }
 0xee5   :  { %v6748_v4 = vpop.f32.mrb[139].mxu0 }
 0xee6   :  { %v5587_v2 = vpack.c.bf16 %v5565_v62, %v5564_v10  ;;  %v5540_v42 = vadd.f32 %v6746_v60, %v6230_v59  ;;  %v6749_v50 = vadd.f32 %v6748_v4, %v6747_v39  ;;  %v10641_v62 = vld [vmem:[#allocation28_spill] sm:$0xff]  ;;  %v10642_v39 = vld [vmem:[#allocation26_spill] sm:$0xff] }
 0xee8   :  { %v5558_v61 = vadd.f32 %v5540_v42, %v9805_v30  ;;  %v5543_v15 = vadd.f32 %v6749_v50, %v6230_v59  ;;  %6985 = vmatmul.mubr.bf16.vlgmr.msra.gmra.mrb[128].mxu1 %v5587_v2  ;;  %v10643_v2 = vld [vmem:[#allocation29_spill] sm:$0xff]  ;;  %v10644_v50 = vld [vmem:[#allocation27_spill] sm:$0xff] }
 0xeea   :  { %v5559_v53 = vadd.f32 %v5543_v15, %v9810_v21  ;;  %v6750_v43 = vpop.f32.mrb[140].mxu0  ;;  %v5566_v9 = vmax.f32 %v5558_v61, 0.0  ;;  %v5767_v21 = vld [vmem:[#allocation7 + $0x8] ss:$0 sm:$0xff]  ;;  %v7669_v15 = vld [vmem:[#allocation2 + $0x30] sm:$0xff] }
 0xeeb   :  { %v6751_v36 = vpop.f32.mrb[141].mxu0  ;;  %v748_v45 = vadd.f32 %v5767_v21, %v10637_v63  ;;  %v740_v49 = vadd.f32 %v5767_v21, %v10638_v13  ;;  %v751_v11 = vadd.f32 %v5767_v21, %v10639_v34  ;;  %v743_v14 = vadd.f32 %v5767_v21, %v10640_v38 }
 0xeec   :  { %v5567_v52 = vmax.f32 %v5559_v53, 0.0  ;;  %v6752_v32 = vadd.f32 %v6751_v36, %v6750_v43  ;;  %v6753_v19 = vpop.f32.mrb[142].mxu0  ;;  %v764_v60 = vadd.f32 %v5767_v21, %v10641_v62  ;;  %v756_v4 = vadd.f32 %v5767_v21, %v10642_v39  ;;  %v7670_v43 = vld [vmem:[#allocation2 + $0x20] sm:$0xff] }
 0xeed   :  { %v6754_v47 = vpop.f32.mrb[143].mxu0  ;;  %v771_v58 = vadd.f32 %v7668_v17, %v743_v14  ;;  %v767_v42 = vadd.f32 %v5767_v21, %v10643_v2  ;;  %v759_v61 = vadd.f32 %v5767_v21, %v10644_v50 }
 0xeee   :  { %v5548_v31 = vadd.f32 %v6752_v32, %v6230_v59  ;;  %v6755_v46 = vadd.f32 %v6754_v47, %v6753_v19  ;;  %v5588_v25 = vpack.c.bf16 %v5567_v52, %v5566_v9  ;;  %v776_v53 = vadd.f32 %v7669_v15, %v764_v60  ;;  %v7671_v52 = vld [vmem:[#allocation2 + $0x38] sm:$0xff] }
 0xeef   :  { %v779_v54 = vmax.f32 %v771_v58, 0.0  ;;  %v774_v36 = vadd.f32 %v7670_v43, %v756_v4  ;;  %v777_v32 = vadd.f32 %v7671_v52, %v767_v42 }
 0xef0   :  { %v5560_v48 = vadd.f32 %v5548_v31, %v9801_v6  ;;  %v5551_v24 = vadd.f32 %v6755_v46, %v6230_v59  ;;  %6988 = vmatprep.mubr.bf16.mxu1 %v5588_v25  ;;  %v772_v6 = vadd.f32 %v7665_v51, %v748_v45  ;;  %v7666_v59 = vld [vmem:[#allocation2] sm:$0xff]  ;;  %v7672_v31 = vld [vmem:[#allocation2 + $0x28] sm:$0xff] }
 0xef1   :  { %v770_v44 = vadd.f32 %v7666_v59, %v740_v49  ;;  %v775_v46 = vadd.f32 %v7672_v31, %v759_v61  ;;  %v785_v45 = vmax.f32 %v777_v32, 0.0 }
 0xef2   :  { %v5561_v30 = vadd.f32 %v5551_v24, %v9807_v56  ;;  %v5568_v1 = vmax.f32 %v5560_v48, 0.0  ;;  %v7667_v56 = vld [vmem:[#allocation2 + $0x18] sm:$0xff]  ;;  %v780_v57 = vmax.f32 %v772_v6, 0.0  ;;  %v784_v24 = vmax.f32 %v776_v53, 0.0 }
 0xef3   :  { %v773_v55 = vadd.f32 %v7667_v56, %v751_v11  ;;  %v778_v18 = vmax.f32 %v770_v44, 0.0  ;;  %v783_v34 = vmax.f32 %v775_v46, 0.0 }
 0xef4   :  { %v5569_v3 = vmax.f32 %v5561_v30, 0.0 }
 0xef5   :  { %v781_v16 = vmax.f32 %v773_v55, 0.0 }
 0xef6   :  { %v5589_v27 = vpack.c.bf16 %v5569_v3, %v5568_v1 }
 0xef8   :  { %6989 = vmatmul.mubr.bf16.gmra.mrb[132].mxu1 %v5589_v27  ;;  %v782_v27 = vmax.f32 %v774_v36, 0.0 }
 0xfbb   :  { %v6986_v40 = vpop.f32.mrb[128].mxu1 }
 0xfbc   :  { %v5686_v8 = vadd.f32 %v6986_v40, %v6247_v7  ;;  %v5677_v26 = vpop.f32.mrb[129].mxu1 }
 0xfbd   :  { %v5678_v33 = vadd.f32 %v6247_v7, %v5677_v26  ;;  %v6987_v35 = vpop.f32.mrb[130].mxu1 }
 0xfbe   :  { %v5710_v22 = vmax.f32 %v5686_v8, 0.0  ;;  %v5689_v5 = vadd.f32 %v6987_v35, %v6247_v7  ;;  %v5680_v12 = vpop.f32.mrb[131].mxu1 }
 0xfbf   :  { %v5708_v20 = vmax.f32 %v5678_v33, 0.0  ;;  %v5681_v0 = vadd.f32 %v6247_v7, %v5680_v12 }
 0xfc0   :  { %v5718_v28 = vadd.f32 %v5710_v22, %v780_v57  ;;  %v5711_v29 = vmax.f32 %v5689_v5, 0.0 }
 0xfc1   :  { %v5716_v23 = vadd.f32 %v5708_v20, %v778_v18  ;;  %v5709_v41 = vmax.f32 %v5681_v0, 0.0 }
 0xfc2   :  { %5726 = vst [vmem:[#allocation8 + $0x10] sm:$0xff] %v5718_v28  ;;  %v5719_v37 = vadd.f32 %v5711_v29, %v781_v16 }
 0xfc3   :  { %5724 = vst [vmem:[#allocation8] sm:$0xff] %v5716_v23  ;;  %v5717_v10 = vadd.f32 %v5709_v41, %v779_v54 }
 0xfc4   :  { %5727 = vst [vmem:[#allocation8 + $0x18] sm:$0xff] %v5719_v37 }
 0xfc5   :  { %5725 = vst [vmem:[#allocation8 + $0x8] sm:$0xff] %v5717_v10 }
 0xfcb   :  { %v6990_v9 = vpop.f32.mrb[132].mxu1 }
 0xfcc   :  { %v5702_v19 = vadd.f32 %v6990_v9, %v6247_v7  ;;  %v5693_v47 = vpop.f32.mrb[133].mxu1 }
 0xfcd   :  { %v5694_v25 = vadd.f32 %v6247_v7, %v5693_v47  ;;  %v6991_v48 = vpop.f32.mrb[134].mxu1 }
 0xfce   :  { %v5714_v30 = vmax.f32 %v5702_v19, 0.0  ;;  %v5705_v1 = vadd.f32 %v6991_v48, %v6247_v7  ;;  %v5696_v3 = vpop.f32.mrb[135].mxu1 }
 0xfcf   :  { %v5712_v63 = vmax.f32 %v5694_v25, 0.0  ;;  %v5697_v21 = vadd.f32 %v6247_v7, %v5696_v3 }
 0xfd0   :  { %v5722_v13 = vadd.f32 %v5714_v30, %v784_v24  ;;  %v5715_v49 = vmax.f32 %v5705_v1, 0.0 }
 0xfd1   :  { %v5720_v11 = vadd.f32 %v5712_v63, %v782_v27  ;;  %v5713_v38 = vmax.f32 %v5697_v21, 0.0 }
 0xfd2   :  { %5730 = vst [vmem:[#allocation8 + $0x30] sm:$0xff] %v5722_v13  ;;  %v5723_v14 = vadd.f32 %v5715_v49, %v785_v45 }
 0xfd3   :  { %5728 = vst [vmem:[#allocation8 + $0x20] sm:$0xff] %v5720_v11  ;;  %v5721_v51 = vadd.f32 %v5713_v38, %v783_v34 }
 0xfd4   :  { %5731 = vst [vmem:[#allocation8 + $0x38] sm:$0xff] %v5723_v14 }
 0xfd5   :  { %5729 = vst [vmem:[#allocation8 + $0x28] sm:$0xff] %v5721_v51 }
 0xfd6   :  { %7750 = shalt.err (!%p7747_p0)
}
 0xfd7   :  { %s7751_s29 = scalar_lea.hbm %s10052_s3, 1024 }
 0xfd8   :  { %p7752_p1 = scmp.ne.s32.totalorder %s10052_s3, %s7751_s29  ;;  %p7755_p2 = scmp.lt.u32.totalorder %s7751_s29, %s10052_s3 }
 0xfda   :  { %p7757_p3 = pnand %p7755_p2, %p7752_p1 }
 0xfdc   :  { %7760 = shalt.err (!%p7757_p3)
}
 0xfdd   :  { %5743 = dma.vmem_to_hbm [thread:$0]  %s5738_s25, 1024, %s10052_s3, [#allocation4], %s7771_s1, %s7771_s1, %s7772_s9  }
 0xfde   :  { %7765 = dma.done.wait [#allocation4], 1024  }
 0xfdf   :  { %7766 = vsyncadd [#allocation4], 4294966272 }
 0xfe0   :  { %5747 = vsyncpa [#allocation3], 1 }
 0xfe1   :  { %5748 = vsyncpa [#allocation6], 1 }
 0xfe2   :  { %5749 = vsyncpa [#allocation4], 1 }

</bundles_post_ra>
